<compile_context>
chip_gen: v7x
topology: tpu7x:2x2x1
jax: 0.10.0
libtpu: 0.0.40
codegen_flags: <defaults>
</compile_context>

<pallas_src>
import functools

import jax
import jax.numpy as jnp
from jax import lax
from jax.experimental import pallas as pl
from jax.experimental.pallas import tpu as pltpu

# ----------------------------------------------------------------------------
# Config (small, deterministic, consistent with Ernie4_5_Moe hyper-parameters)
# ----------------------------------------------------------------------------
CFG = dict(
    vocab_size=128,
    hidden_size=128,
    num_attention_heads=4,
    num_key_value_heads=2,
    head_dim=32,
    intermediate_size=256,          # dense MLP layers
    moe_intermediate_size=128,      # per-expert MLP
    moe_num_experts=4,
    moe_k=2,
    moe_num_shared_experts=1,
    num_hidden_layers=2,
    moe_layer_start_index=1,        # layer 0 = dense MLP, layer 1 = MoE
    moe_layer_end_index=1,
    moe_layer_interval=1,
    rms_norm_eps=1e-5,
    rope_theta=500000.0,
)

VMEM = pl.BlockSpec(memory_space=pltpu.MemorySpace.VMEM)
F32 = jnp.float32
BF16 = jnp.bfloat16


# ----------------------------------------------------------------------------
# In-kernel helpers
# ----------------------------------------------------------------------------
def _contract_last(a, b):
    """a @ b.T without materializing a transpose: contract last dims on the MXU."""
    return lax.dot_general(a, b, dimension_numbers=(((1,), (1,)), ((), ())),
                           preferred_element_type=F32)


def _rmsnorm(z, w, eps):
    var = jnp.mean(z * z, axis=-1, keepdims=True)
    return (z * lax.rsqrt(var + eps)) * w


def _swiglu(xb, gu_w, down_w):
    """down( silu(gate) * up ) with a merged gate_up weight (2I, H)."""
    gu = _contract_last(xb, gu_w)                      # (T, 2I) f32
    inter = gu.shape[1] // 2
    g = gu[:, :inter]
    u = gu[:, inter:]
    h = (g * jax.nn.sigmoid(g)) * u                    # f32 elementwise
    return _contract_last(h.astype(down_w.dtype), down_w)


def _attention(nh, nkv, hd, scale, qkv, rotq, rotk, cosq, sinq, cosk, sink, o_w):
    """Fused RoPE + causal GQA attention + o_proj on a (T, q+2kv) slab."""
    T = qkv.shape[0]
    q_size, kv_size = nh * hd, nkv * hd
    q = qkv[:, :q_size]
    k = qkv[:, q_size:q_size + kv_size]
    v = qkv[:, q_size + kv_size:]

    # Full-slab RoPE: x*cos + rotate_half(x)*sin.  rotate_half is a per-head
    # signed half-swap implemented as ONE +-1 permutation matmul (idle MXU),
    # so each head's rotated features stay lane-contiguous for the score dot.
    qr = (q * cosq + _contract_last(q.astype(BF16), rotq) * sinq).astype(BF16)
    kr = (k * cosk + _contract_last(k.astype(BF16), rotk) * sink).astype(BF16)
    vb = v.astype(BF16)

    # TODO(synk): with a (tq, tk) token-block grid, build the causal mask from
    #             program_id offsets instead of a full (T, T) iota.
    row = lax.broadcasted_iota(jnp.int32, (T, T), 0)
    col = lax.broadcasted_iota(jnp.int32, (T, T), 1)
    causal = col <= row

    rep = nh // nkv
    heads = []
    for h in range(nh):
        g = h // rep                                       # GQA: no K/V repeat
        s = _contract_last(qr[:, h * hd:(h + 1) * hd],
                           kr[:, g * hd:(g + 1) * hd]) * scale   # one K=hd push
        s = jnp.where(causal, s, -1e30)
        s = s - jnp.max(s, axis=-1, keepdims=True)
        p = jnp.exp(s)
        p = p * pl.reciprocal(jnp.sum(p, axis=-1, keepdims=True), approx=True)
        heads.append(jnp.dot(p.astype(BF16), vb[:, g * hd:(g + 1) * hd],
                             preferred_element_type=F32))
    attn = jnp.concatenate(heads, axis=-1)                 # (T, q_size) lane-dense
    return _contract_last(attn.astype(BF16), o_w)          # single K=q_size o_proj


# ----------------------------------------------------------------------------
# Kernel 1: fused dense decoder layer (norm+QKV+attn+o_proj+norm+SwiGLU MLP)
# ----------------------------------------------------------------------------
def _dense_layer_kernel(eps, nh, nkv, hd, has_res, *refs):
    if has_res:
        (x_ref, res_ref, inln_ref, qkv_w_ref, rotq_ref, rotk_ref,
         cosq_ref, sinq_ref, cosk_ref, sink_ref, ow_ref, postln_ref,
         gu_ref, down_ref, h_ref, newres_ref) = refs
        z = x_ref[...].astype(F32) + res_ref[...]
    else:  # vLLM residual=None path on the first layer
        (x_ref, inln_ref, qkv_w_ref, rotq_ref, rotk_ref,
         cosq_ref, sinq_ref, cosk_ref, sink_ref, ow_ref, postln_ref,
         gu_ref, down_ref, h_ref, newres_ref) = refs
        z = x_ref[...].astype(F32)

    normed = _rmsnorm(z, inln_ref[...], eps)
    qkv = _contract_last(normed.astype(BF16), qkv_w_ref[...])
    attn = _attention(nh, nkv, hd, float(hd) ** -0.5, qkv,
                      rotq_ref[...], rotk_ref[...],
                      cosq_ref[...], sinq_ref[...], cosk_ref[...], sink_ref[...],
                      ow_ref[...])
    z2 = attn + z
    newres_ref[...] = z2
    normed2 = _rmsnorm(z2, postln_ref[...], eps)
    h_ref[...] = _swiglu(normed2.astype(BF16), gu_ref[...],
                         down_ref[...]).astype(h_ref.dtype)


# ----------------------------------------------------------------------------
# Kernel 2: fused MoE decoder layer (attention + shared expert + router + experts)
# ----------------------------------------------------------------------------
def _moe_layer_kernel(eps, nh, nkv, hd, n_experts, top_k, has_res, *refs):
    if has_res:
        (x_ref, res_ref, inln_ref, qkv_w_ref, rotq_ref, rotk_ref,
         cosq_ref, sinq_ref, cosk_ref, sink_ref, ow_ref, postln_ref,
         gate_ref, bias_ref, sh_gu_ref, sh_down_ref, e_gu_ref, e_down_ref,
         h_ref, newres_ref) = refs
        z = x_ref[...].astype(F32) + res_ref[...]
    else:
        (x_ref, inln_ref, qkv_w_ref, rotq_ref, rotk_ref,
         cosq_ref, sinq_ref, cosk_ref, sink_ref, ow_ref, postln_ref,
         gate_ref, bias_ref, sh_gu_ref, sh_down_ref, e_gu_ref, e_down_ref,
         h_ref, newres_ref) = refs
        z = x_ref[...].astype(F32)

    normed = _rmsnorm(z, inln_ref[...], eps)
    qkv = _contract_last(normed.astype(BF16), qkv_w_ref[...])
    attn = _attention(nh, nkv, hd, float(hd) ** -0.5, qkv,
                      rotq_ref[...], rotk_ref[...],
                      cosq_ref[...], sinq_ref[...], cosk_ref[...], sink_ref[...],
                      ow_ref[...])
    z2 = attn + z
    newres_ref[...] = z2
    normed2 = _rmsnorm(z2, postln_ref[...], eps)
    xb = normed2.astype(BF16)

    # Shared experts (Ernie4_5_MoeMLP)
    acc = _swiglu(xb, sh_gu_ref[...], sh_down_ref[...])

    # Router (all f32): softmax scores; e_score_correction_bias only for expert
    # *selection*; routing weights = unbiased scores of selected, renormalized.
    logits = _contract_last(normed2, gate_ref[...])        # (T, E)
    logits = logits - jnp.max(logits, axis=-1, keepdims=True)
    ex = jnp.exp(logits)
    probs = ex / jnp.sum(ex, axis=-1, keepdims=True)
    choice = probs + bias_ref[...]

    # Top-k selection via rank counting (exact for distinct scores).
    sel_w = []
    wsum = jnp.zeros_like(probs[:, :1])
    for e in range(n_experts):
        c_e = choice[:, e:e + 1]
        n_greater = jnp.sum((choice > c_e).astype(F32), axis=-1, keepdims=True)
        w_e = probs[:, e:e + 1] * (n_greater < top_k).astype(F32)
        sel_w.append(w_e)
        wsum = wsum + w_e
    inv = 1.0 / wsum

    # TODO(synk): dense all-expert dispatch; at production E switch to sparse
    #             group dispatch (scalar-prefetch index_map) and stream expert
    #             weights over an expert grid axis instead of holding them all
    #             resident in VMEM.
    for e in range(n_experts):
        y_e = _swiglu(xb, e_gu_ref[e], e_down_ref[e])
        acc = acc + (sel_w[e] * inv) * y_e

    h_ref[...] = acc.astype(h_ref.dtype)


# ----------------------------------------------------------------------------
# Kernel 3: final fused-add RMSNorm
# ----------------------------------------------------------------------------
def _final_norm_kernel(eps, x_ref, res_ref, w_ref, out_ref):
    z = x_ref[...].astype(F32) + res_ref[...]
    out_ref[...] = _rmsnorm(z, w_ref[...], eps)


# ----------------------------------------------------------------------------
# pallas_call wrappers
# ----------------------------------------------------------------------------
def _layer_call(kernel, args, T, H, has_res):
    return pl.pallas_call(
        kernel,
        out_shape=(jax.ShapeDtypeStruct((T, H), BF16),   # hidden (bf16)
                   jax.ShapeDtypeStruct((T, H), F32)),   # residual (f32 stream)
        in_specs=[VMEM] * len(args),
        out_specs=(VMEM, VMEM),
        input_output_aliases={1: 1} if has_res else {},  # residual in -> out
    )(*args)


def dense_layer(x, residual, lp, rope, rot, eps, nh, nkv, hd):
    T, H = x.shape
    has_res = residual is not None
    kernel = functools.partial(_dense_layer_kernel, eps, nh, nkv, hd, has_res)
    args = [x] + ([residual] if has_res else []) + [
        lp["input_ln"].reshape(1, -1), lp["qkv_w"], rot["rot_q"], rot["rot_k"],
        rope["cos_q"], rope["sin_q"], rope["cos_k"], rope["sin_k"],
        lp["o_w"], lp["post_ln"].reshape(1, -1), lp["mlp_gu"], lp["mlp_down"]]
    return _layer_call(kernel, args, T, H, has_res)


def moe_layer(x, residual, lp, rope, rot, eps, nh, nkv, hd, n_experts, top_k):
    T, H = x.shape
    has_res = residual is not None
    kernel = functools.partial(_moe_layer_kernel, eps, nh, nkv, hd,
                               n_experts, top_k, has_res)
    args = [x] + ([residual] if has_res else []) + [
        lp["input_ln"].reshape(1, -1), lp["qkv_w"], rot["rot_q"], rot["rot_k"],
        rope["cos_q"], rope["sin_q"], rope["cos_k"], rope["sin_k"],
        lp["o_w"], lp["post_ln"].reshape(1, -1),
        lp["gate_w"], lp["e_bias"].reshape(1, -1),
        lp["shared_gu"], lp["shared_down"], lp["expert_gu"], lp["expert_down"]]
    return _layer_call(kernel, args, T, H, has_res)


def final_norm(x, residual, w, eps):
    T, H = x.shape
    return pl.pallas_call(
        functools.partial(_final_norm_kernel, eps),
        out_shape=jax.ShapeDtypeStruct((T, H), F32),
        in_specs=[VMEM] * 3,
        out_specs=VMEM,
    )(x, residual, w.reshape(1, -1))


# ----------------------------------------------------------------------------
# Plain-JAX glue (tiny, hoisted out of kernels)
# ----------------------------------------------------------------------------
def rope_tables(positions, head_dim, base, nh, nkv):
    """cos/sin pre-broadcast to whole Q/K slab widths (per-head [cos|cos] layout)."""
    inv_freq = 1.0 / (base ** (jnp.arange(0, head_dim, 2, dtype=F32) / head_dim))
    freqs = positions.astype(F32)[:, None] * inv_freq[None, :]   # (T, hd/2)
    cos, sin = jnp.cos(freqs), jnp.sin(freqs)
    return dict(cos_q=jnp.tile(cos, (1, 2 * nh)), sin_q=jnp.tile(sin, (1, 2 * nh)),
                cos_k=jnp.tile(cos, (1, 2 * nkv)), sin_k=jnp.tile(sin, (1, 2 * nkv)))


def _rope_permute_rows(w_block, n_heads, head_dim):
    # De-interleave each head's output features ([0,2,...,1,3,...]) so the
    # interleaved (non-neox) RoPE becomes a half-rotation in the kernel.
    # q.k is invariant to this within-head permutation (applied to q AND k).
    perm = jnp.concatenate([jnp.arange(0, head_dim, 2), jnp.arange(1, head_dim, 2)])
    w = w_block.reshape(n_heads, head_dim, -1)[:, perm, :]
    return w.reshape(n_heads * head_dim, -1)


def _rotate_half_matrix(n_heads, head_dim):
    """ROT[out_lane, in_lane] with contract_last(x, ROT) == per-head [-b | a]."""
    n = n_heads * head_dim
    hd2 = head_dim // 2
    idx = jnp.arange(n)
    t = idx % head_dim
    src = jnp.where(t < hd2, idx + hd2, idx - hd2)
    sign = jnp.where(t < hd2, -1.0, 1.0).astype(F32)
    return jnp.zeros((n, n), F32).at[idx, src].set(sign).astype(BF16)


# ----------------------------------------------------------------------------
# Parameter init (deterministic, synthetic)
# ----------------------------------------------------------------------------
def init_params(key, cfg):
    H = cfg["hidden_size"]
    nh, nkv, hd = cfg["num_attention_heads"], cfg["num_key_value_heads"], cfg["head_dim"]
    q_size, kv_size = nh * hd, nkv * hd
    E = cfg["moe_num_experts"]
    Imoe = cfg["moe_intermediate_size"]
    Ish = Imoe * cfg["moe_num_shared_experts"]
    Idense = cfg["intermediate_size"]

    keys = iter(jax.random.split(key, 256))

    def w(shape, scale=0.02, dtype=BF16):
        return (scale * jax.random.normal(next(keys), shape, dtype=F32)).astype(dtype)

    params = dict(
        embed=w((cfg["vocab_size"], H), 1.0, F32),
        final_norm=jnp.ones((H,), F32),
        rot_q=_rotate_half_matrix(nh, hd),
        rot_k=_rotate_half_matrix(nkv, hd),
        layers=[],
    )
    for li in range(cfg["num_hidden_layers"]):
        is_moe = (E > 0 and (li + 1) % cfg["moe_layer_interval"] == 0
                  and cfg["moe_layer_start_index"] <= li <= cfg["moe_layer_end_index"])
        qkv_w = w((q_size + 2 * kv_size, H), dtype=F32)
        qkv_w = jnp.concatenate([
            _rope_permute_rows(qkv_w[:q_size], nh, hd),
            _rope_permute_rows(qkv_w[q_size:q_size + kv_size], nkv, hd),
            qkv_w[q_size + kv_size:],
        ], axis=0).astype(BF16)
        layer = dict(
            input_ln=jnp.ones((H,), F32),
            post_ln=jnp.ones((H,), F32),
            qkv_w=qkv_w,
            o_w=w((H, q_size)),
        )
        if is_moe:
            layer["gate_w"] = w((E, H), dtype=F32)          # router stays f32
            layer["e_bias"] = w((E,), 0.1, F32)
            layer["shared_gu"] = w((2 * Ish, H))            # merged gate_up
            layer["shared_down"] = w((H, Ish))
            layer["expert_gu"] = w((E, 2 * Imoe, H))        # stacked experts
            layer["expert_down"] = w((E, H, Imoe))
        else:
            layer["mlp_gu"] = w((2 * Idense, H))
            layer["mlp_down"] = w((H, Idense))
        params["layers"].append(layer)
    return params


# ----------------------------------------------------------------------------
# Model forward
# ----------------------------------------------------------------------------
def ernie45_moe_model(params, input_ids, positions, cfg):
    nh, nkv, hd = cfg["num_attention_heads"], cfg["num_key_value_heads"], cfg["head_dim"]
    eps = cfg["rms_norm_eps"]
    h = jnp.take(params["embed"], input_ids, axis=0)        # embedding gather (glue)
    rope = rope_tables(positions, hd, cfg["rope_theta"], nh, nkv)
    rot = dict(rot_q=params["rot_q"], rot_k=params["rot_k"])
    residual = None
    for lp in params["layers"]:
        if "gate_w" in lp:
            h, residual = moe_layer(h, residual, lp, rope, rot, eps, nh, nkv, hd,
                                    cfg["moe_num_experts"], cfg["moe_k"])
        else:
            h, residual = dense_layer(h, residual, lp, rope, rot, eps, nh, nkv, hd)
    return final_norm(h, residual, params["final_norm"], eps)


# ----------------------------------------------------------------------------
# Main
# ----------------------------------------------------------------------------
if __name__ == "__main__":
    key = jax.random.PRNGKey(0)
    k_params, k_ids = jax.random.split(key)

    params = init_params(k_params, CFG)

    T = 8
    input_ids = jax.random.randint(k_ids, (T,), 0, CFG["vocab_size"], dtype=jnp.int32)
    positions = jnp.arange(T, dtype=jnp.int32)

    forward = jax.jit(functools.partial(ernie45_moe_model, cfg=CFG))
    out = jax.block_until_ready(forward(params, input_ids, positions))

    assert out.shape == (T, CFG["hidden_size"])
    assert bool(jnp.all(jnp.isfinite(out)))
    print("KERNEL_OK")
</pallas_src>

<mosaic_0001>
module attributes {stable_mosaic.version = 11 : i64} {
  func.func @_final_norm_kernel(%arg0: memref<8x128xbf16, #tpu.memory_space<vmem>>, %arg1: memref<8x128xf32, #tpu.memory_space<vmem>>, %arg2: memref<1x128xf32, #tpu.memory_space<vmem>>, %arg3: memref<8x128xf32, #tpu.memory_space<vmem>>) attributes {dimension_semantics = [], scalar_prefetch = 0 : i64, scratch_operands = 0 : i64, tpu.core_type = #tpu.core_type<tc>} {
    %c0 = arith.constant 0 : index
    %c0_0 = arith.constant 0 : index
    %0 = vector.load %arg0[%c0, %c0_0] : memref<8x128xbf16, #tpu.memory_space<vmem>>, vector<8x128xbf16>
    %1 = arith.extf %0 : vector<8x128xbf16> to vector<8x128xf32>
    %c0_1 = arith.constant 0 : index
    %c0_2 = arith.constant 0 : index
    %2 = vector.load %arg1[%c0_1, %c0_2] : memref<8x128xf32, #tpu.memory_space<vmem>>, vector<8x128xf32>
    %3 = arith.addf %1, %2 : vector<8x128xf32>
    %c0_3 = arith.constant 0 : index
    %c0_4 = arith.constant 0 : index
    %4 = vector.load %arg2[%c0_3, %c0_4] : memref<1x128xf32, #tpu.memory_space<vmem>>, vector<1x128xf32>
    %5 = arith.mulf %3, %3 : vector<8x128xf32>
    %cst = arith.constant dense<0.000000e+00> : vector<8xf32>
    %6 = vector.multi_reduction <add>, %5, %cst [1] : vector<8x128xf32> to vector<8xf32>
    %7 = vector.shape_cast %6 : vector<8xf32> to vector<8x1xf32>
    %cst_5 = arith.constant 1.280000e+02 : f32
    %8 = vector.broadcast %cst_5 : f32 to vector<8x1xf32>
    %9 = arith.divf %7, %8 : vector<8x1xf32>
    %cst_6 = arith.constant 9.99999974E-6 : f32
    %10 = vector.broadcast %cst_6 : f32 to vector<8x1xf32>
    %11 = arith.addf %9, %10 : vector<8x1xf32>
    %12 = math.rsqrt %11 : vector<8x1xf32>
    %13 = vector.broadcast %12 : vector<8x1xf32> to vector<8x128xf32>
    %14 = arith.mulf %3, %13 : vector<8x128xf32>
    %15 = vector.broadcast %4 : vector<1x128xf32> to vector<8x128xf32>
    %16 = arith.mulf %14, %15 : vector<8x128xf32>
    %c0_7 = arith.constant 0 : index
    %c0_8 = arith.constant 0 : index
    %17 = vector.load %arg3[%c0_7, %c0_8] : memref<8x128xf32, #tpu.memory_space<vmem>>, vector<8x128xf32>
    tpu.vector_store %arg3[%c0_7, %c0_8], %16 {strides = array<i32>} : memref<8x128xf32, #tpu.memory_space<vmem>>, vector<8x128xf32>,
    return
  }
}

module attributes {stable_mosaic.version = 11 : i64} {
  func.func @_dense_layer_kernel(%arg0: memref<8x128xf32, #tpu.memory_space<vmem>>, %arg1: memref<1x128xf32, #tpu.memory_space<vmem>>, %arg2: memref<256x128xbf16, #tpu.memory_space<vmem>>, %arg3: memref<128x128xbf16, #tpu.memory_space<vmem>>, %arg4: memref<64x64xbf16, #tpu.memory_space<vmem>>, %arg5: memref<8x128xf32, #tpu.memory_space<vmem>>, %arg6: memref<8x128xf32, #tpu.memory_space<vmem>>, %arg7: memref<8x64xf32, #tpu.memory_space<vmem>>, %arg8: memref<8x64xf32, #tpu.memory_space<vmem>>, %arg9: memref<128x128xbf16, #tpu.memory_space<vmem>>, %arg10: memref<1x128xf32, #tpu.memory_space<vmem>>, %arg11: memref<512x128xbf16, #tpu.memory_space<vmem>>, %arg12: memref<128x256xbf16, #tpu.memory_space<vmem>>, %arg13: memref<8x128xbf16, #tpu.memory_space<vmem>>, %arg14: memref<8x128xf32, #tpu.memory_space<vmem>>) attributes {dimension_semantics = [], scalar_prefetch = 0 : i64, scratch_operands = 0 : i64, tpu.core_type = #tpu.core_type<tc>} {
    %c0 = arith.constant 0 : index
    %c0_0 = arith.constant 0 : index
    %0 = vector.load %arg0[%c0, %c0_0] : memref<8x128xf32, #tpu.memory_space<vmem>>, vector<8x128xf32>
    %c0_1 = arith.constant 0 : index
    %c0_2 = arith.constant 0 : index
    %1 = vector.load %arg1[%c0_1, %c0_2] : memref<1x128xf32, #tpu.memory_space<vmem>>, vector<1x128xf32>
    %2 = arith.mulf %0, %0 : vector<8x128xf32>
    %cst = arith.constant dense<0.000000e+00> : vector<8xf32>
    %3 = vector.multi_reduction <add>, %2, %cst [1] : vector<8x128xf32> to vector<8xf32>
    %4 = vector.shape_cast %3 : vector<8xf32> to vector<8x1xf32>
    %cst_3 = arith.constant 1.280000e+02 : f32
    %5 = vector.broadcast %cst_3 : f32 to vector<8x1xf32>
    %6 = arith.divf %4, %5 : vector<8x1xf32>
    %cst_4 = arith.constant 9.99999974E-6 : f32
    %7 = vector.broadcast %cst_4 : f32 to vector<8x1xf32>
    %8 = arith.addf %6, %7 : vector<8x1xf32>
    %9 = math.rsqrt %8 : vector<8x1xf32>
    %10 = vector.broadcast %9 : vector<8x1xf32> to vector<8x128xf32>
    %11 = arith.mulf %0, %10 : vector<8x128xf32>
    %12 = vector.broadcast %1 : vector<1x128xf32> to vector<8x128xf32>
    %13 = arith.mulf %11, %12 : vector<8x128xf32>
    %14 = arith.truncf %13 : vector<8x128xf32> to vector<8x128xbf16>
    %c0_5 = arith.constant 0 : index
    %c0_6 = arith.constant 0 : index
    %15 = vector.load %arg2[%c0_5, %c0_6] : memref<256x128xbf16, #tpu.memory_space<vmem>>, vector<256x128xbf16>
    %cst_7 = arith.constant dense<0.000000e+00> : vector<8x256xf32>
    %16 = tpu.matmul %14, %15, %cst_7 {dimension_numbers = #tpu.dot_dimension_numbers<[1], [1], [0], [0], [0, 0, 1, 0], [], []>} : vector<8x128xbf16>, vector<256x128xbf16>, vector<8x256xf32> -> vector<8x256xf32>
    %c0_8 = arith.constant 0 : index
    %c0_9 = arith.constant 0 : index
    %17 = vector.load %arg3[%c0_8, %c0_9] : memref<128x128xbf16, #tpu.memory_space<vmem>>, vector<128x128xbf16>
    %c0_10 = arith.constant 0 : index
    %c0_11 = arith.constant 0 : index
    %18 = vector.load %arg4[%c0_10, %c0_11] : memref<64x64xbf16, #tpu.memory_space<vmem>>, vector<64x64xbf16>
    %c0_12 = arith.constant 0 : index
    %c0_13 = arith.constant 0 : index
    %19 = vector.load %arg5[%c0_12, %c0_13] : memref<8x128xf32, #tpu.memory_space<vmem>>, vector<8x128xf32>
    %c0_14 = arith.constant 0 : index
    %c0_15 = arith.constant 0 : index
    %20 = vector.load %arg6[%c0_14, %c0_15] : memref<8x128xf32, #tpu.memory_space<vmem>>, vector<8x128xf32>
    %c0_16 = arith.constant 0 : index
    %c0_17 = arith.constant 0 : index
    %21 = vector.load %arg7[%c0_16, %c0_17] : memref<8x64xf32, #tpu.memory_space<vmem>>, vector<8x64xf32>
    %c0_18 = arith.constant 0 : index
    %c0_19 = arith.constant 0 : index
    %22 = vector.load %arg8[%c0_18, %c0_19] : memref<8x64xf32, #tpu.memory_space<vmem>>, vector<8x64xf32>
    %c0_20 = arith.constant 0 : index
    %c0_21 = arith.constant 0 : index
    %23 = vector.load %arg9[%c0_20, %c0_21] : memref<128x128xbf16, #tpu.memory_space<vmem>>, vector<128x128xbf16>
    %24 = vector.extract_strided_slice %16 {offsets = [0, 0], sizes = [8, 128], strides = [1, 1]} : vector<8x256xf32> to vector<8x128xf32>
    %25 = vector.extract_strided_slice %16 {offsets = [0, 128], sizes = [8, 64], strides = [1, 1]} : vector<8x256xf32> to vector<8x64xf32>
    %26 = vector.extract_strided_slice %16 {offsets = [0, 192], sizes = [8, 64], strides = [1, 1]} : vector<8x256xf32> to vector<8x64xf32>
    %27 = arith.mulf %24, %19 : vector<8x128xf32>
    %28 = arith.truncf %24 : vector<8x128xf32> to vector<8x128xbf16>
    %cst_22 = arith.constant dense<0.000000e+00> : vector<8x128xf32>
    %29 = tpu.matmul %28, %17, %cst_22 {dimension_numbers = #tpu.dot_dimension_numbers<[1], [1], [0], [0], [0, 0, 1, 0], [], []>} : vector<8x128xbf16>, vector<128x128xbf16>, vector<8x128xf32> -> vector<8x128xf32>
    %30 = arith.mulf %29, %20 : vector<8x128xf32>
    %31 = arith.addf %27, %30 : vector<8x128xf32>
    %32 = arith.truncf %31 : vector<8x128xf32> to vector<8x128xbf16>
    %33 = arith.mulf %25, %21 : vector<8x64xf32>
    %34 = arith.truncf %25 : vector<8x64xf32> to vector<8x64xbf16>
    %cst_23 = arith.constant dense<0.000000e+00> : vector<8x64xf32>
    %35 = tpu.matmul %34, %18, %cst_23 {dimension_numbers = #tpu.dot_dimension_numbers<[1], [1], [0], [0], [0, 0, 1, 0], [], []>} : vector<8x64xbf16>, vector<64x64xbf16>, vector<8x64xf32> -> vector<8x64xf32>
    %36 = arith.mulf %35, %22 : vector<8x64xf32>
    %37 = arith.addf %33, %36 : vector<8x64xf32>
    %38 = arith.truncf %37 : vector<8x64xf32> to vector<8x64xbf16>
    %39 = arith.truncf %26 : vector<8x64xf32> to vector<8x64xbf16>
    %40 = tpu.iota {dimensions = array<i32: 0>} : vector<8x8xi32>
    %41 = tpu.iota {dimensions = array<i32: 1>} : vector<8x8xi32>
    %42 = arith.cmpi sle, %41, %40 : vector<8x8xi32>
    %43 = vector.extract_strided_slice %32 {offsets = [0, 0], sizes = [8, 32], strides = [1, 1]} : vector<8x128xbf16> to vector<8x32xbf16>
    %44 = vector.extract_strided_slice %38 {offsets = [0, 0], sizes = [8, 32], strides = [1, 1]} : vector<8x64xbf16> to vector<8x32xbf16>
    %cst_24 = arith.constant dense<0.000000e+00> : vector<8x8xf32>
    %45 = tpu.matmul %43, %44, %cst_24 {dimension_numbers = #tpu.dot_dimension_numbers<[1], [1], [0], [0], [0, 0, 1, 0], [], []>} : vector<8x32xbf16>, vector<8x32xbf16>, vector<8x8xf32> -> vector<8x8xf32>
    %cst_25 = arith.constant 0.176776692 : f32
    %46 = vector.broadcast %cst_25 : f32 to vector<8x8xf32>
    %47 = arith.mulf %45, %46 : vector<8x8xf32>
    %cst_26 = arith.constant -1.000000e+30 : f32
    %48 = vector.broadcast %cst_26 : f32 to vector<8x8xf32>
    %49 = arith.select %42, %47, %48 : vector<8x8xi1>, vector<8x8xf32>
    %cst_27 = arith.constant dense<0xFF800000> : vector<8xf32>
    %50 = vector.multi_reduction <maximumf>, %49, %cst_27 [1] : vector<8x8xf32> to vector<8xf32>
    %51 = vector.shape_cast %50 : vector<8xf32> to vector<8x1xf32>
    %52 = vector.broadcast %51 : vector<8x1xf32> to vector<8x8xf32>
    %53 = arith.subf %49, %52 : vector<8x8xf32>
    %54 = math.exp %53 : vector<8x8xf32>
    %cst_28 = arith.constant dense<0.000000e+00> : vector<8xf32>
    %55 = vector.multi_reduction <add>, %54, %cst_28 [1] : vector<8x8xf32> to vector<8xf32>
    %56 = vector.shape_cast %55 : vector<8xf32> to vector<8x1xf32>
    %57 = tpu.reciprocal %56 {approx = true} : vector<8x1xf32> -> vector<8x1xf32>
    %58 = vector.broadcast %57 : vector<8x1xf32> to vector<8x8xf32>
    %59 = arith.mulf %54, %58 : vector<8x8xf32>
    %60 = arith.truncf %59 : vector<8x8xf32> to vector<8x8xbf16>
    %61 = vector.extract_strided_slice %39 {offsets = [0, 0], sizes = [8, 32], strides = [1, 1]} : vector<8x64xbf16> to vector<8x32xbf16>
    %cst_29 = arith.constant dense<0.000000e+00> : vector<8x32xf32>
    %62 = tpu.matmul %60, %61, %cst_29 {dimension_numbers = #tpu.dot_dimension_numbers<[1], [0], [0], [1], [0, 0, 1, 1], [], []>} : vector<8x8xbf16>, vector<8x32xbf16>, vector<8x32xf32> -> vector<8x32xf32>
    %63 = vector.extract_strided_slice %32 {offsets = [0, 32], sizes = [8, 32], strides = [1, 1]} : vector<8x128xbf16> to vector<8x32xbf16>
    %64 = vector.extract_strided_slice %38 {offsets = [0, 0], sizes = [8, 32], strides = [1, 1]} : vector<8x64xbf16> to vector<8x32xbf16>
    %cst_30 = arith.constant dense<0.000000e+00> : vector<8x8xf32>
    %65 = tpu.matmul %63, %64, %cst_30 {dimension_numbers = #tpu.dot_dimension_numbers<[1], [1], [0], [0], [0, 0, 1, 0], [], []>} : vector<8x32xbf16>, vector<8x32xbf16>, vector<8x8xf32> -> vector<8x8xf32>
    %cst_31 = arith.constant 0.176776692 : f32
    %66 = vector.broadcast %cst_31 : f32 to vector<8x8xf32>
    %67 = arith.mulf %65, %66 : vector<8x8xf32>
    %cst_32 = arith.constant -1.000000e+30 : f32
    %68 = vector.broadcast %cst_32 : f32 to vector<8x8xf32>
    %69 = arith.select %42, %67, %68 : vector<8x8xi1>, vector<8x8xf32>
    %cst_33 = arith.constant dense<0xFF800000> : vector<8xf32>
    %70 = vector.multi_reduction <maximumf>, %69, %cst_33 [1] : vector<8x8xf32> to vector<8xf32>
    %71 = vector.shape_cast %70 : vector<8xf32> to vector<8x1xf32>
    %72 = vector.broadcast %71 : vector<8x1xf32> to vector<8x8xf32>
    %73 = arith.subf %69, %72 : vector<8x8xf32>
    %74 = math.exp %73 : vector<8x8xf32>
    %cst_34 = arith.constant dense<0.000000e+00> : vector<8xf32>
    %75 = vector.multi_reduction <add>, %74, %cst_34 [1] : vector<8x8xf32> to vector<8xf32>
    %76 = vector.shape_cast %75 : vector<8xf32> to vector<8x1xf32>
    %77 = tpu.reciprocal %76 {approx = true} : vector<8x1xf32> -> vector<8x1xf32>
    %78 = vector.broadcast %77 : vector<8x1xf32> to vector<8x8xf32>
    %79 = arith.mulf %74, %78 : vector<8x8xf32>
    %80 = arith.truncf %79 : vector<8x8xf32> to vector<8x8xbf16>
    %81 = vector.extract_strided_slice %39 {offsets = [0, 0], sizes = [8, 32], strides = [1, 1]} : vector<8x64xbf16> to vector<8x32xbf16>
    %cst_35 = arith.constant dense<0.000000e+00> : vector<8x32xf32>
    %82 = tpu.matmul %80, %81, %cst_35 {dimension_numbers = #tpu.dot_dimension_numbers<[1], [0], [0], [1], [0, 0, 1, 1], [], []>} : vector<8x8xbf16>, vector<8x32xbf16>, vector<8x32xf32> -> vector<8x32xf32>
    %83 = vector.extract_strided_slice %32 {offsets = [0, 64], sizes = [8, 32], strides = [1, 1]} : vector<8x128xbf16> to vector<8x32xbf16>
    %84 = vector.extract_strided_slice %38 {offsets = [0, 32], sizes = [8, 32], strides = [1, 1]} : vector<8x64xbf16> to vector<8x32xbf16>
    %cst_36 = arith.constant dense<0.000000e+00> : vector<8x8xf32>
    %85 = tpu.matmul %83, %84, %cst_36 {dimension_numbers = #tpu.dot_dimension_numbers<[1], [1], [0], [0], [0, 0, 1, 0], [], []>} : vector<8x32xbf16>, vector<8x32xbf16>, vector<8x8xf32> -> vector<8x8xf32>
    %cst_37 = arith.constant 0.176776692 : f32
    %86 = vector.broadcast %cst_37 : f32 to vector<8x8xf32>
    %87 = arith.mulf %85, %86 : vector<8x8xf32>
    %cst_38 = arith.constant -1.000000e+30 : f32
    %88 = vector.broadcast %cst_38 : f32 to vector<8x8xf32>
    %89 = arith.select %42, %87, %88 : vector<8x8xi1>, vector<8x8xf32>
    %cst_39 = arith.constant dense<0xFF800000> : vector<8xf32>
    %90 = vector.multi_reduction <maximumf>, %89, %cst_39 [1] : vector<8x8xf32> to vector<8xf32>
    %91 = vector.shape_cast %90 : vector<8xf32> to vector<8x1xf32>
    %92 = vector.broadcast %91 : vector<8x1xf32> to vector<8x8xf32>
    %93 = arith.subf %89, %92 : vector<8x8xf32>
    %94 = math.exp %93 : vector<8x8xf32>
    %cst_40 = arith.constant dense<0.000000e+00> : vector<8xf32>
    %95 = vector.multi_reduction <add>, %94, %cst_40 [1] : vector<8x8xf32> to vector<8xf32>
    %96 = vector.shape_cast %95 : vector<8xf32> to vector<8x1xf32>
    %97 = tpu.reciprocal %96 {approx = true} : vector<8x1xf32> -> vector<8x1xf32>
    %98 = vector.broadcast %97 : vector<8x1xf32> to vector<8x8xf32>
    %99 = arith.mulf %94, %98 : vector<8x8xf32>
    %100 = arith.truncf %99 : vector<8x8xf32> to vector<8x8xbf16>
    %101 = vector.extract_strided_slice %39 {offsets = [0, 32], sizes = [8, 32], strides = [1, 1]} : vector<8x64xbf16> to vector<8x32xbf16>
    %cst_41 = arith.constant dense<0.000000e+00> : vector<8x32xf32>
    %102 = tpu.matmul %100, %101, %cst_41 {dimension_numbers = #tpu.dot_dimension_numbers<[1], [0], [0], [1], [0, 0, 1, 1], [], []>} : vector<8x8xbf16>, vector<8x32xbf16>, vector<8x32xf32> -> vector<8x32xf32>
    %103 = vector.extract_strided_slice %32 {offsets = [0, 96], sizes = [8, 32], strides = [1, 1]} : vector<8x128xbf16> to vector<8x32xbf16>
    %104 = vector.extract_strided_slice %38 {offsets = [0, 32], sizes = [8, 32], strides = [1, 1]} : vector<8x64xbf16> to vector<8x32xbf16>
    %cst_42 = arith.constant dense<0.000000e+00> : vector<8x8xf32>
    %105 = tpu.matmul %103, %104, %cst_42 {dimension_numbers = #tpu.dot_dimension_numbers<[1], [1], [0], [0], [0, 0, 1, 0], [], []>} : vector<8x32xbf16>, vector<8x32xbf16>, vector<8x8xf32> -> vector<8x8xf32>
    %cst_43 = arith.constant 0.176776692 : f32
    %106 = vector.broadcast %cst_43 : f32 to vector<8x8xf32>
    %107 = arith.mulf %105, %106 : vector<8x8xf32>
    %cst_44 = arith.constant -1.000000e+30 : f32
    %108 = vector.broadcast %cst_44 : f32 to vector<8x8xf32>
    %109 = arith.select %42, %107, %108 : vector<8x8xi1>, vector<8x8xf32>
    %cst_45 = arith.constant dense<0xFF800000> : vector<8xf32>
    %110 = vector.multi_reduction <maximumf>, %109, %cst_45 [1] : vector<8x8xf32> to vector<8xf32>
    %111 = vector.shape_cast %110 : vector<8xf32> to vector<8x1xf32>
    %112 = vector.broadcast %111 : vector<8x1xf32> to vector<8x8xf32>
    %113 = arith.subf %109, %112 : vector<8x8xf32>
    %114 = math.exp %113 : vector<8x8xf32>
    %cst_46 = arith.constant dense<0.000000e+00> : vector<8xf32>
    %115 = vector.multi_reduction <add>, %114, %cst_46 [1] : vector<8x8xf32> to vector<8xf32>
    %116 = vector.shape_cast %115 : vector<8xf32> to vector<8x1xf32>
    %117 = tpu.reciprocal %116 {approx = true} : vector<8x1xf32> -> vector<8x1xf32>
    %118 = vector.broadcast %117 : vector<8x1xf32> to vector<8x8xf32>
    %119 = arith.mulf %114, %118 : vector<8x8xf32>
    %120 = arith.truncf %119 : vector<8x8xf32> to vector<8x8xbf16>
    %121 = vector.extract_strided_slice %39 {offsets = [0, 32], sizes = [8, 32], strides = [1, 1]} : vector<8x64xbf16> to vector<8x32xbf16>
    %cst_47 = arith.constant dense<0.000000e+00> : vector<8x32xf32>
    %122 = tpu.matmul %120, %121, %cst_47 {dimension_numbers = #tpu.dot_dimension_numbers<[1], [0], [0], [1], [0, 0, 1, 1], [], []>} : vector<8x8xbf16>, vector<8x32xbf16>, vector<8x32xf32> -> vector<8x32xf32>
    %123 = tpu.concatenate %62, %82, %102, %122 in 1 : vector<8x32xf32>, vector<8x32xf32>, vector<8x32xf32>, vector<8x32xf32> -> vector<8x128xf32>
    %124 = arith.truncf %123 : vector<8x128xf32> to vector<8x128xbf16>
    %cst_48 = arith.constant dense<0.000000e+00> : vector<8x128xf32>
    %125 = tpu.matmul %124, %23, %cst_48 {dimension_numbers = #tpu.dot_dimension_numbers<[1], [1], [0], [0], [0, 0, 1, 0], [], []>} : vector<8x128xbf16>, vector<128x128xbf16>, vector<8x128xf32> -> vector<8x128xf32>
    %126 = arith.addf %125, %0 : vector<8x128xf32>
    %c0_49 = arith.constant 0 : index
    %c0_50 = arith.constant 0 : index
    %127 = vector.load %arg14[%c0_49, %c0_50] : memref<8x128xf32, #tpu.memory_space<vmem>>, vector<8x128xf32>
    tpu.vector_store %arg14[%c0_49, %c0_50], %126 {strides = array<i32>} : memref<8x128xf32, #tpu.memory_space<vmem>>, vector<8x128xf32>,
    %c0_51 = arith.constant 0 : index
    %c0_52 = arith.constant 0 : index
    %128 = vector.load %arg10[%c0_51, %c0_52] : memref<1x128xf32, #tpu.memory_space<vmem>>, vector<1x128xf32>
    %129 = arith.mulf %126, %126 : vector<8x128xf32>
    %cst_53 = arith.constant dense<0.000000e+00> : vector<8xf32>
    %130 = vector.multi_reduction <add>, %129, %cst_53 [1] : vector<8x128xf32> to vector<8xf32>
    %131 = vector.shape_cast %130 : vector<8xf32> to vector<8x1xf32>
    %cst_54 = arith.constant 1.280000e+02 : f32
    %132 = vector.broadcast %cst_54 : f32 to vector<8x1xf32>
    %133 = arith.divf %131, %132 : vector<8x1xf32>
    %cst_55 = arith.constant 9.99999974E-6 : f32
    %134 = vector.broadcast %cst_55 : f32 to vector<8x1xf32>
    %135 = arith.addf %133, %134 : vector<8x1xf32>
    %136 = math.rsqrt %135 : vector<8x1xf32>
    %137 = vector.broadcast %136 : vector<8x1xf32> to vector<8x128xf32>
    %138 = arith.mulf %126, %137 : vector<8x128xf32>
    %139 = vector.broadcast %128 : vector<1x128xf32> to vector<8x128xf32>
    %140 = arith.mulf %138, %139 : vector<8x128xf32>
    %141 = arith.truncf %140 : vector<8x128xf32> to vector<8x128xbf16>
    %c0_56 = arith.constant 0 : index
    %c0_57 = arith.constant 0 : index
    %142 = vector.load %arg11[%c0_56, %c0_57] : memref<512x128xbf16, #tpu.memory_space<vmem>>, vector<512x128xbf16>
    %c0_58 = arith.constant 0 : index
    %c0_59 = arith.constant 0 : index
    %143 = vector.load %arg12[%c0_58, %c0_59] : memref<128x256xbf16, #tpu.memory_space<vmem>>, vector<128x256xbf16>
    %cst_60 = arith.constant dense<0.000000e+00> : vector<8x512xf32>
    %144 = tpu.matmul %141, %142, %cst_60 {dimension_numbers = #tpu.dot_dimension_numbers<[1], [1], [0], [0], [0, 0, 1, 0], [], []>} : vector<8x128xbf16>, vector<512x128xbf16>, vector<8x512xf32> -> vector<8x512xf32>
    %145 = vector.extract_strided_slice %144 {offsets = [0, 0], sizes = [8, 256], strides = [1, 1]} : vector<8x512xf32> to vector<8x256xf32>
    %146 = vector.extract_strided_slice %144 {offsets = [0, 256], sizes = [8, 256], strides = [1, 1]} : vector<8x512xf32> to vector<8x256xf32>
    %147 = arith.negf %145 : vector<8x256xf32>
    %148 = math.exp %147 : vector<8x256xf32>
    %cst_61 = arith.constant 1.000000e+00 : f32
    %149 = vector.broadcast %cst_61 : f32 to vector<8x256xf32>
    %150 = arith.addf %149, %148 : vector<8x256xf32>
    %151 = arith.divf %149, %150 : vector<8x256xf32>
    %152 = arith.mulf %145, %151 : vector<8x256xf32>
    %153 = arith.mulf %152, %146 : vector<8x256xf32>
    %154 = arith.truncf %153 : vector<8x256xf32> to vector<8x256xbf16>
    %cst_62 = arith.constant dense<0.000000e+00> : vector<8x128xf32>
    %155 = tpu.matmul %154, %143, %cst_62 {dimension_numbers = #tpu.dot_dimension_numbers<[1], [1], [0], [0], [0, 0, 1, 0], [], []>} : vector<8x256xbf16>, vector<128x256xbf16>, vector<8x128xf32> -> vector<8x128xf32>
    %156 = arith.truncf %155 : vector<8x128xf32> to vector<8x128xbf16>
    %c0_63 = arith.constant 0 : index
    %c0_64 = arith.constant 0 : index
    %157 = vector.load %arg13[%c0_63, %c0_64] : memref<8x128xbf16, #tpu.memory_space<vmem>>, vector<8x128xbf16>
    tpu.vector_store %arg13[%c0_63, %c0_64], %156 {strides = array<i32>} : memref<8x128xbf16, #tpu.memory_space<vmem>>, vector<8x128xbf16>,
    return
  }
}

module attributes {stable_mosaic.version = 11 : i64} {
  func.func @_moe_layer_kernel(%arg0: memref<8x128xbf16, #tpu.memory_space<vmem>>, %arg1: memref<8x128xf32, #tpu.memory_space<vmem>>, %arg2: memref<1x128xf32, #tpu.memory_space<vmem>>, %arg3: memref<256x128xbf16, #tpu.memory_space<vmem>>, %arg4: memref<128x128xbf16, #tpu.memory_space<vmem>>, %arg5: memref<64x64xbf16, #tpu.memory_space<vmem>>, %arg6: memref<8x128xf32, #tpu.memory_space<vmem>>, %arg7: memref<8x128xf32, #tpu.memory_space<vmem>>, %arg8: memref<8x64xf32, #tpu.memory_space<vmem>>, %arg9: memref<8x64xf32, #tpu.memory_space<vmem>>, %arg10: memref<128x128xbf16, #tpu.memory_space<vmem>>, %arg11: memref<1x128xf32, #tpu.memory_space<vmem>>, %arg12: memref<4x128xf32, #tpu.memory_space<vmem>>, %arg13: memref<1x4xf32, #tpu.memory_space<vmem>>, %arg14: memref<256x128xbf16, #tpu.memory_space<vmem>>, %arg15: memref<128x128xbf16, #tpu.memory_space<vmem>>, %arg16: memref<4x256x128xbf16, #tpu.memory_space<vmem>>, %arg17: memref<4x128x128xbf16, #tpu.memory_space<vmem>>, %arg18: memref<8x128xbf16, #tpu.memory_space<vmem>>, %arg19: memref<8x128xf32, #tpu.memory_space<vmem>>) attributes {dimension_semantics = [], scalar_prefetch = 0 : i64, scratch_operands = 0 : i64, tpu.core_type = #tpu.core_type<tc>} {
    %c0 = arith.constant 0 : index
    %c0_0 = arith.constant 0 : index
    %0 = vector.load %arg0[%c0, %c0_0] : memref<8x128xbf16, #tpu.memory_space<vmem>>, vector<8x128xbf16>
    %1 = arith.extf %0 : vector<8x128xbf16> to vector<8x128xf32>
    %c0_1 = arith.constant 0 : index
    %c0_2 = arith.constant 0 : index
    %2 = vector.load %arg1[%c0_1, %c0_2] : memref<8x128xf32, #tpu.memory_space<vmem>>, vector<8x128xf32>
    %3 = arith.addf %1, %2 : vector<8x128xf32>
    %c0_3 = arith.constant 0 : index
    %c0_4 = arith.constant 0 : index
    %4 = vector.load %arg2[%c0_3, %c0_4] : memref<1x128xf32, #tpu.memory_space<vmem>>, vector<1x128xf32>
    %5 = arith.mulf %3, %3 : vector<8x128xf32>
    %cst = arith.constant dense<0.000000e+00> : vector<8xf32>
    %6 = vector.multi_reduction <add>, %5, %cst [1] : vector<8x128xf32> to vector<8xf32>
    %7 = vector.shape_cast %6 : vector<8xf32> to vector<8x1xf32>
    %cst_5 = arith.constant 1.280000e+02 : f32
    %8 = vector.broadcast %cst_5 : f32 to vector<8x1xf32>
    %9 = arith.divf %7, %8 : vector<8x1xf32>
    %cst_6 = arith.constant 9.99999974E-6 : f32
    %10 = vector.broadcast %cst_6 : f32 to vector<8x1xf32>
    %11 = arith.addf %9, %10 : vector<8x1xf32>
    %12 = math.rsqrt %11 : vector<8x1xf32>
    %13 = vector.broadcast %12 : vector<8x1xf32> to vector<8x128xf32>
    %14 = arith.mulf %3, %13 : vector<8x128xf32>
    %15 = vector.broadcast %4 : vector<1x128xf32> to vector<8x128xf32>
    %16 = arith.mulf %14, %15 : vector<8x128xf32>
    %17 = arith.truncf %16 : vector<8x128xf32> to vector<8x128xbf16>
    %c0_7 = arith.constant 0 : index
    %c0_8 = arith.constant 0 : index
    %18 = vector.load %arg3[%c0_7, %c0_8] : memref<256x128xbf16, #tpu.memory_space<vmem>>, vector<256x128xbf16>
    %cst_9 = arith.constant dense<0.000000e+00> : vector<8x256xf32>
    %19 = tpu.matmul %17, %18, %cst_9 {dimension_numbers = #tpu.dot_dimension_numbers<[1], [1], [0], [0], [0, 0, 1, 0], [], []>} : vector<8x128xbf16>, vector<256x128xbf16>, vector<8x256xf32> -> vector<8x256xf32>
    %c0_10 = arith.constant 0 : index
    %c0_11 = arith.constant 0 : index
    %20 = vector.load %arg4[%c0_10, %c0_11] : memref<128x128xbf16, #tpu.memory_space<vmem>>, vector<128x128xbf16>
    %c0_12 = arith.constant 0 : index
    %c0_13 = arith.constant 0 : index
    %21 = vector.load %arg5[%c0_12, %c0_13] : memref<64x64xbf16, #tpu.memory_space<vmem>>, vector<64x64xbf16>
    %c0_14 = arith.constant 0 : index
    %c0_15 = arith.constant 0 : index
    %22 = vector.load %arg6[%c0_14, %c0_15] : memref<8x128xf32, #tpu.memory_space<vmem>>, vector<8x128xf32>
    %c0_16 = arith.constant 0 : index
    %c0_17 = arith.constant 0 : index
    %23 = vector.load %arg7[%c0_16, %c0_17] : memref<8x128xf32, #tpu.memory_space<vmem>>, vector<8x128xf32>
    %c0_18 = arith.constant 0 : index
    %c0_19 = arith.constant 0 : index
    %24 = vector.load %arg8[%c0_18, %c0_19] : memref<8x64xf32, #tpu.memory_space<vmem>>, vector<8x64xf32>
    %c0_20 = arith.constant 0 : index
    %c0_21 = arith.constant 0 : index
    %25 = vector.load %arg9[%c0_20, %c0_21] : memref<8x64xf32, #tpu.memory_space<vmem>>, vector<8x64xf32>
    %c0_22 = arith.constant 0 : index
    %c0_23 = arith.constant 0 : index
    %26 = vector.load %arg10[%c0_22, %c0_23] : memref<128x128xbf16, #tpu.memory_space<vmem>>, vector<128x128xbf16>
    %27 = vector.extract_strided_slice %19 {offsets = [0, 0], sizes = [8, 128], strides = [1, 1]} : vector<8x256xf32> to vector<8x128xf32>
    %28 = vector.extract_strided_slice %19 {offsets = [0, 128], sizes = [8, 64], strides = [1, 1]} : vector<8x256xf32> to vector<8x64xf32>
    %29 = vector.extract_strided_slice %19 {offsets = [0, 192], sizes = [8, 64], strides = [1, 1]} : vector<8x256xf32> to vector<8x64xf32>
    %30 = arith.mulf %27, %22 : vector<8x128xf32>
    %31 = arith.truncf %27 : vector<8x128xf32> to vector<8x128xbf16>
    %cst_24 = arith.constant dense<0.000000e+00> : vector<8x128xf32>
    %32 = tpu.matmul %31, %20, %cst_24 {dimension_numbers = #tpu.dot_dimension_numbers<[1], [1], [0], [0], [0, 0, 1, 0], [], []>} : vector<8x128xbf16>, vector<128x128xbf16>, vector<8x128xf32> -> vector<8x128xf32>
    %33 = arith.mulf %32, %23 : vector<8x128xf32>
    %34 = arith.addf %30, %33 : vector<8x128xf32>
    %35 = arith.truncf %34 : vector<8x128xf32> to vector<8x128xbf16>
    %36 = arith.mulf %28, %24 : vector<8x64xf32>
    %37 = arith.truncf %28 : vector<8x64xf32> to vector<8x64xbf16>
    %cst_25 = arith.constant dense<0.000000e+00> : vector<8x64xf32>
    %38 = tpu.matmul %37, %21, %cst_25 {dimension_numbers = #tpu.dot_dimension_numbers<[1], [1], [0], [0], [0, 0, 1, 0], [], []>} : vector<8x64xbf16>, vector<64x64xbf16>, vector<8x64xf32> -> vector<8x64xf32>
    %39 = arith.mulf %38, %25 : vector<8x64xf32>
    %40 = arith.addf %36, %39 : vector<8x64xf32>
    %41 = arith.truncf %40 : vector<8x64xf32> to vector<8x64xbf16>
    %42 = arith.truncf %29 : vector<8x64xf32> to vector<8x64xbf16>
    %43 = tpu.iota {dimensions = array<i32: 0>} : vector<8x8xi32>
    %44 = tpu.iota {dimensions = array<i32: 1>} : vector<8x8xi32>
    %45 = arith.cmpi sle, %44, %43 : vector<8x8xi32>
    %46 = vector.extract_strided_slice %35 {offsets = [0, 0], sizes = [8, 32], strides = [1, 1]} : vector<8x128xbf16> to vector<8x32xbf16>
    %47 = vector.extract_strided_slice %41 {offsets = [0, 0], sizes = [8, 32], strides = [1, 1]} : vector<8x64xbf16> to vector<8x32xbf16>
    %cst_26 = arith.constant dense<0.000000e+00> : vector<8x8xf32>
    %48 = tpu.matmul %46, %47, %cst_26 {dimension_numbers = #tpu.dot_dimension_numbers<[1], [1], [0], [0], [0, 0, 1, 0], [], []>} : vector<8x32xbf16>, vector<8x32xbf16>, vector<8x8xf32> -> vector<8x8xf32>
    %cst_27 = arith.constant 0.176776692 : f32
    %49 = vector.broadcast %cst_27 : f32 to vector<8x8xf32>
    %50 = arith.mulf %48, %49 : vector<8x8xf32>
    %cst_28 = arith.constant -1.000000e+30 : f32
    %51 = vector.broadcast %cst_28 : f32 to vector<8x8xf32>
    %52 = arith.select %45, %50, %51 : vector<8x8xi1>, vector<8x8xf32>
    %cst_29 = arith.constant dense<0xFF800000> : vector<8xf32>
    %53 = vector.multi_reduction <maximumf>, %52, %cst_29 [1] : vector<8x8xf32> to vector<8xf32>
    %54 = vector.shape_cast %53 : vector<8xf32> to vector<8x1xf32>
    %55 = vector.broadcast %54 : vector<8x1xf32> to vector<8x8xf32>
    %56 = arith.subf %52, %55 : vector<8x8xf32>
    %57 = math.exp %56 : vector<8x8xf32>
    %cst_30 = arith.constant dense<0.000000e+00> : vector<8xf32>
    %58 = vector.multi_reduction <add>, %57, %cst_30 [1] : vector<8x8xf32> to vector<8xf32>
    %59 = vector.shape_cast %58 : vector<8xf32> to vector<8x1xf32>
    %60 = tpu.reciprocal %59 {approx = true} : vector<8x1xf32> -> vector<8x1xf32>
    %61 = vector.broadcast %60 : vector<8x1xf32> to vector<8x8xf32>
    %62 = arith.mulf %57, %61 : vector<8x8xf32>
    %63 = arith.truncf %62 : vector<8x8xf32> to vector<8x8xbf16>
    %64 = vector.extract_strided_slice %42 {offsets = [0, 0], sizes = [8, 32], strides = [1, 1]} : vector<8x64xbf16> to vector<8x32xbf16>
    %cst_31 = arith.constant dense<0.000000e+00> : vector<8x32xf32>
    %65 = tpu.matmul %63, %64, %cst_31 {dimension_numbers = #tpu.dot_dimension_numbers<[1], [0], [0], [1], [0, 0, 1, 1], [], []>} : vector<8x8xbf16>, vector<8x32xbf16>, vector<8x32xf32> -> vector<8x32xf32>
    %66 = vector.extract_strided_slice %35 {offsets = [0, 32], sizes = [8, 32], strides = [1, 1]} : vector<8x128xbf16> to vector<8x32xbf16>
    %67 = vector.extract_strided_slice %41 {offsets = [0, 0], sizes = [8, 32], strides = [1, 1]} : vector<8x64xbf16> to vector<8x32xbf16>
    %cst_32 = arith.constant dense<0.000000e+00> : vector<8x8xf32>
    %68 = tpu.matmul %66, %67, %cst_32 {dimension_numbers = #tpu.dot_dimension_numbers<[1], [1], [0], [0], [0, 0, 1, 0], [], []>} : vector<8x32xbf16>, vector<8x32xbf16>, vector<8x8xf32> -> vector<8x8xf32>
    %cst_33 = arith.constant 0.176776692 : f32
    %69 = vector.broadcast %cst_33 : f32 to vector<8x8xf32>
    %70 = arith.mulf %68, %69 : vector<8x8xf32>
    %cst_34 = arith.constant -1.000000e+30 : f32
    %71 = vector.broadcast %cst_34 : f32 to vector<8x8xf32>
    %72 = arith.select %45, %70, %71 : vector<8x8xi1>, vector<8x8xf32>
    %cst_35 = arith.constant dense<0xFF800000> : vector<8xf32>
    %73 = vector.multi_reduction <maximumf>, %72, %cst_35 [1] : vector<8x8xf32> to vector<8xf32>
    %74 = vector.shape_cast %73 : vector<8xf32> to vector<8x1xf32>
    %75 = vector.broadcast %74 : vector<8x1xf32> to vector<8x8xf32>
    %76 = arith.subf %72, %75 : vector<8x8xf32>
    %77 = math.exp %76 : vector<8x8xf32>
    %cst_36 = arith.constant dense<0.000000e+00> : vector<8xf32>
    %78 = vector.multi_reduction <add>, %77, %cst_36 [1] : vector<8x8xf32> to vector<8xf32>
    %79 = vector.shape_cast %78 : vector<8xf32> to vector<8x1xf32>
    %80 = tpu.reciprocal %79 {approx = true} : vector<8x1xf32> -> vector<8x1xf32>
    %81 = vector.broadcast %80 : vector<8x1xf32> to vector<8x8xf32>
    %82 = arith.mulf %77, %81 : vector<8x8xf32>
    %83 = arith.truncf %82 : vector<8x8xf32> to vector<8x8xbf16>
    %84 = vector.extract_strided_slice %42 {offsets = [0, 0], sizes = [8, 32], strides = [1, 1]} : vector<8x64xbf16> to vector<8x32xbf16>
    %cst_37 = arith.constant dense<0.000000e+00> : vector<8x32xf32>
    %85 = tpu.matmul %83, %84, %cst_37 {dimension_numbers = #tpu.dot_dimension_numbers<[1], [0], [0], [1], [0, 0, 1, 1], [], []>} : vector<8x8xbf16>, vector<8x32xbf16>, vector<8x32xf32> -> vector<8x32xf32>
    %86 = vector.extract_strided_slice %35 {offsets = [0, 64], sizes = [8, 32], strides = [1, 1]} : vector<8x128xbf16> to vector<8x32xbf16>
    %87 = vector.extract_strided_slice %41 {offsets = [0, 32], sizes = [8, 32], strides = [1, 1]} : vector<8x64xbf16> to vector<8x32xbf16>
    %cst_38 = arith.constant dense<0.000000e+00> : vector<8x8xf32>
    %88 = tpu.matmul %86, %87, %cst_38 {dimension_numbers = #tpu.dot_dimension_numbers<[1], [1], [0], [0], [0, 0, 1, 0], [], []>} : vector<8x32xbf16>, vector<8x32xbf16>, vector<8x8xf32> -> vector<8x8xf32>
    %cst_39 = arith.constant 0.176776692 : f32
    %89 = vector.broadcast %cst_39 : f32 to vector<8x8xf32>
    %90 = arith.mulf %88, %89 : vector<8x8xf32>
    %cst_40 = arith.constant -1.000000e+30 : f32
    %91 = vector.broadcast %cst_40 : f32 to vector<8x8xf32>
    %92 = arith.select %45, %90, %91 : vector<8x8xi1>, vector<8x8xf32>
    %cst_41 = arith.constant dense<0xFF800000> : vector<8xf32>
    %93 = vector.multi_reduction <maximumf>, %92, %cst_41 [1] : vector<8x8xf32> to vector<8xf32>
    %94 = vector.shape_cast %93 : vector<8xf32> to vector<8x1xf32>
    %95 = vector.broadcast %94 : vector<8x1xf32> to vector<8x8xf32>
    %96 = arith.subf %92, %95 : vector<8x8xf32>
    %97 = math.exp %96 : vector<8x8xf32>
    %cst_42 = arith.constant dense<0.000000e+00> : vector<8xf32>
    %98 = vector.multi_reduction <add>, %97, %cst_42 [1] : vector<8x8xf32> to vector<8xf32>
    %99 = vector.shape_cast %98 : vector<8xf32> to vector<8x1xf32>
    %100 = tpu.reciprocal %99 {approx = true} : vector<8x1xf32> -> vector<8x1xf32>
    %101 = vector.broadcast %100 : vector<8x1xf32> to vector<8x8xf32>
    %102 = arith.mulf %97, %101 : vector<8x8xf32>
    %103 = arith.truncf %102 : vector<8x8xf32> to vector<8x8xbf16>
    %104 = vector.extract_strided_slice %42 {offsets = [0, 32], sizes = [8, 32], strides = [1, 1]} : vector<8x64xbf16> to vector<8x32xbf16>
    %cst_43 = arith.constant dense<0.000000e+00> : vector<8x32xf32>
    %105 = tpu.matmul %103, %104, %cst_43 {dimension_numbers = #tpu.dot_dimension_numbers<[1], [0], [0], [1], [0, 0, 1, 1], [], []>} : vector<8x8xbf16>, vector<8x32xbf16>, vector<8x32xf32> -> vector<8x32xf32>
    %106 = vector.extract_strided_slice %35 {offsets = [0, 96], sizes = [8, 32], strides = [1, 1]} : vector<8x128xbf16> to vector<8x32xbf16>
    %107 = vector.extract_strided_slice %41 {offsets = [0, 32], sizes = [8, 32], strides = [1, 1]} : vector<8x64xbf16> to vector<8x32xbf16>
    %cst_44 = arith.constant dense<0.000000e+00> : vector<8x8xf32>
    %108 = tpu.matmul %106, %107, %cst_44 {dimension_numbers = #tpu.dot_dimension_numbers<[1], [1], [0], [0], [0, 0, 1, 0], [], []>} : vector<8x32xbf16>, vector<8x32xbf16>, vector<8x8xf32> -> vector<8x8xf32>
    %cst_45 = arith.constant 0.176776692 : f32
    %109 = vector.broadcast %cst_45 : f32 to vector<8x8xf32>
    %110 = arith.mulf %108, %109 : vector<8x8xf32>
    %cst_46 = arith.constant -1.000000e+30 : f32
    %111 = vector.broadcast %cst_46 : f32 to vector<8x8xf32>
    %112 = arith.select %45, %110, %111 : vector<8x8xi1>, vector<8x8xf32>
    %cst_47 = arith.constant dense<0xFF800000> : vector<8xf32>
    %113 = vector.multi_reduction <maximumf>, %112, %cst_47 [1] : vector<8x8xf32> to vector<8xf32>
    %114 = vector.shape_cast %113 : vector<8xf32> to vector<8x1xf32>
    %115 = vector.broadcast %114 : vector<8x1xf32> to vector<8x8xf32>
    %116 = arith.subf %112, %115 : vector<8x8xf32>
    %117 = math.exp %116 : vector<8x8xf32>
    %cst_48 = arith.constant dense<0.000000e+00> : vector<8xf32>
    %118 = vector.multi_reduction <add>, %117, %cst_48 [1] : vector<8x8xf32> to vector<8xf32>
    %119 = vector.shape_cast %118 : vector<8xf32> to vector<8x1xf32>
    %120 = tpu.reciprocal %119 {approx = true} : vector<8x1xf32> -> vector<8x1xf32>
    %121 = vector.broadcast %120 : vector<8x1xf32> to vector<8x8xf32>
    %122 = arith.mulf %117, %121 : vector<8x8xf32>
    %123 = arith.truncf %122 : vector<8x8xf32> to vector<8x8xbf16>
    %124 = vector.extract_strided_slice %42 {offsets = [0, 32], sizes = [8, 32], strides = [1, 1]} : vector<8x64xbf16> to vector<8x32xbf16>
    %cst_49 = arith.constant dense<0.000000e+00> : vector<8x32xf32>
    %125 = tpu.matmul %123, %124, %cst_49 {dimension_numbers = #tpu.dot_dimension_numbers<[1], [0], [0], [1], [0, 0, 1, 1], [], []>} : vector<8x8xbf16>, vector<8x32xbf16>, vector<8x32xf32> -> vector<8x32xf32>
    %126 = tpu.concatenate %65, %85, %105, %125 in 1 : vector<8x32xf32>, vector<8x32xf32>, vector<8x32xf32>, vector<8x32xf32> -> vector<8x128xf32>
    %127 = arith.truncf %126 : vector<8x128xf32> to vector<8x128xbf16>
    %cst_50 = arith.constant dense<0.000000e+00> : vector<8x128xf32>
    %128 = tpu.matmul %127, %26, %cst_50 {dimension_numbers = #tpu.dot_dimension_numbers<[1], [1], [0], [0], [0, 0, 1, 0], [], []>} : vector<8x128xbf16>, vector<128x128xbf16>, vector<8x128xf32> -> vector<8x128xf32>
    %129 = arith.addf %128, %3 : vector<8x128xf32>
    %c0_51 = arith.constant 0 : index
    %c0_52 = arith.constant 0 : index
    %130 = vector.load %arg19[%c0_51, %c0_52] : memref<8x128xf32, #tpu.memory_space<vmem>>, vector<8x128xf32>
    tpu.vector_store %arg19[%c0_51, %c0_52], %129 {strides = array<i32>} : memref<8x128xf32, #tpu.memory_space<vmem>>, vector<8x128xf32>,
    %c0_53 = arith.constant 0 : index
    %c0_54 = arith.constant 0 : index
    %131 = vector.load %arg11[%c0_53, %c0_54] : memref<1x128xf32, #tpu.memory_space<vmem>>, vector<1x128xf32>
    %132 = arith.mulf %129, %129 : vector<8x128xf32>
    %cst_55 = arith.constant dense<0.000000e+00> : vector<8xf32>
    %133 = vector.multi_reduction <add>, %132, %cst_55 [1] : vector<8x128xf32> to vector<8xf32>
    %134 = vector.shape_cast %133 : vector<8xf32> to vector<8x1xf32>
    %cst_56 = arith.constant 1.280000e+02 : f32
    %135 = vector.broadcast %cst_56 : f32 to vector<8x1xf32>
    %136 = arith.divf %134, %135 : vector<8x1xf32>
    %cst_57 = arith.constant 9.99999974E-6 : f32
    %137 = vector.broadcast %cst_57 : f32 to vector<8x1xf32>
    %138 = arith.addf %136, %137 : vector<8x1xf32>
    %139 = math.rsqrt %138 : vector<8x1xf32>
    %140 = vector.broadcast %139 : vector<8x1xf32> to vector<8x128xf32>
    %141 = arith.mulf %129, %140 : vector<8x128xf32>
    %142 = vector.broadcast %131 : vector<1x128xf32> to vector<8x128xf32>
    %143 = arith.mulf %141, %142 : vector<8x128xf32>
    %144 = arith.truncf %143 : vector<8x128xf32> to vector<8x128xbf16>
    %c0_58 = arith.constant 0 : index
    %c0_59 = arith.constant 0 : index
    %145 = vector.load %arg14[%c0_58, %c0_59] : memref<256x128xbf16, #tpu.memory_space<vmem>>, vector<256x128xbf16>
    %c0_60 = arith.constant 0 : index
    %c0_61 = arith.constant 0 : index
    %146 = vector.load %arg15[%c0_60, %c0_61] : memref<128x128xbf16, #tpu.memory_space<vmem>>, vector<128x128xbf16>
    %cst_62 = arith.constant dense<0.000000e+00> : vector<8x256xf32>
    %147 = tpu.matmul %144, %145, %cst_62 {dimension_numbers = #tpu.dot_dimension_numbers<[1], [1], [0], [0], [0, 0, 1, 0], [], []>} : vector<8x128xbf16>, vector<256x128xbf16>, vector<8x256xf32> -> vector<8x256xf32>
    %148 = vector.extract_strided_slice %147 {offsets = [0, 0], sizes = [8, 128], strides = [1, 1]} : vector<8x256xf32> to vector<8x128xf32>
    %149 = vector.extract_strided_slice %147 {offsets = [0, 128], sizes = [8, 128], strides = [1, 1]} : vector<8x256xf32> to vector<8x128xf32>
    %150 = arith.negf %148 : vector<8x128xf32>
    %151 = math.exp %150 : vector<8x128xf32>
    %cst_63 = arith.constant 1.000000e+00 : f32
    %152 = vector.broadcast %cst_63 : f32 to vector<8x128xf32>
    %153 = arith.addf %152, %151 : vector<8x128xf32>
    %154 = arith.divf %152, %153 : vector<8x128xf32>
    %155 = arith.mulf %148, %154 : vector<8x128xf32>
    %156 = arith.mulf %155, %149 : vector<8x128xf32>
    %157 = arith.truncf %156 : vector<8x128xf32> to vector<8x128xbf16>
    %cst_64 = arith.constant dense<0.000000e+00> : vector<8x128xf32>
    %158 = tpu.matmul %157, %146, %cst_64 {dimension_numbers = #tpu.dot_dimension_numbers<[1], [1], [0], [0], [0, 0, 1, 0], [], []>} : vector<8x128xbf16>, vector<128x128xbf16>, vector<8x128xf32> -> vector<8x128xf32>
    %c0_65 = arith.constant 0 : index
    %c0_66 = arith.constant 0 : index
    %159 = vector.load %arg12[%c0_65, %c0_66] : memref<4x128xf32, #tpu.memory_space<vmem>>, vector<4x128xf32>
    %cst_67 = arith.constant dense<0.000000e+00> : vector<8x4xf32>
    %160 = tpu.matmul %143, %159, %cst_67 {dimension_numbers = #tpu.dot_dimension_numbers<[1], [1], [0], [0], [0, 0, 1, 0], [], []>} : vector<8x128xf32>, vector<4x128xf32>, vector<8x4xf32> -> vector<8x4xf32>
    %cst_68 = arith.constant dense<0xFF800000> : vector<8xf32>
    %161 = vector.multi_reduction <maximumf>, %160, %cst_68 [1] : vector<8x4xf32> to vector<8xf32>
    %162 = vector.shape_cast %161 : vector<8xf32> to vector<8x1xf32>
    %163 = vector.broadcast %162 : vector<8x1xf32> to vector<8x4xf32>
    %164 = arith.subf %160, %163 : vector<8x4xf32>
    %165 = math.exp %164 : vector<8x4xf32>
    %cst_69 = arith.constant dense<0.000000e+00> : vector<8xf32>
    %166 = vector.multi_reduction <add>, %165, %cst_69 [1] : vector<8x4xf32> to vector<8xf32>
    %167 = vector.shape_cast %166 : vector<8xf32> to vector<8x1xf32>
    %168 = vector.broadcast %167 : vector<8x1xf32> to vector<8x4xf32>
    %169 = arith.divf %165, %168 : vector<8x4xf32>
    %c0_70 = arith.constant 0 : index
    %c0_71 = arith.constant 0 : index
    %170 = vector.load %arg13[%c0_70, %c0_71] : memref<1x4xf32, #tpu.memory_space<vmem>>, vector<1x4xf32>
    %171 = vector.broadcast %170 : vector<1x4xf32> to vector<8x4xf32>
    %172 = arith.addf %169, %171 : vector<8x4xf32>
    %cst_72 = arith.constant 0.000000e+00 : f32
    %173 = vector.broadcast %cst_72 : f32 to vector<8x1xf32>
    %174 = vector.extract_strided_slice %172 {offsets = [0, 0], sizes = [8, 1], strides = [1, 1]} : vector<8x4xf32> to vector<8x1xf32>
    %175 = vector.broadcast %174 : vector<8x1xf32> to vector<8x4xf32>
    %176 = arith.cmpf ogt, %172, %175 : vector<8x4xf32>
    %177 = arith.extui %176 : vector<8x4xi1> to vector<8x4xi32>
    %178 = arith.sitofp %177 : vector<8x4xi32> to vector<8x4xf32>
    %cst_73 = arith.constant dense<0.000000e+00> : vector<8xf32>
    %179 = vector.multi_reduction <add>, %178, %cst_73 [1] : vector<8x4xf32> to vector<8xf32>
    %180 = vector.shape_cast %179 : vector<8xf32> to vector<8x1xf32>
    %181 = vector.extract_strided_slice %169 {offsets = [0, 0], sizes = [8, 1], strides = [1, 1]} : vector<8x4xf32> to vector<8x1xf32>
    %cst_74 = arith.constant 2.000000e+00 : f32
    %182 = vector.broadcast %cst_74 : f32 to vector<8x1xf32>
    %183 = arith.cmpf olt, %180, %182 : vector<8x1xf32>
    %184 = arith.extui %183 : vector<8x1xi1> to vector<8x1xi32>
    %185 = arith.sitofp %184 : vector<8x1xi32> to vector<8x1xf32>
    %186 = arith.mulf %181, %185 : vector<8x1xf32>
    %187 = arith.addf %173, %186 : vector<8x1xf32>
    %188 = vector.extract_strided_slice %172 {offsets = [0, 1], sizes = [8, 1], strides = [1, 1]} : vector<8x4xf32> to vector<8x1xf32>
    %189 = vector.broadcast %188 : vector<8x1xf32> to vector<8x4xf32>
    %190 = arith.cmpf ogt, %172, %189 : vector<8x4xf32>
    %191 = arith.extui %190 : vector<8x4xi1> to vector<8x4xi32>
    %192 = arith.sitofp %191 : vector<8x4xi32> to vector<8x4xf32>
    %cst_75 = arith.constant dense<0.000000e+00> : vector<8xf32>
    %193 = vector.multi_reduction <add>, %192, %cst_75 [1] : vector<8x4xf32> to vector<8xf32>
    %194 = vector.shape_cast %193 : vector<8xf32> to vector<8x1xf32>
    %195 = vector.extract_strided_slice %169 {offsets = [0, 1], sizes = [8, 1], strides = [1, 1]} : vector<8x4xf32> to vector<8x1xf32>
    %cst_76 = arith.constant 2.000000e+00 : f32
    %196 = vector.broadcast %cst_76 : f32 to vector<8x1xf32>
    %197 = arith.cmpf olt, %194, %196 : vector<8x1xf32>
    %198 = arith.extui %197 : vector<8x1xi1> to vector<8x1xi32>
    %199 = arith.sitofp %198 : vector<8x1xi32> to vector<8x1xf32>
    %200 = arith.mulf %195, %199 : vector<8x1xf32>
    %201 = arith.addf %187, %200 : vector<8x1xf32>
    %202 = vector.extract_strided_slice %172 {offsets = [0, 2], sizes = [8, 1], strides = [1, 1]} : vector<8x4xf32> to vector<8x1xf32>
    %203 = vector.broadcast %202 : vector<8x1xf32> to vector<8x4xf32>
    %204 = arith.cmpf ogt, %172, %203 : vector<8x4xf32>
    %205 = arith.extui %204 : vector<8x4xi1> to vector<8x4xi32>
    %206 = arith.sitofp %205 : vector<8x4xi32> to vector<8x4xf32>
    %cst_77 = arith.constant dense<0.000000e+00> : vector<8xf32>
    %207 = vector.multi_reduction <add>, %206, %cst_77 [1] : vector<8x4xf32> to vector<8xf32>
    %208 = vector.shape_cast %207 : vector<8xf32> to vector<8x1xf32>
    %209 = vector.extract_strided_slice %169 {offsets = [0, 2], sizes = [8, 1], strides = [1, 1]} : vector<8x4xf32> to vector<8x1xf32>
    %cst_78 = arith.constant 2.000000e+00 : f32
    %210 = vector.broadcast %cst_78 : f32 to vector<8x1xf32>
    %211 = arith.cmpf olt, %208, %210 : vector<8x1xf32>
    %212 = arith.extui %211 : vector<8x1xi1> to vector<8x1xi32>
    %213 = arith.sitofp %212 : vector<8x1xi32> to vector<8x1xf32>
    %214 = arith.mulf %209, %213 : vector<8x1xf32>
    %215 = arith.addf %201, %214 : vector<8x1xf32>
    %216 = vector.extract_strided_slice %172 {offsets = [0, 3], sizes = [8, 1], strides = [1, 1]} : vector<8x4xf32> to vector<8x1xf32>
    %217 = vector.broadcast %216 : vector<8x1xf32> to vector<8x4xf32>
    %218 = arith.cmpf ogt, %172, %217 : vector<8x4xf32>
    %219 = arith.extui %218 : vector<8x4xi1> to vector<8x4xi32>
    %220 = arith.sitofp %219 : vector<8x4xi32> to vector<8x4xf32>
    %cst_79 = arith.constant dense<0.000000e+00> : vector<8xf32>
    %221 = vector.multi_reduction <add>, %220, %cst_79 [1] : vector<8x4xf32> to vector<8xf32>
    %222 = vector.shape_cast %221 : vector<8xf32> to vector<8x1xf32>
    %223 = vector.extract_strided_slice %169 {offsets = [0, 3], sizes = [8, 1], strides = [1, 1]} : vector<8x4xf32> to vector<8x1xf32>
    %cst_80 = arith.constant 2.000000e+00 : f32
    %224 = vector.broadcast %cst_80 : f32 to vector<8x1xf32>
    %225 = arith.cmpf olt, %222, %224 : vector<8x1xf32>
    %226 = arith.extui %225 : vector<8x1xi1> to vector<8x1xi32>
    %227 = arith.sitofp %226 : vector<8x1xi32> to vector<8x1xf32>
    %228 = arith.mulf %223, %227 : vector<8x1xf32>
    %229 = arith.addf %215, %228 : vector<8x1xf32>
    %cst_81 = arith.constant 1.000000e+00 : f32
    %230 = vector.broadcast %cst_81 : f32 to vector<8x1xf32>
    %231 = arith.divf %230, %229 : vector<8x1xf32>
    %c0_82 = arith.constant 0 : index
    %c0_83 = arith.constant 0 : index
    %c0_84 = arith.constant 0 : index
    %232 = vector.load %arg16[%c0_82, %c0_83, %c0_84] : memref<4x256x128xbf16, #tpu.memory_space<vmem>>, vector<1x256x128xbf16>
    %233 = vector.shape_cast %232 : vector<1x256x128xbf16> to vector<256x128xbf16>
    %c0_85 = arith.constant 0 : index
    %c0_86 = arith.constant 0 : index
    %c0_87 = arith.constant 0 : index
    %234 = vector.load %arg17[%c0_85, %c0_86, %c0_87] : memref<4x128x128xbf16, #tpu.memory_space<vmem>>, vector<1x128x128xbf16>
    %235 = vector.shape_cast %234 : vector<1x128x128xbf16> to vector<128x128xbf16>
    %cst_88 = arith.constant dense<0.000000e+00> : vector<8x256xf32>
    %236 = tpu.matmul %144, %233, %cst_88 {dimension_numbers = #tpu.dot_dimension_numbers<[1], [1], [0], [0], [0, 0, 1, 0], [], []>} : vector<8x128xbf16>, vector<256x128xbf16>, vector<8x256xf32> -> vector<8x256xf32>
    %237 = vector.extract_strided_slice %236 {offsets = [0, 0], sizes = [8, 128], strides = [1, 1]} : vector<8x256xf32> to vector<8x128xf32>
    %238 = vector.extract_strided_slice %236 {offsets = [0, 128], sizes = [8, 128], strides = [1, 1]} : vector<8x256xf32> to vector<8x128xf32>
    %239 = arith.negf %237 : vector<8x128xf32>
    %240 = math.exp %239 : vector<8x128xf32>
    %cst_89 = arith.constant 1.000000e+00 : f32
    %241 = vector.broadcast %cst_89 : f32 to vector<8x128xf32>
    %242 = arith.addf %241, %240 : vector<8x128xf32>
    %243 = arith.divf %241, %242 : vector<8x128xf32>
    %244 = arith.mulf %237, %243 : vector<8x128xf32>
    %245 = arith.mulf %244, %238 : vector<8x128xf32>
    %246 = arith.truncf %245 : vector<8x128xf32> to vector<8x128xbf16>
    %cst_90 = arith.constant dense<0.000000e+00> : vector<8x128xf32>
    %247 = tpu.matmul %246, %235, %cst_90 {dimension_numbers = #tpu.dot_dimension_numbers<[1], [1], [0], [0], [0, 0, 1, 0], [], []>} : vector<8x128xbf16>, vector<128x128xbf16>, vector<8x128xf32> -> vector<8x128xf32>
    %248 = arith.mulf %186, %231 : vector<8x1xf32>
    %249 = vector.broadcast %248 : vector<8x1xf32> to vector<8x128xf32>
    %250 = arith.mulf %249, %247 : vector<8x128xf32>
    %251 = arith.addf %158, %250 : vector<8x128xf32>
    %c1 = arith.constant 1 : index
    %c0_91 = arith.constant 0 : index
    %c0_92 = arith.constant 0 : index
    %252 = vector.load %arg16[%c1, %c0_91, %c0_92] : memref<4x256x128xbf16, #tpu.memory_space<vmem>>, vector<1x256x128xbf16>
    %253 = vector.shape_cast %252 : vector<1x256x128xbf16> to vector<256x128xbf16>
    %c1_93 = arith.constant 1 : index
    %c0_94 = arith.constant 0 : index
    %c0_95 = arith.constant 0 : index
    %254 = vector.load %arg17[%c1_93, %c0_94, %c0_95] : memref<4x128x128xbf16, #tpu.memory_space<vmem>>, vector<1x128x128xbf16>
    %255 = vector.shape_cast %254 : vector<1x128x128xbf16> to vector<128x128xbf16>
    %cst_96 = arith.constant dense<0.000000e+00> : vector<8x256xf32>
    %256 = tpu.matmul %144, %253, %cst_96 {dimension_numbers = #tpu.dot_dimension_numbers<[1], [1], [0], [0], [0, 0, 1, 0], [], []>} : vector<8x128xbf16>, vector<256x128xbf16>, vector<8x256xf32> -> vector<8x256xf32>
    %257 = vector.extract_strided_slice %256 {offsets = [0, 0], sizes = [8, 128], strides = [1, 1]} : vector<8x256xf32> to vector<8x128xf32>
    %258 = vector.extract_strided_slice %256 {offsets = [0, 128], sizes = [8, 128], strides = [1, 1]} : vector<8x256xf32> to vector<8x128xf32>
    %259 = arith.negf %257 : vector<8x128xf32>
    %260 = math.exp %259 : vector<8x128xf32>
    %cst_97 = arith.constant 1.000000e+00 : f32
    %261 = vector.broadcast %cst_97 : f32 to vector<8x128xf32>
    %262 = arith.addf %261, %260 : vector<8x128xf32>
    %263 = arith.divf %261, %262 : vector<8x128xf32>
    %264 = arith.mulf %257, %263 : vector<8x128xf32>
    %265 = arith.mulf %264, %258 : vector<8x128xf32>
    %266 = arith.truncf %265 : vector<8x128xf32> to vector<8x128xbf16>
    %cst_98 = arith.constant dense<0.000000e+00> : vector<8x128xf32>
    %267 = tpu.matmul %266, %255, %cst_98 {dimension_numbers = #tpu.dot_dimension_numbers<[1], [1], [0], [0], [0, 0, 1, 0], [], []>} : vector<8x128xbf16>, vector<128x128xbf16>, vector<8x128xf32> -> vector<8x128xf32>
    %268 = arith.mulf %200, %231 : vector<8x1xf32>
    %269 = vector.broadcast %268 : vector<8x1xf32> to vector<8x128xf32>
    %270 = arith.mulf %269, %267 : vector<8x128xf32>
    %271 = arith.addf %251, %270 : vector<8x128xf32>
    %c2 = arith.constant 2 : index
    %c0_99 = arith.constant 0 : index
    %c0_100 = arith.constant 0 : index
    %272 = vector.load %arg16[%c2, %c0_99, %c0_100] : memref<4x256x128xbf16, #tpu.memory_space<vmem>>, vector<1x256x128xbf16>
    %273 = vector.shape_cast %272 : vector<1x256x128xbf16> to vector<256x128xbf16>
    %c2_101 = arith.constant 2 : index
    %c0_102 = arith.constant 0 : index
    %c0_103 = arith.constant 0 : index
    %274 = vector.load %arg17[%c2_101, %c0_102, %c0_103] : memref<4x128x128xbf16, #tpu.memory_space<vmem>>, vector<1x128x128xbf16>
    %275 = vector.shape_cast %274 : vector<1x128x128xbf16> to vector<128x128xbf16>
    %cst_104 = arith.constant dense<0.000000e+00> : vector<8x256xf32>
    %276 = tpu.matmul %144, %273, %cst_104 {dimension_numbers = #tpu.dot_dimension_numbers<[1], [1], [0], [0], [0, 0, 1, 0], [], []>} : vector<8x128xbf16>, vector<256x128xbf16>, vector<8x256xf32> -> vector<8x256xf32>
    %277 = vector.extract_strided_slice %276 {offsets = [0, 0], sizes = [8, 128], strides = [1, 1]} : vector<8x256xf32> to vector<8x128xf32>
    %278 = vector.extract_strided_slice %276 {offsets = [0, 128], sizes = [8, 128], strides = [1, 1]} : vector<8x256xf32> to vector<8x128xf32>
    %279 = arith.negf %277 : vector<8x128xf32>
    %280 = math.exp %279 : vector<8x128xf32>
    %cst_105 = arith.constant 1.000000e+00 : f32
    %281 = vector.broadcast %cst_105 : f32 to vector<8x128xf32>
    %282 = arith.addf %281, %280 : vector<8x128xf32>
    %283 = arith.divf %281, %282 : vector<8x128xf32>
    %284 = arith.mulf %277, %283 : vector<8x128xf32>
    %285 = arith.mulf %284, %278 : vector<8x128xf32>
    %286 = arith.truncf %285 : vector<8x128xf32> to vector<8x128xbf16>
    %cst_106 = arith.constant dense<0.000000e+00> : vector<8x128xf32>
    %287 = tpu.matmul %286, %275, %cst_106 {dimension_numbers = #tpu.dot_dimension_numbers<[1], [1], [0], [0], [0, 0, 1, 0], [], []>} : vector<8x128xbf16>, vector<128x128xbf16>, vector<8x128xf32> -> vector<8x128xf32>
    %288 = arith.mulf %214, %231 : vector<8x1xf32>
    %289 = vector.broadcast %288 : vector<8x1xf32> to vector<8x128xf32>
    %290 = arith.mulf %289, %287 : vector<8x128xf32>
    %291 = arith.addf %271, %290 : vector<8x128xf32>
    %c3 = arith.constant 3 : index
    %c0_107 = arith.constant 0 : index
    %c0_108 = arith.constant 0 : index
    %292 = vector.load %arg16[%c3, %c0_107, %c0_108] : memref<4x256x128xbf16, #tpu.memory_space<vmem>>, vector<1x256x128xbf16>
    %293 = vector.shape_cast %292 : vector<1x256x128xbf16> to vector<256x128xbf16>
    %c3_109 = arith.constant 3 : index
    %c0_110 = arith.constant 0 : index
    %c0_111 = arith.constant 0 : index
    %294 = vector.load %arg17[%c3_109, %c0_110, %c0_111] : memref<4x128x128xbf16, #tpu.memory_space<vmem>>, vector<1x128x128xbf16>
    %295 = vector.shape_cast %294 : vector<1x128x128xbf16> to vector<128x128xbf16>
    %cst_112 = arith.constant dense<0.000000e+00> : vector<8x256xf32>
    %296 = tpu.matmul %144, %293, %cst_112 {dimension_numbers = #tpu.dot_dimension_numbers<[1], [1], [0], [0], [0, 0, 1, 0], [], []>} : vector<8x128xbf16>, vector<256x128xbf16>, vector<8x256xf32> -> vector<8x256xf32>
    %297 = vector.extract_strided_slice %296 {offsets = [0, 0], sizes = [8, 128], strides = [1, 1]} : vector<8x256xf32> to vector<8x128xf32>
    %298 = vector.extract_strided_slice %296 {offsets = [0, 128], sizes = [8, 128], strides = [1, 1]} : vector<8x256xf32> to vector<8x128xf32>
    %299 = arith.negf %297 : vector<8x128xf32>
    %300 = math.exp %299 : vector<8x128xf32>
    %cst_113 = arith.constant 1.000000e+00 : f32
    %301 = vector.broadcast %cst_113 : f32 to vector<8x128xf32>
    %302 = arith.addf %301, %300 : vector<8x128xf32>
    %303 = arith.divf %301, %302 : vector<8x128xf32>
    %304 = arith.mulf %297, %303 : vector<8x128xf32>
    %305 = arith.mulf %304, %298 : vector<8x128xf32>
    %306 = arith.truncf %305 : vector<8x128xf32> to vector<8x128xbf16>
    %cst_114 = arith.constant dense<0.000000e+00> : vector<8x128xf32>
    %307 = tpu.matmul %306, %295, %cst_114 {dimension_numbers = #tpu.dot_dimension_numbers<[1], [1], [0], [0], [0, 0, 1, 0], [], []>} : vector<8x128xbf16>, vector<128x128xbf16>, vector<8x128xf32> -> vector<8x128xf32>
    %308 = arith.mulf %228, %231 : vector<8x1xf32>
    %309 = vector.broadcast %308 : vector<8x1xf32> to vector<8x128xf32>
    %310 = arith.mulf %309, %307 : vector<8x128xf32>
    %311 = arith.addf %291, %310 : vector<8x128xf32>
    %312 = arith.truncf %311 : vector<8x128xf32> to vector<8x128xbf16>
    %c0_115 = arith.constant 0 : index
    %c0_116 = arith.constant 0 : index
    %313 = vector.load %arg18[%c0_115, %c0_116] : memref<8x128xbf16, #tpu.memory_space<vmem>>, vector<8x128xbf16>
    tpu.vector_store %arg18[%c0_115, %c0_116], %312 {strides = array<i32>} : memref<8x128xbf16, #tpu.memory_space<vmem>>, vector<8x128xbf16>,
    return
  }
}

</mosaic_0001>

<bundles_post_ra>
// kernel: tile.34
= control target key start
LH: loop header
LB: loop body
LE: loop exit
PB: predicated region body
PF: predicated region fallthrough
CT: control target
= control target key end

     0   :  { %vm42_vm0 = vcmask 1047556   ;;  %vm44_vm1 = vcmask 130048   ;;  %s93_s22 = smov 16   ;;  %s94_s25 = smov 32   ;;  %vm54_vm2 = vcmask 523648   ;;  %vm64_vm3 = vcmask 392448   ;;  %s146_s0 = inlined_call_operand.vmem [shape: f32[8,4,16], index: 0, kind: input, shape index: {}]   ;;  %s147_s1 = inlined_call_operand.vmem [shape: f32[8,64], index: 1, kind: output, shape index: {}]  }
   0x1   :  { %v82_v0 = vld [vmem:[%s146_s0 + $0x1c] sm:$0xf]  ;;  %v83_v1 = vld [vmem:[%s146_s0 + $0x18] sm:$0xf]  ;;  %v84_v2 = vld [vmem:[%s146_s0 + $0x14] sm:$0xf] }
   0x2   :  { %8 = vst [vmem:[#allocation0 + $0x38] sm:$0xf] %v82_v0  ;;  %13 = vst [vmem:[#allocation0 + $0x30] sm:$0xf] %v83_v1  ;;  %v85_v3 = vld [vmem:[%s146_s0 + $0x10] sm:$0xf] }
   0x3   :  { %18 = vst [vmem:[#allocation0 + $0x28] sm:$0xf] %v84_v2  ;;  %v86_v4 = vld [vmem:[%s146_s0 + $0xc] sm:$0xf]  ;;  %v87_v5 = vld [vmem:[%s146_s0 + $0x8] sm:$0xf] }
   0x4   :  { %23 = vst [vmem:[#allocation0 + $0x20] sm:$0xf] %v85_v3  ;;  %28 = vst [vmem:[#allocation0 + $0x18] sm:$0xf] %v86_v4  ;;  %v88_v6 = vld [vmem:[%s146_s0 + $0x4] sm:$0xf] }
   0x5   :  { %33 = vst [vmem:[#allocation0 + $0x10] sm:$0xf] %v87_v5  ;;  %v38_v7 = vld [vmem:[%s146_s0] sm:$0xf]  ;;  %37 = vst [vmem:[#allocation0 + $0x8] sm:$0xf] %v88_v6 }
   0x6   :  { %39 = vst [vmem:[#allocation0] sm:$0xf] %v38_v7  ;;  %s92_s0 = smov 48   ;;  %vm74_vm4 = vcmask 261248  }
   0xb   :  { %v49_v8 = vld [vmem:[#allocation0 + $0x3] ss:$8 sm:$0xf0]   ;;  %v59_v9 = vld [vmem:[#allocation0 + $0x2] ss:$8 sm:$0xf0]  }
   0xc   :  { %v69_v14 = vld [vmem:[#allocation0 + $0x1] ss:$8 sm:$0xf0]   ;;  %v41_v17 = vld [vmem:[#allocation0] ss:$8 sm:$0xf0]  }
   0xd   :  { %v47_v10 = vld [vmem:[#allocation0 + $0x3] ss:$8 sm:$0xf]   ;;  %v57_v11 = vld [vmem:[#allocation0 + $0x2] ss:$8 sm:$0xf]  }
   0xe   :  { %v51_v12 = vsel %vm42_vm0, %v49_v8, %v47_v10  ;;  %v67_v13 = vld [vmem:[#allocation0 + $0x1] ss:$8 sm:$0xf]   ;;  %v40_v16 = vld [vmem:[#allocation0] ss:$8 sm:$0xf]   ;;  %v61_v18 = vsel %vm42_vm0, %v59_v9, %v57_v11 }
   0xf   :  { %52 = vrot.lane.b32.xlu0 %v51_v12, %s92_s0  ;;  %v71_v15 = vsel %vm42_vm0, %v69_v14, %v67_v13  ;;  %v43_v19 = vsel %vm42_vm0, %v41_v17, %v40_v16 }
  0x10   :  { %72 = vrot.lane.b32.xlu1 %v71_v15, %s93_s22  ;;  %45 = vst.msk [vmem:[%s147_s1] sm:$0xff] %vm44_vm1, %v43_v19  }
  0x13   :  { %62 = vrot.lane.b32.xlu0 %v61_v18, %s94_s25 }
  0x81   :  { %v53_v20 = vpop.permute.xlu0 %52  }
  0x82   :  { %55 = vst.msk [vmem:[%s147_s1] sm:$0xff] %vm54_vm2, %v53_v20   ;;  %v73_v21 = vpop.permute.xlu1 %72  }
  0x85   :  { %v63_v22 = vpop.permute.xlu0 %62  }
  0x86   :  { %65 = vst.msk [vmem:[%s147_s1] sm:$0xff] %vm64_vm3, %v63_v22  }
  0x87   :  { %75 = vst.msk [vmem:[%s147_s1] sm:$0xff] %vm74_vm4, %v73_v21  }

// kernel: tile.24
= control target key start
LH: loop header
LB: loop body
LE: loop exit
PB: predicated region body
PF: predicated region fallthrough
CT: control target
= control target key end

     0   :  { %vm4_vm0 = vcmask 1047556   ;;  %s99_s14 = smov 112   ;;  %s100_s19 = smov 80   ;;  %vm6_vm1 = vcmask 130048   ;;  %vm16_vm2 = vcmask 1048448   ;;  %vm26_vm3 = vcmask 917248   ;;  %s196_s0 = inlined_call_operand.vmem [shape: f32[8,8,16], index: 0, kind: input, shape index: {}]   ;;  %s197_s1 = inlined_call_operand.vmem [shape: f32[8,128], index: 1, kind: output, shape index: {}]  }
   0x1   :  { %v78_v0 = vld [vmem:[%s196_s0 + $0x7] ss:$8 sm:$0xf]   ;;  %v82_v3 = vld [vmem:[%s196_s0 + $0x5] ss:$8 sm:$0xf]  }
   0x2   :  { %v79_v1 = vld [vmem:[%s196_s0 + $0x7] ss:$8 sm:$0xf0]   ;;  %v83_v4 = vld [vmem:[%s196_s0 + $0x5] ss:$8 sm:$0xf0]  }
   0x3   :  { %v13_v2 = vsel %vm4_vm0, %v79_v1, %v78_v0  ;;  %v33_v5 = vsel %vm4_vm0, %v83_v4, %v82_v3  ;;  %v80_v6 = vld [vmem:[%s196_s0 + $0x6] ss:$8 sm:$0xf]   ;;  %v84_v9 = vld [vmem:[%s196_s0 + $0x4] ss:$8 sm:$0xf]  }
   0x4   :  { %14 = vrot.lane.b32.xlu0 %v13_v2, %s99_s14  ;;  %v81_v7 = vld [vmem:[%s196_s0 + $0x6] ss:$8 sm:$0xf0]   ;;  %34 = vrot.lane.b32.xlu1 %v33_v5, %s100_s19  ;;  %v85_v10 = vld [vmem:[%s196_s0 + $0x4] ss:$8 sm:$0xf0]  }
   0x5   :  { %v23_v8 = vsel %vm4_vm0, %v81_v7, %v80_v6  ;;  %v86_v11 = vld [vmem:[%s196_s0 + $0x3] ss:$8 sm:$0xf]   ;;  %v43_v12 = vsel %vm4_vm0, %v85_v10, %v84_v9  ;;  %s101_s28 = smov 96   ;;  %s102_s4 = smov 64   ;;  %vm36_vm4 = vcmask 786048  }
   0x6   :  { %v87_v13 = vld [vmem:[%s196_s0 + $0x3] ss:$8 sm:$0xf0]   ;;  %v88_v14 = vld [vmem:[%s196_s0 + $0x2] ss:$8 sm:$0xf]  }
   0x7   :  { %v89_v15 = vld [vmem:[%s196_s0 + $0x2] ss:$8 sm:$0xf0]   ;;  %v53_v16 = vsel %vm4_vm0, %v87_v13, %v86_v11  ;;  %v90_v17 = vld [vmem:[%s196_s0 + $0x1] ss:$8 sm:$0xf]  }
   0x8   :  { %24 = vrot.lane.b32.xlu0 %v23_v8, %s101_s28  ;;  %44 = vrot.lane.b32.xlu1 %v43_v12, %s102_s4  ;;  %v63_v18 = vsel %vm4_vm0, %v89_v15, %v88_v14  ;;  %v91_v19 = vld [vmem:[%s196_s0 + $0x1] ss:$8 sm:$0xf0]   ;;  %v2_v20 = vld [vmem:[%s196_s0] ss:$8 sm:$0xf]  }
   0x9   :  { %v3_v21 = vld [vmem:[%s196_s0] ss:$8 sm:$0xf0]   ;;  %s103_s0 = smov 48   ;;  %s104_s13 = smov 32   ;;  %v73_v23 = vsel %vm4_vm0, %v91_v19, %v90_v17  ;;  %vm46_vm5 = vcmask 654848  }
   0xa   :  { %v5_v22 = vsel %vm4_vm0, %v3_v21, %v2_v20  ;;  %s105_s16 = smov 16   ;;  %vm56_vm6 = vcmask 523648   ;;  %vm66_vm7 = vcmask 392448   ;;  %vm76_vm8 = vcmask 261248  }
   0xb   :  { %7 = vst.msk [vmem:[%s197_s1] sm:$0xff] %vm6_vm1, %v5_v22  }
   0xc   :  { %54 = vrot.lane.b32.xlu0 %v53_v16, %s103_s0  ;;  %64 = vrot.lane.b32.xlu1 %v63_v18, %s104_s13 }
  0x10   :  { %74 = vrot.lane.b32.xlu0 %v73_v23, %s105_s16 }
  0x76   :  { %v15_v24 = vpop.permute.xlu0 %14   ;;  %v35_v25 = vpop.permute.xlu1 %34  }
  0x77   :  { %17 = vst.msk [vmem:[%s197_s1] sm:$0xff] %vm16_vm2, %v15_v24  }
  0x7a   :  { %v25_v26 = vpop.permute.xlu0 %24   ;;  %v45_v27 = vpop.permute.xlu1 %44  }
  0x7b   :  { %27 = vst.msk [vmem:[%s197_s1] sm:$0xff] %vm26_vm3, %v25_v26  }
  0x7c   :  { %37 = vst.msk [vmem:[%s197_s1] sm:$0xff] %vm36_vm4, %v35_v25  }
  0x7d   :  { %47 = vst.msk [vmem:[%s197_s1] sm:$0xff] %vm46_vm5, %v45_v27  }
  0x7e   :  { %v55_v28 = vpop.permute.xlu0 %54   ;;  %v65_v29 = vpop.permute.xlu1 %64  }
  0x7f   :  { %57 = vst.msk [vmem:[%s197_s1] sm:$0xff] %vm56_vm6, %v55_v28  }
  0x80   :  { %67 = vst.msk [vmem:[%s197_s1] sm:$0xff] %vm66_vm7, %v65_v29  }
  0x82   :  { %v75_v30 = vpop.permute.xlu0 %74  }
  0x83   :  { %77 = vst.msk [vmem:[%s197_s1] sm:$0xff] %vm76_vm8, %v75_v30  }

// kernel: ernie45_moe_model.5
= control target key start
LH: loop header
LB: loop body
LE: loop exit
PB: predicated region body
PF: predicated region fallthrough
CT: control target
= control target key end

     0   :  { %s120_s0 = inlined_call_operand.vmem [shape: bf16[8,128], index: 0, kind: input, shape index: {}]   ;;  %s121_s1 = inlined_call_operand.vmem [shape: f32[8,128], index: 1, kind: input, shape index: {}]   ;;  %s122_s2 = inlined_call_operand.vmem [shape: f32[1,128], index: 2, kind: input, shape index: {}]   ;;  %s123_s3 = inlined_call_operand.hbm [shape: f32[8,128], index: 3, kind: output, shape index: {}]  }
   0x1   :  { %v15_v0 = vld [vmem:[%s120_s0] sm:$0xf] }
   0x2   :  { %v17_v1 = vld [vmem:[%s121_s1] sm:$0xff] }
   0x3   :  { %8 = vsyncpa [#allocation3], 0  ;;  %v16_v2 = vunpack.c.l.bf16 %v15_v0  ;;  %v50_v9 = vld [vmem:[%s122_s2] ss:$0 sm:$0xff]  ;;  %s78_s18 = smov [#allocation2]  }
   0x4   :  { %s42_s0 = sshll.u32 %s78_s18, 4  ;;  %s43_s0 = int_to_ptr.vmem [resolvable:$true] %s42_s0 }
   0x5   :  { %v18_v3 = vadd.f32 %v17_v1, %v16_v2  ;;  %s54_s1 = scalar_lea.vmem %s43_s0, 128  ;;  %p59_p1 = scmp.lt.s32.totalorder %s43_s0, %s43_s0 }
   0x6   :  { %p55_p0 = scmp.ne.s32.totalorder %s43_s0, %s54_s1  ;;  %p60_p2 = scmp.lt.s32.totalorder %s54_s1, %s54_s1 }
   0x7   :  { %v20_v4 = vmul.f32 %v18_v3, %v18_v3 }
   0x8   :  { %p61_p3 = por %p60_p2, %p59_p1 }
   0x9   :  { %21 = vadd.xlane.f32.xlu0 %v20_v4 }
   0xa   :  { %p62_p4 = pnand %p61_p3, %p55_p0 }
  0x96   :  { %v22_v5 = vpop.xlane.xlu0 %21 }
  0x97   :  { %v24_v6 = vmul.f32 0.0078125, %v22_v5 }
  0x99   :  { %v25_v7 = vadd.f32 1e-05, %v24_v6 }
  0x9b   :  { %52 = vrsqrt.f32 %v25_v7 }
  0xa5   :  { %v53_v8 = vpop.eup %52 }
  0xa6   :  { %v27_v10 = vmul.f32 %v53_v8, %v18_v3 }
  0xa8   :  { %v34_v11 = vmul.f32 %v50_v9, %v27_v10 }
  0xaa   :  { %35 = vst [vmem:[#allocation2] sm:$0xff] %v34_v11 }
  0xab   :  { %65 = shalt.err (!%p62_p4)
}
  0xac   :  { %s66_s21 = scalar_lea.hbm %s123_s3, 128 }
  0xad   :  { %p67_p5 = scmp.ne.s32.totalorder %s123_s3, %s66_s21  ;;  %p70_p6 = scmp.lt.u32.totalorder %s66_s21, %s123_s3 }
  0xaf   :  { %p72_p7 = pnand %p70_p6, %p67_p5 }
  0xb1   :  { %75 = shalt.err (!%p72_p7)
}
  0xb2   :  { %45 = dma.vmem_to_hbm [thread:$0]  %s43_s0, 128, %s123_s3, [#allocation3]  }
  0xb3   :  { %76 = dma.done.wait [#allocation3], 128  }
  0xb4   :  { %77 = vsyncadd [#allocation3], 4294967168 }
  0xb5   :  { %49 = vsyncpa [#allocation3], 1 }

// kernel: ernie45_moe_model.3
= control target key start
LH: loop header
LB: loop body
LE: loop exit
PB: predicated region body
PF: predicated region fallthrough
CT: control target
= control target key end

     0   :  { %20 = vsyncpa [#allocation3], 0  ;;  %s2443_s0 = inlined_call_operand.vmem [shape: f32[8,128], index: 0, kind: input, shape index: {}]   ;;  %s2444_s1 = inlined_call_operand.vmem [shape: f32[1,128], index: 1, kind: input, shape index: {}]   ;;  %s2445_s2 = inlined_call_operand.hbm [shape: bf16[256,128], index: 2, kind: input, shape index: {}]   ;;  %s2446_s3 = inlined_call_operand.vmem [shape: bf16[128,128], index: 3, kind: input, shape index: {}]   ;;  %s2447_s4 = inlined_call_operand.vmem [shape: bf16[64,64], index: 4, kind: input, shape index: {}]   ;;  %s2448_s5 = inlined_call_operand.vmem [shape: f32[8,128], index: 5, kind: input, shape index: {}]   ;;  %s2449_s6 = inlined_call_operand.vmem [shape: f32[8,128], index: 6, kind: input, shape index: {}]   ;;  %s2450_s7 = inlined_call_operand.vmem [shape: f32[8,64], index: 7, kind: input, shape index: {}]   ;;  %s2451_s8 = inlined_call_operand.vmem [shape: f32[8,64], index: 8, kind: input, shape index: {}]   ;;  %s2452_s9 = inlined_call_operand.hbm [shape: bf16[128,128], index: 9, kind: input, shape index: {}]   ;;  %s2453_s10 = inlined_call_operand.vmem [shape: f32[1,128], index: 10, kind: input, shape index: {}]   ;;  %s2454_s11 = inlined_call_operand.vmem [shape: bf16[512,128], index: 11, kind: input, shape index: {}]   ;;  %s2455_s12 = inlined_call_operand.vmem [shape: bf16[128,256], index: 12, kind: input, shape index: {}]   ;;  %s2456_s13 = inlined_call_operand.vmem [shape: bf16[8,128], index: 13, kind: output, shape index: {0}]   ;;  %s2457_s14 = inlined_call_operand.vmem [shape: f32[8,128], index: 14, kind: output, shape index: {1}]  }
   0x1   :  { %21 = vsyncpa [#allocation5], 0  ;;  %s2007_s29 = smov [#allocation2]   ;;  %s1959_s17 = scalar_lea.hbm %s2445_s2, 2048 }
   0x2   :  { %s31_s30 = sshll.u32 %s2007_s29, 4  ;;  %p1960_p0 = scmp.ne.s32.totalorder %s2445_s2, %s1959_s17  ;;  %s32_s30 = int_to_ptr.vmem [resolvable:$true] %s31_s30 }
   0x3   :  { %p1963_p1 = scmp.lt.u32.totalorder %s1959_s17, %s2445_s2 }
   0x5   :  { %p1965_p2 = pnand %p1963_p1, %p1960_p0 }
   0x7   :  { %1968 = shalt.err (!%p1965_p2)
}
   0x8   :  { %s1969_s22 = scalar_lea.vmem %s32_s30, 2048  ;;  %p1974_p4 = scmp.lt.s32.totalorder %s32_s30, %s32_s30 }
   0x9   :  { %p1970_p3 = scmp.ne.s32.totalorder %s32_s30, %s1969_s22  ;;  %p1975_p5 = scmp.lt.s32.totalorder %s1969_s22, %s1969_s22 }
   0xb   :  { %p1976_p6 = por %p1975_p5, %p1974_p4 }
   0xd   :  { %p1977_p7 = pnand %p1976_p6, %p1970_p3 }
   0xf   :  { %1980 = shalt.err (!%p1977_p7)
}
  0x10   :  { %s2008_s23 = smov 64   ;;  %s2009_s24 = smov 4  }
  0x11   :  { %37 = dma.hbm_to_vmem [thread:$0]  %s2445_s2, 2048, %s32_s30, [#allocation3], %s2008_s23, %s2008_s23, %s2009_s24  }
  0x12   :  { %s2010_s27 = smov [#allocation4]   ;;  %s1981_s16 = scalar_lea.hbm %s2452_s9, 1024 }
  0x13   :  { %s55_s28 = sshll.u32 %s2010_s27, 4  ;;  %p1982_p8 = scmp.ne.s32.totalorder %s2452_s9, %s1981_s16  ;;  %s56_s28 = int_to_ptr.vmem [resolvable:$true] %s55_s28 }
  0x14   :  { %p1985_p9 = scmp.lt.u32.totalorder %s1981_s16, %s2452_s9 }
  0x16   :  { %p1987_p10 = pnand %p1985_p9, %p1982_p8 }
  0x18   :  { %1990 = shalt.err (!%p1987_p10)
}
  0x19   :  { %s1991_s21 = scalar_lea.vmem %s56_s28, 1024  ;;  %p1996_p12 = scmp.lt.s32.totalorder %s56_s28, %s56_s28 }
  0x1a   :  { %p1992_p11 = scmp.ne.s32.totalorder %s56_s28, %s1991_s21  ;;  %p1997_p13 = scmp.lt.s32.totalorder %s1991_s21, %s1991_s21 }
  0x1c   :  { %p1998_p0 = por %p1997_p13, %p1996_p12 }
  0x1e   :  { %p1999_p1 = pnand %p1998_p0, %p1992_p11 }
  0x20   :  { %2002 = shalt.err (!%p1999_p1)
}
  0x21   :  { %61 = dma.hbm_to_vmem [thread:$0]  %s2452_s9, 1024, %s56_s28, [#allocation5], %s2008_s23, %s2008_s23, %s2009_s24  }
  0x22   :  { %2003 = dma.done.wait [#allocation3], 2048  }
  0x23   :  { %2004 = vsyncadd [#allocation3], 4294965248 }
  0x24   :  { %2005 = dma.done.wait [#allocation5], 1024  }
  0x25   :  { %2006 = vsyncadd [#allocation5], 4294966272  ;;  %v2121_v0 = vld [vmem:[%s2443_s0] sm:$0xff]  ;;  %v1841_v4 = vld [vmem:[#allocation2 + $0x48] sm:$0xff]   ;;  %v2011_v15 = vmov 0.0   ;;  %vm421_vm0 = vcmask 523264  }
  0x26   :  { %v77_v1 = vmul.f32 %v2121_v0, %v2121_v0  ;;  %v1839_v2 = vld [vmem:[#allocation2 + $0x40] sm:$0xff]   ;;  %v1842_v5 = vld [vmem:[#allocation2 + $0x8] sm:$0xff]   ;;  %v1843_v6 = vld [vmem:[#allocation2 + $0x50] sm:$0xff]   ;;  %1731 = vmatprep.subr.bf16.mxu1 %v2011_v15  ;;  %vm2012_vm1 = vmmov 0   ;;  %vm485_vm2 = vcmask 261120   ;;  %vm534_vm4 = vcmask 64512  }
  0x27   :  { %v1840_v3 = vld [vmem:[#allocation2] sm:$0xff]   ;;  %1638 = vmatprep.subr.bf16.mxu0 %v1839_v2  ;;  %v1844_v7 = vld [vmem:[#allocation2 + $0x10] sm:$0xff]   ;;  %v1845_v8 = vld [vmem:[#allocation2 + $0x58] sm:$0xff]   ;;  %1747 = vmatprep.mubr.msk.bf16.mxu1 %vm2012_vm1, %v2011_v15  ;;  %vm553_vm5 = vcmask 1043456   ;;  %vm929_vm6 = vcmask 785408  }
  0x28   :  { %78 = vadd.xlane.f32.xlu0 %v77_v1  ;;  %1639 = vmatpush3.bf16.xpose.msra.mxu0 %v1840_v3  ;;  %v1846_v9 = vld [vmem:[#allocation2 + $0x18] sm:$0xff]   ;;  %v1847_v10 = vld [vmem:[#allocation2 + $0x60] sm:$0xff]   ;;  %v1849_v12 = vld [vmem:[#allocation2 + $0x68] sm:$0xff]  }
  0x29   :  { %1640 = vmatprep.subr.bf16.mxu0 %v1841_v4  ;;  %v1848_v11 = vld [vmem:[#allocation2 + $0x20] sm:$0xff]   ;;  %v1850_v14 = vld [vmem:[#allocation2 + $0x28] sm:$0xff]   ;;  %v1851_v16 = vld [vmem:[#allocation2 + $0x70] sm:$0xff]  }
  0x2a   :  { %v1855_v13 = vld [vmem:[%s2446_s3] sm:$0xff]   ;;  %v1856_v17 = vld [vmem:[%s2446_s3 + $0x8] sm:$0xff]   ;;  %v1852_v18 = vld [vmem:[#allocation2 + $0x30] sm:$0xff]  }
  0x2b   :  { %1732 = vmatpush3.bf16.xpose.msra.mxu1 %v1855_v13  ;;  %v1853_v19 = vld [vmem:[#allocation2 + $0x78] sm:$0xff]   ;;  %v1857_v20 = vld [vmem:[%s2446_s3 + $0x10] sm:$0xff]   ;;  %v1859_v23 = vld [vmem:[%s2446_s3 + $0x20] sm:$0xff]  }
  0x2c   :  { %1733 = vmatprep.subr.bf16.mxu1 %v2011_v15  ;;  %v1854_v21 = vld [vmem:[#allocation2 + $0x38] sm:$0xff]   ;;  %v1861_v24 = vld [vmem:[%s2446_s3 + $0x28] sm:$0xff]   ;;  %v1863_v25 = vld [vmem:[%s2446_s3 + $0x30] sm:$0xff]  }
  0x2d   :  { %v1858_v22 = vld [vmem:[%s2446_s3 + $0x18] sm:$0xff]   ;;  %v1541_v31 = vld [vmem:[%s2444_s1] ss:$0 sm:$0xff]  ;;  %v1862_v37 = vld [vmem:[%s2447_s4 + $0x8] sm:$0xff]  }
  0x2e   :  { %v1865_v26 = vld [vmem:[%s2446_s3 + $0x38] sm:$0xff]   ;;  %v1860_v33 = vld [vmem:[%s2447_s4] sm:$0xff]   ;;  %v429_v38 = vsel %vm421_vm0, %v1862_v37, 0  ;;  %v1864_v39 = vld [vmem:[%s2447_s4 + $0x10] sm:$0xff]  }
  0x2f   :  { %v426_v36 = vsel %vm421_vm0, %v1860_v33, 0  ;;  %v432_v40 = vsel %vm421_vm0, %v1864_v39, 0  ;;  %v1866_v41 = vld [vmem:[%s2447_s4 + $0x18] sm:$0xff]   ;;  %v286_v49 = vld [vmem:[%s2448_s5] sm:$0xff]  ;;  %s2013_s5 = smov 96  }
  0x30   :  { %1641 = vmatpush3.bf16.xpose.msra.mxu0 %v1842_v5  ;;  %v435_v42 = vsel %vm421_vm0, %v1866_v41, 0  ;;  %v287_v50 = vld [vmem:[%s2449_s6] sm:$0xff]  ;;  %s2014_s6 = smov 32  }
  0x31   :  { %1642 = vmatprep.subr.bf16.mxu0 %v1843_v6  ;;  %v288_v51 = vld [vmem:[%s2450_s7] sm:$0xff] }
  0x32   :  { %v289_v52 = vld [vmem:[%s2451_s8] sm:$0xff] }
  0x33   :  { %1734 = vmatpush3.bf16.xpose.msra.mxu1 %v1856_v17 }
  0x34   :  { %1735 = vmatprep.subr.bf16.mxu1 %v2011_v15 }
  0x38   :  { %1643 = vmatpush3.bf16.xpose.msra.mxu0 %v1844_v7  ;;  %v480_v7 = vlaneseq }
  0x39   :  { %1644 = vmatprep.subr.bf16.mxu0 %v1845_v8 }
  0x3a   :  { %v2212_v8 = vshrl.u32 %v480_v7, 7 }
  0x3b   :  { %1736 = vmatpush3.bf16.xpose.msra.mxu1 %v1857_v20 }
  0x3c   :  { %1737 = vmatprep.subr.bf16.mxu1 %v2011_v15 }
  0x40   :  { %1645 = vmatpush3.bf16.xpose.msra.mxu0 %v1846_v9  ;;  %v2214_v9 = vand.u32 127, %v480_v7 }
  0x41   :  { %1646 = vmatprep.subr.bf16.mxu0 %v1847_v10 }
  0x42   :  { %vm484_vm3 = vcmp.le.s32.totalorder %v2214_v9, %v2212_v8 }
  0x43   :  { %1738 = vmatpush3.bf16.xpose.msra.mxu1 %v1858_v22 }
  0x44   :  { %1739 = vmatprep.subr.bf16.mxu1 %v2011_v15 }
  0x48   :  { %1647 = vmatpush3.bf16.xpose.msra.mxu0 %v1848_v11 }
  0x49   :  { %1648 = vmatprep.subr.bf16.mxu0 %v1849_v12 }
  0x4b   :  { %1740 = vmatpush3.bf16.xpose.msra.mxu1 %v1859_v23 }
  0x4c   :  { %1741 = vmatprep.subr.bf16.mxu1 %v2011_v15 }
  0x50   :  { %1649 = vmatpush3.bf16.xpose.msra.mxu0 %v1850_v14 }
  0x51   :  { %1650 = vmatprep.subr.bf16.mxu0 %v1851_v16 }
  0x53   :  { %1742 = vmatpush3.bf16.xpose.msra.mxu1 %v1861_v24 }
  0x54   :  { %1743 = vmatprep.subr.bf16.mxu1 %v2011_v15 }
  0x58   :  { %1651 = vmatpush3.bf16.xpose.msra.mxu0 %v1852_v18 }
  0x59   :  { %1652 = vmatprep.subr.bf16.mxu0 %v1853_v19 }
  0x5b   :  { %1744 = vmatpush3.bf16.xpose.msra.mxu1 %v1863_v25 }
  0x5c   :  { %1745 = vmatprep.subr.bf16.mxu1 %v2011_v15 }
  0x60   :  { %1653 = vmatpush3.bf16.xpose.msra.mxu0 %v1854_v21 }
  0x61   :  { %1751 = vmatprep.subr.bf16.mxu0 %v2011_v15 }
  0x63   :  { %1746 = vmatpush3.bf16.xpose.msra.mxu1 %v1865_v26 }
  0x64   :  { %1763 = vmatprep.subr.bf16.mxu1 %v2011_v15 }
  0xb5   :  { %v79_v27 = vpop.xlane.xlu0 %78 }
  0xb6   :  { %v81_v28 = vmul.f32 0.0078125, %v79_v27 }
  0xb8   :  { %v82_v29 = vadd.f32 1e-05, %v81_v28 }
  0xba   :  { %1931 = vrsqrt.f32 %v82_v29 }
  0xc4   :  { %v1932_v30 = vpop.eup %1931 }
  0xc5   :  { %v84_v32 = vmul.f32 %v1932_v30, %v2121_v0 }
  0xc7   :  { %v91_v34 = vmul.f32 %v1541_v31, %v84_v32 }
  0xc9   :  { %v92_v35 = vpack.c.bf16 %v91_v34, %v91_v34 }
  0xcb   :  { %1654 = vmatprep.mubr.bf16.mxu0 %v92_v35 }
  0xcc   :  { %1655 = vmatmul.mubr.bf16.vlgmr.msra.gmra.mrb[0].mxu0 %v92_v35 }
  0xcd   :  { %1752 = vmatpush3.bf16.xpose.msra.mxu0 %v426_v36  ;;  %1759 = vmatprep.mubr.msk.bf16.mxu0 %vm2012_vm1, %v2011_v15 }
  0xce   :  { %1753 = vmatprep.subr.bf16.mxu0 %v2011_v15 }
  0xd5   :  { %1754 = vmatpush3.bf16.xpose.msra.mxu0 %v429_v38 }
  0xd6   :  { %1755 = vmatprep.subr.bf16.mxu0 %v2011_v15 }
  0xdd   :  { %1756 = vmatpush3.bf16.xpose.msra.mxu0 %v432_v40 }
  0xde   :  { %1757 = vmatprep.subr.bf16.mxu0 %v2011_v15 }
  0xe5   :  { %1758 = vmatpush3.bf16.xpose.msra.mxu0 %v435_v42 }
  0xe6   :  { %1787 = vmatprep.subr.bf16.mxu0 %v2011_v15 }
 0x19f   :  { %v255_v43 = vpop.f32.mrb[0].mxu0 }
 0x1a0   :  { %v307_v44 = vpack.c.bf16 %v255_v43, %v255_v43  ;;  %v257_v45 = vpop.f32.mrb[1].mxu0  ;;  %v306_v54 = vmul.f32 %v286_v49, %v255_v43 }
 0x1a1   :  { %v2187_v46 = vpack.c.bf16 %v257_v45, %v257_v45  ;;  %v259_v47 = vpop.f32.mrb[2].mxu0  ;;  %v399_v58 = vmul.f32 %v288_v51, %v257_v45 }
 0x1a2   :  { %v260_v48 = vpop.f32.mrb[3].mxu0  ;;  %1748 = vmatmul.mubr.bf16.vlgmr.msra.gmra.mrb[0].mxu1 %v307_v44 }
 0x1a3   :  { %1760 = vmatmul.mubr.msk.bf16.vlgmr.msra.gmra.mrb[4].mxu0 %vm421_vm0, %v2187_v46  ;;  %1765 = vmatprep.mubr.msk.bf16.mxu1 %vm2012_vm1, %v2011_v15 }
 0x1a4   :  { %1789 = vmatprep.mubr.msk.bf16.mxu0 %vm2012_vm1, %v2011_v15 }
 0x275   :  { %v390_v53 = vpop.f32.mrb[0].mxu1 }
 0x276   :  { %v396_v55 = vmul.f32 %v390_v53, %v287_v50  ;;  %v1749_v56 = vpop.f32.mrb[1].mxu1  ;;  %v471_v57 = vpop.f32.mrb[4].mxu0 }
 0x277   :  { %v477_v59 = vmul.f32 %v471_v57, %v289_v52  ;;  %v393_v60 = vpop.f32.mrb[2].mxu1  ;;  %v1761_v61 = vpop.f32.mrb[5].mxu0 }
 0x278   :  { %v397_v62 = vadd.f32 %v396_v55, %v306_v54  ;;  %v1750_v63 = vpop.f32.mrb[3].mxu1  ;;  %v474_v1 = vpop.f32.mrb[6].mxu0 }
 0x279   :  { %v478_v2 = vadd.f32 %v477_v59, %v399_v58  ;;  %v1762_v3 = vpop.f32.mrb[7].mxu0 }
 0x27a   :  { %v398_v6 = vpack.c.bf16 %v397_v62, %v397_v62 }
 0x27b   :  { %v479_v4 = vpack.c.bf16 %v478_v2, %v478_v2 }
 0x27d   :  { %v490_v5 = vsel %vm485_vm2, %v479_v4, 0 }
 0x27e   :  { %1764 = vmatpush3.bf16.xpose.msra.mxu1 %v490_v5 }
 0x27f   :  { %1769 = vmatprep.subr.bf16.mxu1 %v2011_v15 }
 0x285   :  { %1766 = vmatmul.mubr.msk.bf16.vlgmr.msra.gmra.mrb[4].mxu1 %vm485_vm2, %v398_v6 }
 0x286   :  { %1771 = vmatprep.mubr.msk.bf16.mxu1 %vm2012_vm1, %v2011_v15 }
 0x358   :  { %v526_v10 = vpop.f32.mrb[4].mxu1 }
 0x359   :  { %v532_v11 = vmul.f32 0.17677669, %v526_v10  ;;  %v1767_v12 = vpop.f32.mrb[5].mxu1 }
 0x35a   :  { %v529_v13 = vpop.f32.mrb[6].mxu1 }
 0x35b   :  { %v1768_v14 = vpop.f32.mrb[7].mxu1  ;;  %v533_v16 = vsel %vm484_vm3, %v532_v11, -1e+30 }
 0x35c   :  { %v535_v17 = vsel %vm534_vm4, %v533_v16, -inf }
 0x35d   :  { %536 = vmax.xlane.f32.xlu0 %v535_v17 }
 0x373   :  { %598 = vrot.lane.b32.xlu0 %v398_v6, %s2013_s5 }
 0x3ea   :  { %v537_v18 = vpop.xlane.xlu0 %536 }
 0x3eb   :  { %v538_v19 = vsub.f32 %v533_v16, %v537_v18 }
 0x3ed   :  { %v539_v20 = vmul.f32 1.442695, %v538_v19 }
 0x3ee   :  { %v599_v32 = vpop.permute.xlu0 %598 }
 0x3ef   :  { %1933 = vpow2.f32 %v539_v20 }
 0x3f9   :  { %v1934_v21 = vpop.eup %1933 }
 0x3fa   :  { %v541_v22 = vsel %vm534_vm4, %v1934_v21, 0.0 }
 0x3fb   :  { %542 = vadd.xlane.f32.xlu1 %v541_v22 }
 0x40c   :  { %548 = vrot.lane.b32.xlu1 %v2187_v46, %s2008_s23 }
 0x410   :  { %703 = vrot.lane.b32.xlu1 %v479_v4, %s2013_s5 }
 0x414   :  { %700 = vrot.lane.b32.xlu1 %v398_v6, %s2008_s23 }
 0x418   :  { %813 = vrot.lane.b32.xlu1 %v398_v6, %s2014_s6 }
 0x488   :  { %v543_v23 = vpop.xlane.xlu1 %542 }
 0x489   :  { %1935 = vrcp.f32 %v543_v23 }
 0x48c   :  { %v549_v24 = vpop.permute.xlu1 %548 }
 0x48d   :  { %v555_v25 = vsel %vm553_vm5, %v549_v24, 0 }
 0x48e   :  { %1770 = vmatpush3.bf16.msra.mxu1 %v555_v25 }
 0x48f   :  { %1775 = vmatprep.subr.bf16.mxu1 %v2011_v15 }
 0x490   :  { %v704_v26 = vpop.permute.xlu1 %703 }
 0x491   :  { %v709_v27 = vsel %vm485_vm2, %v704_v26, 0  ;;  %v1867_v26 = vld [vmem:[#allocation4] sm:$0xff]  }
 0x492   :  { %1788 = vmatpush3.bf16.xpose.msra.mxu0 %v709_v27 }
 0x493   :  { %v1936_v28 = vpop.eup %1935  ;;  %1799 = vmatprep.subr.bf16.mxu0 %v2011_v15 }
 0x494   :  { %v545_v29 = vmul.f32 %v1936_v28, %v1934_v21  ;;  %v701_v31 = vpop.permute.xlu1 %700  ;;  %v1869_v28 = vld [vmem:[#allocation4 + $0x10] sm:$0xff]  }
 0x496   :  { %v546_v30 = vpack.c.bf16 %v545_v29, %v545_v29  ;;  %v1870_v29 = vld [vmem:[#allocation4 + $0x18] sm:$0xff]  }
 0x498   :  { %1772 = vmatmul.mubr.msk.bf16.vlgmr.msra.gmra.mrb[8].mxu1 %vm534_vm4, %v546_v30  ;;  %v814_v33 = vpop.permute.xlu1 %813  ;;  %v1871_v30 = vld [vmem:[#allocation4 + $0x20] sm:$0xff]  }
 0x499   :  { %1776 = vmatpush3.bf16.xpose.msra.mxu1 %v490_v5  ;;  %1790 = vmatmul.mubr.msk.bf16.vlgmr.msra.gmra.mrb[8].mxu0 %vm485_vm2, %v701_v31  ;;  %v1872_v31 = vld [vmem:[#allocation4 + $0x28] sm:$0xff]  }
 0x49a   :  { %1800 = vmatpush3.bf16.xpose.msra.mxu0 %v709_v27  ;;  %1777 = vmatprep.mubr.msk.bf16.mxu1 %vm2012_vm1, %v2011_v15  ;;  %v1868_v27 = vld [vmem:[#allocation4 + $0x8] sm:$0xff]  }
 0x49b   :  { %1781 = vmatprep.subr.bf16.mxu1 %v2011_v15  ;;  %1801 = vmatprep.mubr.msk.bf16.mxu0 %vm2012_vm1, %v2011_v15 }
 0x49c   :  { %1811 = vmatprep.subr.bf16.mxu0 %v2011_v15 }
 0x4a0   :  { %1778 = vmatmul.mubr.msk.bf16.vlgmr.msra.gmra.mrb[12].mxu1 %vm485_vm2, %v599_v32  ;;  %v1873_v32 = vld [vmem:[#allocation4 + $0x30] sm:$0xff]  }
 0x4a1   :  { %1782 = vmatpush3.bf16.msra.mxu1 %v555_v25  ;;  %1802 = vmatmul.mubr.msk.bf16.vlgmr.msra.gmra.mrb[12].mxu0 %vm485_vm2, %v814_v33  ;;  %v1874_v33 = vld [vmem:[#allocation4 + $0x38] sm:$0xff]  }
 0x4a2   :  { %1783 = vmatprep.mubr.msk.bf16.mxu1 %vm2012_vm1, %v2011_v15  ;;  %1793 = vmatprep.subr.bf16.mxu1 %v2011_v15 }
 0x4a3   :  { %1827 = vmatprep.mubr.msk.bf16.mxu0 %vm2012_vm1, %v2011_v15  ;;  %1812 = vmatpush3.bf16.xpose.msra.mxu0 %v1867_v26  ;;  %v1906_v26 = vld [vmem:[%s2454_s11 + $0xb8] sm:$0xff]  }
 0x4a4   :  { %1813 = vmatprep.subr.bf16.mxu0 %v2011_v15 }
 0x4ab   :  { %1814 = vmatpush3.bf16.xpose.msra.mxu0 %v1868_v27  ;;  %v1909_v27 = vld [vmem:[%s2455_s12 + $0x4] ss:$8 sps:$4 sm:$0xff]  }
 0x4ac   :  { %1815 = vmatprep.subr.bf16.mxu0 %v2011_v15 }
 0x4b3   :  { %1816 = vmatpush3.bf16.xpose.msra.mxu0 %v1869_v28 }
 0x4b4   :  { %1817 = vmatprep.subr.bf16.mxu0 %v2011_v15 }
 0x4bb   :  { %1818 = vmatpush3.bf16.xpose.msra.mxu0 %v1870_v29 }
 0x4bc   :  { %1819 = vmatprep.subr.bf16.mxu0 %v2011_v15 }
 0x4c3   :  { %1820 = vmatpush3.bf16.xpose.msra.mxu0 %v1871_v30 }
 0x4c4   :  { %1821 = vmatprep.subr.bf16.mxu0 %v2011_v15 }
 0x4cb   :  { %1822 = vmatpush3.bf16.xpose.msra.mxu0 %v1872_v31 }
 0x4cc   :  { %1823 = vmatprep.subr.bf16.mxu0 %v2011_v15 }
 0x4d3   :  { %1824 = vmatpush3.bf16.xpose.msra.mxu0 %v1873_v32  ;;  %v1587_v32 = vld [vmem:[%s2453_s10] ss:$0 sm:$0xff] }
 0x4d4   :  { %1825 = vmatprep.subr.bf16.mxu0 %v2011_v15 }
 0x4db   :  { %1826 = vmatpush3.bf16.xpose.msra.mxu0 %v1874_v33 }
 0x56b   :  { %v2248_v34 = vpop.f32.mrb[8].mxu1 }
 0x56c   :  { %v1773_v35 = vpop.f32.mrb[9].mxu1  ;;  %v745_v36 = vpop.f32.mrb[8].mxu0 }
 0x56d   :  { %v751_v37 = vmul.f32 0.17677669, %v745_v36  ;;  %v594_v38 = vpop.f32.mrb[10].mxu1  ;;  %v1791_v39 = vpop.f32.mrb[9].mxu0 }
 0x56e   :  { %v1774_v40 = vpop.f32.mrb[11].mxu1  ;;  %v748_v41 = vpop.f32.mrb[10].mxu0 }
 0x56f   :  { %v1792_v42 = vpop.f32.mrb[11].mxu0  ;;  %v752_v43 = vsel %vm484_vm3, %v751_v37, -1e+30 }
 0x570   :  { %v753_v44 = vsel %vm534_vm4, %v752_v43, -inf }
 0x571   :  { %754 = vmax.xlane.f32.xlu1 %v753_v44 }
 0x573   :  { %v637_v45 = vpop.f32.mrb[12].mxu1 }
 0x574   :  { %v643_v47 = vmul.f32 0.17677669, %v637_v45  ;;  %v1779_v48 = vpop.f32.mrb[13].mxu1  ;;  %v852_v49 = vpop.f32.mrb[12].mxu0 }
 0x575   :  { %v858_v50 = vmul.f32 0.17677669, %v852_v49  ;;  %v640_v51 = vpop.f32.mrb[14].mxu1  ;;  %v1803_v52 = vpop.f32.mrb[13].mxu0 }
 0x576   :  { %v1780_v53 = vpop.f32.mrb[15].mxu1  ;;  %v855_v54 = vpop.f32.mrb[14].mxu0  ;;  %v644_v55 = vsel %vm484_vm3, %v643_v47, -1e+30 }
 0x577   :  { %v1804_v56 = vpop.f32.mrb[15].mxu0  ;;  %v645_v57 = vsel %vm534_vm4, %v644_v55, -inf  ;;  %v859_v58 = vsel %vm484_vm3, %v858_v50, -1e+30  ;;  %v1875_v54 = vld [vmem:[%s2454_s11 + $0x40] sm:$0xff]  }
 0x578   :  { %646 = vmax.xlane.f32.xlu0 %v645_v57  ;;  %v860_v59 = vsel %vm534_vm4, %v859_v58, -inf  ;;  %v1877_v56 = vld [vmem:[%s2454_s11] sm:$0xff]   ;;  %v1879_v57 = vld [vmem:[%s2454_s11 + $0x48] sm:$0xff]  }
 0x57c   :  { %861 = vmax.xlane.f32.xlu0 %v860_v59  ;;  %v1881_v59 = vld [vmem:[%s2454_s11 + $0x8] sm:$0xff]  }
 0x5fe   :  { %v755_v60 = vpop.xlane.xlu1 %754 }
 0x5ff   :  { %v756_v61 = vsub.f32 %v752_v43, %v755_v60  ;;  %v1882_v60 = vld [vmem:[%s2454_s11 + $0x88] sm:$0xff]  }
 0x601   :  { %v757_v1 = vmul.f32 1.442695, %v756_v61  ;;  %v1883_v61 = vld [vmem:[%s2454_s11 + $0x50] sm:$0xff]  }
 0x605   :  { %v647_v62 = vpop.xlane.xlu0 %646 }
 0x606   :  { %v648_v63 = vsub.f32 %v644_v55, %v647_v62  ;;  %v1876_v55 = vld [vmem:[%s2454_s11 + $0xc0] sm:$0xff]   ;;  %v1884_v62 = vld [vmem:[%s2454_s11 + $0xd0] sm:$0xff]  }
 0x607   :  { %1713 = vmatprep.subr.bf16.mxu0 %v1876_v55 }
 0x608   :  { %v649_v2 = vmul.f32 1.442695, %v648_v63  ;;  %v1885_v63 = vld [vmem:[%s2454_s11 + $0x10] sm:$0xff]  }
 0x609   :  { %v862_v3 = vpop.xlane.xlu0 %861 }
 0x60a   :  { %1937 = vpow2.f32 %v649_v2  ;;  %v863_v4 = vsub.f32 %v859_v58, %v862_v3  ;;  %v1880_v58 = vld [vmem:[%s2454_s11 + $0xc8] sm:$0xff]   ;;  %v1887_v2 = vld [vmem:[%s2454_s11 + $0x58] sm:$0xff]  }
 0x60b   :  { %1939 = vpow2.f32 %v757_v1  ;;  %v1886_v1 = vld [vmem:[%s2454_s11 + $0x90] sm:$0xff]   ;;  %v1888_v3 = vld [vmem:[%s2454_s11 + $0xd8] sm:$0xff]  }
 0x60c   :  { %v864_v5 = vmul.f32 1.442695, %v863_v4  ;;  %v1889_v4 = vld [vmem:[%s2454_s11 + $0x18] sm:$0xff]  }
 0x60e   :  { %1941 = vpow2.f32 %v864_v5  ;;  %v1890_v5 = vld [vmem:[%s2454_s11 + $0x98] sm:$0xff]  }
 0x614   :  { %v1938_v6 = vpop.eup %1937 }
 0x615   :  { %v651_v7 = vsel %vm534_vm4, %v1938_v6, 0.0  ;;  %v1940_v8 = vpop.eup %1939 }
 0x616   :  { %652 = vadd.xlane.f32.xlu0 %v651_v7  ;;  %v759_v10 = vsel %vm534_vm4, %v1940_v8, 0.0  ;;  %v1892_v7 = vld [vmem:[%s2454_s11 + $0xe0] sm:$0xff]  }
 0x618   :  { %v1942_v9 = vpop.eup %1941 }
 0x619   :  { %v866_v11 = vsel %vm534_vm4, %v1942_v9, 0.0 }
 0x61a   :  { %760 = vadd.xlane.f32.xlu0 %v759_v10  ;;  %867 = vadd.xlane.f32.xlu1 %v866_v11  ;;  %v1895_v10 = vld [vmem:[%s2454_s11 + $0x68] sm:$0xff]  }
 0x61b   :  { %v1896_v11 = vld [vmem:[%s2454_s11 + $0xe8] sm:$0xff]  }
 0x630   :  { %765 = vrot.lane.b32.xlu0 %v2187_v46, %s2014_s6 }
 0x6a3   :  { %v653_v12 = vpop.xlane.xlu0 %652 }
 0x6a4   :  { %1943 = vrcp.f32 %v653_v12  ;;  %v1897_v12 = vld [vmem:[%s2454_s11 + $0x28] sm:$0xff]  }
 0x6a7   :  { %v761_v13 = vpop.xlane.xlu0 %760  ;;  %v868_v14 = vpop.xlane.xlu1 %867 }
 0x6a8   :  { %1945 = vrcp.f32 %v761_v13  ;;  %v1898_v13 = vld [vmem:[%s2454_s11 + $0xa8] sm:$0xff]  }
 0x6a9   :  { %1947 = vrcp.f32 %v868_v14 }
 0x6ab   :  { %v766_v18 = vpop.permute.xlu0 %765 }
 0x6ac   :  { %v771_v21 = vsel %vm553_vm5, %v766_v18, 0 }
 0x6ae   :  { %v1944_v16 = vpop.eup %1943 }
 0x6af   :  { %v655_v17 = vmul.f32 %v1944_v16, %v1938_v6  ;;  %v1891_v6 = vld [vmem:[%s2454_s11 + $0x60] sm:$0xff]  }
 0x6b1   :  { %v656_v19 = vpack.c.bf16 %v655_v17, %v655_v17 }
 0x6b2   :  { %v1946_v20 = vpop.eup %1945 }
 0x6b3   :  { %1784 = vmatmul.mubr.msk.bf16.vlgmr.msra.gmra.mrb[16].mxu1 %vm534_vm4, %v656_v19  ;;  %v763_v46 = vmul.f32 %v1946_v20, %v1940_v8  ;;  %v1948_v23 = vpop.eup %1947  ;;  %v1893_v8 = vld [vmem:[%s2454_s11 + $0x20] sm:$0xff]  }
 0x6b4   :  { %1794 = vmatpush3.bf16.msra.mxu1 %v771_v21  ;;  %1795 = vmatprep.mubr.msk.bf16.mxu1 %vm2012_vm1, %v2011_v15  ;;  %v870_v24 = vmul.f32 %v1948_v23, %v1942_v9  ;;  %v1894_v9 = vld [vmem:[%s2454_s11 + $0xa0] sm:$0xff]   ;;  %v1903_v23 = vld [vmem:[%s2454_s11 + $0x78] sm:$0xff]  }
 0x6b5   :  { %1805 = vmatprep.subr.bf16.mxu1 %v2011_v15  ;;  %v764_v22 = vpack.c.bf16 %v763_v46, %v763_v46  ;;  %v1900_v46 = vld [vmem:[%s2454_s11 + $0xf0] sm:$0xff]  }
 0x6b6   :  { %v871_v25 = vpack.c.bf16 %v870_v24, %v870_v24  ;;  %v1904_v24 = vld [vmem:[%s2454_s11 + $0xf8] sm:$0xff]  }
 0x6bb   :  { %1796 = vmatmul.mubr.msk.bf16.vlgmr.msra.gmra.mrb[20].mxu1 %vm534_vm4, %v764_v22  ;;  %v1902_v22 = vld [vmem:[%s2454_s11 + $0xb0] sm:$0xff]  }
 0x6bc   :  { %1806 = vmatpush3.bf16.msra.mxu1 %v771_v21  ;;  %1807 = vmatprep.mubr.msk.bf16.mxu1 %vm2012_vm1, %v2011_v15  ;;  %v1899_v21 = vld [vmem:[%s2454_s11 + $0x70] sm:$0xff]  }
 0x6bd   :  { %1695 = vmatprep.subr.bf16.mxu1 %v1875_v54 }
 0x6c3   :  { %1808 = vmatmul.mubr.msk.bf16.vlgmr.msra.gmra.mrb[24].mxu1 %vm534_vm4, %v871_v25  ;;  %v1905_v25 = vld [vmem:[%s2454_s11 + $0x38] sm:$0xff]  }
 0x6c5   :  { %1696 = vmatpush3.bf16.xpose.msra.mxu1 %v1877_v56 }
 0x6c6   :  { %1697 = vmatprep.subr.bf16.mxu1 %v1879_v57 }
 0x6cd   :  { %1698 = vmatpush3.bf16.xpose.msra.mxu1 %v1881_v59 }
 0x6ce   :  { %1699 = vmatprep.subr.bf16.mxu1 %v1883_v61 }
 0x6d5   :  { %1700 = vmatpush3.bf16.xpose.msra.mxu1 %v1885_v63 }
 0x6d6   :  { %1701 = vmatprep.subr.bf16.mxu1 %v1887_v2 }
 0x6dd   :  { %1702 = vmatpush3.bf16.xpose.msra.mxu1 %v1889_v4 }
 0x6de   :  { %1703 = vmatprep.subr.bf16.mxu1 %v1891_v6 }
 0x6e5   :  { %1704 = vmatpush3.bf16.xpose.msra.mxu1 %v1893_v8 }
 0x6e6   :  { %1705 = vmatprep.subr.bf16.mxu1 %v1895_v10 }
 0x6ed   :  { %1706 = vmatpush3.bf16.xpose.msra.mxu1 %v1897_v12 }
 0x6ee   :  { %1707 = vmatprep.subr.bf16.mxu1 %v1899_v21 }
 0x786   :  { %v694_v35 = vpop.f32.mrb[16].mxu1 }
 0x787   :  { %916 = vrot.lane.b32.xlu1 %v694_v35, %s2014_s6  ;;  %v1785_v36 = vpop.f32.mrb[17].mxu1 }
 0x788   :  { %v697_v37 = vpop.f32.mrb[18].mxu1 }
 0x789   :  { %v1786_v38 = vpop.f32.mrb[19].mxu1  ;;  %v1907_v37 = vld [vmem:[%s2455_s12] ss:$8 sps:$4 sm:$0xff]  }
 0x78a   :  { %v1912_v38 = vld [vmem:[%s2455_s12 + $0x14] ss:$8 sps:$4 sm:$0xff]  }
 0x78e   :  { %v807_v39 = vpop.f32.mrb[20].mxu1 }
 0x78f   :  { %920 = vrot.lane.b32.xlu1 %v807_v39, %s2008_s23  ;;  %v1797_v40 = vpop.f32.mrb[21].mxu1  ;;  %v1910_v39 = vld [vmem:[%s2455_s12 + $0x10] ss:$8 sps:$4 sm:$0xff]  }
 0x790   :  { %v810_v41 = vpop.f32.mrb[22].mxu1  ;;  %v1915_v40 = vld [vmem:[%s2455_s12 + $0x24] ss:$8 sps:$4 sm:$0xff]  }
 0x791   :  { %v1798_v42 = vpop.f32.mrb[23].mxu1  ;;  %v1913_v41 = vld [vmem:[%s2455_s12 + $0x20] ss:$8 sps:$4 sm:$0xff]  }
 0x792   :  { %v1918_v42 = vld [vmem:[%s2455_s12 + $0x34] ss:$8 sps:$4 sm:$0xff]  }
 0x796   :  { %v909_v43 = vpop.f32.mrb[24].mxu1 }
 0x797   :  { %924 = vrot.lane.b32.xlu1 %v909_v43, %s2013_s5  ;;  %v1809_v44 = vpop.f32.mrb[25].mxu1  ;;  %v1916_v43 = vld [vmem:[%s2455_s12 + $0x30] ss:$8 sps:$4 sm:$0xff]  }
 0x798   :  { %v912_v45 = vpop.f32.mrb[26].mxu1  ;;  %v1921_v44 = vld [vmem:[%s2455_s12 + $0x44] ss:$8 sps:$4 sm:$0xff]  }
 0x799   :  { %v1810_v15 = vpop.f32.mrb[27].mxu1  ;;  %v1919_v45 = vld [vmem:[%s2455_s12 + $0x40] ss:$8 sps:$4 sm:$0xff]  }
 0x79a   :  { %v1924_v15 = vld [vmem:[%s2455_s12 + $0x54] ss:$8 sps:$4 sm:$0xff]  }
 0x7f9   :  { %v917_v47 = vpop.permute.xlu1 %916 }
 0x7fa   :  { %v927_v49 = vsel %vm485_vm2, %v2248_v34, %v917_v47  ;;  %v1878_v34 = vld [vmem:[%s2454_s11 + $0x80] sm:$0xff]   ;;  %v1922_v47 = vld [vmem:[%s2455_s12 + $0x50] ss:$8 sps:$4 sm:$0xff]  }
 0x801   :  { %v921_v48 = vpop.permute.xlu1 %920 }
 0x802   :  { %v928_v50 = vsel %vm421_vm0, %v927_v49, %v921_v48  ;;  %v1927_v48 = vld [vmem:[%s2455_s12 + $0x64] ss:$8 sps:$4 sm:$0xff]   ;;  %v1925_v49 = vld [vmem:[%s2455_s12 + $0x60] ss:$8 sps:$4 sm:$0xff]  }
 0x809   :  { %v925_v51 = vpop.permute.xlu1 %924 }
 0x80a   :  { %v930_v52 = vsel %vm929_vm6, %v928_v50, %v925_v51  ;;  %v1930_v50 = vld [vmem:[%s2455_s12 + $0x74] ss:$8 sps:$4 sm:$0xff]   ;;  %v1928_v51 = vld [vmem:[%s2455_s12 + $0x70] ss:$8 sps:$4 sm:$0xff]  }
 0x80b   :  { %v931_v53 = vpack.c.bf16 %v930_v52, %v930_v52 }
 0x80d   :  { %1828 = vmatmul.mubr.bf16.vlgmr.msra.gmra.mrb[16].mxu0 %v931_v53 }
 0x80e   :  { %1714 = vmatpush3.bf16.xpose.msra.mxu0 %v1878_v34 }
 0x80f   :  { %1715 = vmatprep.subr.bf16.mxu0 %v1880_v58 }
 0x816   :  { %1716 = vmatpush3.bf16.xpose.msra.mxu0 %v1882_v60 }
 0x817   :  { %1717 = vmatprep.subr.bf16.mxu0 %v1884_v62 }
 0x81e   :  { %1718 = vmatpush3.bf16.xpose.msra.mxu0 %v1886_v1 }
 0x81f   :  { %1719 = vmatprep.subr.bf16.mxu0 %v1888_v3 }
 0x826   :  { %1720 = vmatpush3.bf16.xpose.msra.mxu0 %v1890_v5 }
 0x827   :  { %1721 = vmatprep.subr.bf16.mxu0 %v1892_v7 }
 0x82e   :  { %1722 = vmatpush3.bf16.xpose.msra.mxu0 %v1894_v9 }
 0x82f   :  { %1723 = vmatprep.subr.bf16.mxu0 %v1896_v11 }
 0x836   :  { %1724 = vmatpush3.bf16.xpose.msra.mxu0 %v1898_v13 }
 0x837   :  { %1725 = vmatprep.subr.bf16.mxu0 %v1900_v46 }
 0x83e   :  { %1726 = vmatpush3.bf16.xpose.msra.mxu0 %v1902_v22 }
 0x83f   :  { %1727 = vmatprep.subr.bf16.mxu0 %v1904_v24 }
 0x846   :  { %1728 = vmatpush3.bf16.xpose.msra.mxu0 %v1906_v26 }
 0x8e0   :  { %v1014_v14 = vpop.f32.mrb[16].mxu0 }
 0x8e1   :  { %v1015_v16 = vadd.f32 %v1014_v14, %v2121_v0  ;;  %v1829_v17 = vpop.f32.mrb[17].mxu0  ;;  %v1901_v0 = vld [vmem:[%s2454_s11 + $0x30] sm:$0xff]  }
 0x8e2   :  { %v1017_v18 = vpop.f32.mrb[18].mxu0  ;;  %1708 = vmatpush3.bf16.xpose.msra.mxu1 %v1901_v0 }
 0x8e3   :  { %1020 = vst [vmem:[%s2457_s14] sm:$0xff] %v1015_v16  ;;  %v1830_v19 = vpop.f32.mrb[19].mxu0  ;;  %v1022_v20 = vmul.f32 %v1015_v16, %v1015_v16  ;;  %1709 = vmatprep.subr.bf16.mxu1 %v1903_v23 }
 0x8e5   :  { %1023 = vadd.xlane.f32.xlu0 %v1022_v20 }
 0x8ea   :  { %1710 = vmatpush3.bf16.xpose.msra.mxu1 %v1905_v25 }
 0x8eb   :  { %1489 = vmatprep.subr.bf16.mxu1 %v1909_v27 }
 0x972   :  { %v1024_v28 = vpop.xlane.xlu0 %1023 }
 0x973   :  { %v1025_v29 = vmul.f32 0.0078125, %v1024_v28 }
 0x975   :  { %v1026_v30 = vadd.f32 1e-05, %v1025_v29 }
 0x977   :  { %1949 = vrsqrt.f32 %v1026_v30 }
 0x981   :  { %v1950_v31 = vpop.eup %1949 }
 0x982   :  { %v1028_v33 = vmul.f32 %v1950_v31, %v1015_v16 }
 0x984   :  { %v1035_v35 = vmul.f32 %v1587_v32, %v1028_v33 }
 0x986   :  { %v1036_v36 = vpack.c.bf16 %v1035_v35, %v1035_v35 }
 0x988   :  { %1711 = vmatprep.mubr.bf16.mxu1 %v1036_v36  ;;  %1729 = vmatprep.mubr.bf16.mxu0 %v1036_v36 }
 0x989   :  { %1712 = vmatmul.mubr.bf16.vlgmr.msra.gmra.mrb[28].mxu1 %v1036_v36  ;;  %1730 = vmatmul.mubr.bf16.vlgmr.msra.gmra.mrb[20].mxu0 %v1036_v36 }
 0x98a   :  { %1490 = vmatpush1.bf16.xpose.msra.mxu1 %v1907_v37 }
 0x98b   :  { %1491 = vmatprep.subr.bf16.mxu1 %v1912_v38 }
 0x992   :  { %1492 = vmatpush1.bf16.xpose.msra.mxu1 %v1910_v39 }
 0x993   :  { %1493 = vmatprep.subr.bf16.mxu1 %v1915_v40 }
 0x99a   :  { %1494 = vmatpush1.bf16.xpose.msra.mxu1 %v1913_v41 }
 0x99b   :  { %1495 = vmatprep.subr.bf16.mxu1 %v1918_v42 }
 0x9a2   :  { %1496 = vmatpush1.bf16.xpose.msra.mxu1 %v1916_v43 }
 0x9a3   :  { %1497 = vmatprep.subr.bf16.mxu1 %v1921_v44 }
 0x9aa   :  { %1498 = vmatpush1.bf16.xpose.msra.mxu1 %v1919_v45 }
 0x9ab   :  { %1499 = vmatprep.subr.bf16.mxu1 %v1924_v15 }
 0x9b2   :  { %1500 = vmatpush1.bf16.xpose.msra.mxu1 %v1922_v47 }
 0x9b3   :  { %1501 = vmatprep.subr.bf16.mxu1 %v1927_v48 }
 0x9ba   :  { %1502 = vmatpush1.bf16.xpose.msra.mxu1 %v1925_v49 }
 0x9bb   :  { %1503 = vmatprep.subr.bf16.mxu1 %v1930_v50 }
 0x9c2   :  { %1504 = vmatpush1.bf16.xpose.msra.mxu1 %v1928_v51 }
 0xa5c   :  { %v1343_v52 = vpop.f32.mrb[28].mxu1  ;;  %v1384_v53 = vpop.f32.mrb[20].mxu0 }
 0xa5d   :  { %v1620_v54 = vmul.f32 -1.442695, %v1343_v52  ;;  %v1345_v55 = vpop.f32.mrb[29].mxu1  ;;  %v1386_v56 = vpop.f32.mrb[21].mxu0 }
 0xa5e   :  { %v1621_v34 = vmul.f32 -1.442695, %v1345_v55  ;;  %v1347_v57 = vpop.f32.mrb[30].mxu1  ;;  %v1388_v58 = vpop.f32.mrb[22].mxu0 }
 0xa5f   :  { %1951 = vpow2.f32 %v1620_v54  ;;  %v1348_v59 = vpop.f32.mrb[31].mxu1  ;;  %v1389_v60 = vpop.f32.mrb[23].mxu0 }
 0xa60   :  { %1953 = vpow2.f32 %v1621_v34 }
 0xa69   :  { %v1952_v61 = vpop.eup %1951 }
 0xa6a   :  { %v1954_v62 = vpop.eup %1953  ;;  %v1397_v63 = vadd.f32 1.0, %v1952_v61 }
 0xa6b   :  { %v1398_v1 = vadd.f32 1.0, %v1954_v62 }
 0xa6c   :  { %1955 = vrcp.f32 %v1397_v63 }
 0xa6d   :  { %1957 = vrcp.f32 %v1398_v1 }
 0xa76   :  { %v1956_v2 = vpop.eup %1955 }
 0xa77   :  { %v1958_v3 = vpop.eup %1957  ;;  %v1403_v4 = vmul.f32 %v1956_v2, %v1343_v52 }
 0xa78   :  { %v1404_v5 = vmul.f32 %v1958_v3, %v1345_v55 }
 0xa79   :  { %v1405_v6 = vmul.f32 %v1403_v4, %v1384_v53 }
 0xa7a   :  { %v1406_v7 = vmul.f32 %v1404_v5, %v1386_v56 }
 0xa7b   :  { %v1407_v9 = vpack.c.bf16 %v1405_v6, %v1405_v6 }
 0xa7c   :  { %v1408_v8 = vpack.c.bf16 %v1406_v7, %v1406_v7 }
 0xa7e   :  { %1521 = vmatprep.mubr.bf16.mxu1 %v1408_v8 }
 0xa7f   :  { %1522 = vmatmul.mubr.bf16.vlgmr.msra.gmra.mrb[32].mxu1 %v1407_v9 }
 0xb52   :  { %v1523_v10 = vpop.f32.mrb[32].mxu1 }
 0xb53   :  { %v1529_v11 = vpack.c.bf16 %v1523_v10, %v1523_v10  ;;  %v1525_v12 = vpop.f32.mrb[33].mxu1 }
 0xb54   :  { %v1526_v13 = vpop.f32.mrb[34].mxu1 }
 0xb55   :  { %1530 = vst [vmem:[%s2456_s13] sm:$0xf] %v1529_v11  ;;  %v1527_v14 = vpop.f32.mrb[35].mxu1 }
 0xb56   :  { %1539 = vsyncpa [#allocation3], 1 }
 0xb57   :  { %1540 = vsyncpa [#allocation5], 1 }

// kernel: ernie45_moe_model.4
= control target key start
LH: loop header
LB: loop body
LE: loop exit
PB: predicated region body
PF: predicated region fallthrough
CT: control target
= control target key end

     0   :  { %s4669_s0 = inlined_call_operand.vmem [shape: bf16[8,128], index: 0, kind: input, shape index: {}]   ;;  %s4670_s1 = inlined_call_operand.vmem [shape: f32[8,128], index: 1, kind: input, shape index: {}, may-alias: {1,19}]   ;;  %s4671_s2 = inlined_call_operand.hbm [shape: f32[1,128], index: 2, kind: input, shape index: {}]   ;;  %s4672_s3 = inlined_call_operand.vmem [shape: bf16[256,128], index: 3, kind: input, shape index: {}]   ;;  %s4673_s4 = inlined_call_operand.vmem [shape: bf16[128,128], index: 4, kind: input, shape index: {}]   ;;  %s4674_s5 = inlined_call_operand.vmem [shape: bf16[64,64], index: 5, kind: input, shape index: {}]   ;;  %s4675_s6 = inlined_call_operand.vmem [shape: f32[8,128], index: 6, kind: input, shape index: {}]   ;;  %s4676_s7 = inlined_call_operand.vmem [shape: f32[8,128], index: 7, kind: input, shape index: {}]   ;;  %s4677_s8 = inlined_call_operand.vmem [shape: f32[8,64], index: 8, kind: input, shape index: {}]   ;;  %s4678_s9 = inlined_call_operand.vmem [shape: f32[8,64], index: 9, kind: input, shape index: {}]   ;;  %s4679_s10 = inlined_call_operand.hbm [shape: bf16[128,128], index: 10, kind: input, shape index: {}]   ;;  %s4680_s11 = inlined_call_operand.hbm [shape: f32[1,128], index: 11, kind: input, shape index: {}]   ;;  %s4681_s12 = inlined_call_operand.vmem [shape: f32[4,128], index: 12, kind: input, shape index: {}]   ;;  %s4682_s13 = inlined_call_operand.hbm [shape: f32[1,4], index: 13, kind: input, shape index: {}]   ;;  %s4683_s14 = inlined_call_operand.hbm [shape: bf16[256,128], index: 14, kind: input, shape index: {}]   ;;  %s4684_s15 = inlined_call_operand.hbm [shape: bf16[128,128], index: 15, kind: input, shape index: {}]   ;;  %s4685_s16 = inlined_call_operand.vmem [shape: bf16[4,256,128], index: 16, kind: input, shape index: {}]   ;;  %s4686_s17 = inlined_call_operand.vmem [shape: bf16[4,128,128], index: 17, kind: input, shape index: {}]   ;;  %s4687_s18 = inlined_call_operand.vmem [shape: bf16[8,128], index: 18, kind: output, shape index: {0}]   ;;  %s4688_s19 = inlined_call_operand.vmem [shape: f32[8,128], index: 19, kind: output, shape index: {1}, may-alias: {1,19}]  }
   0x1   :  { %4691 = sst [smem:[#allocation16_spill]] %s4669_s0 }
   0x2   :  { %4692 = sst [smem:[#allocation17_spill]] %s4670_s1 }
   0x3   :  { %4693 = sst [smem:[#allocation18_spill]] %s4671_s2 }
   0x4   :  { %4694 = sst [smem:[#allocation19_spill]] %s4672_s3 }
   0x5   :  { %4695 = sst [smem:[#allocation20_spill]] %s4687_s18 }
   0x6   :  { %25 = vsyncpa [#allocation3], 0 }
   0x7   :  { %26 = vsyncpa [#allocation5], 0 }
   0x8   :  { %27 = vsyncpa [#allocation8], 0 }
   0x9   :  { %28 = vsyncpa [#allocation11], 0  ;;  %s3836_s0 = smov [#allocation4]   ;;  %s3696_s1 = scalar_lea.hbm %s4679_s10, 1024 }
   0xa   :  { %s62_s30 = sshll.u32 %s3836_s0, 4  ;;  %p3697_p0 = scmp.ne.s32.totalorder %s4679_s10, %s3696_s1  ;;  %s63_s30 = int_to_ptr.vmem [resolvable:$true] %s62_s30 }
   0xb   :  { %p3700_p1 = scmp.lt.u32.totalorder %s3696_s1, %s4679_s10 }
   0xd   :  { %p3702_p2 = pnand %p3700_p1, %p3697_p0 }
   0xf   :  { %3705 = shalt.err (!%p3702_p2)
}
  0x10   :  { %s3706_s25 = scalar_lea.vmem %s63_s30, 1024  ;;  %p3711_p4 = scmp.lt.s32.totalorder %s63_s30, %s63_s30 }
  0x11   :  { %p3707_p3 = scmp.ne.s32.totalorder %s63_s30, %s3706_s25  ;;  %p3712_p5 = scmp.lt.s32.totalorder %s3706_s25, %s3706_s25 }
  0x13   :  { %p3713_p6 = por %p3712_p5, %p3711_p4 }
  0x15   :  { %p3714_p7 = pnand %p3713_p6, %p3707_p3 }
  0x17   :  { %3717 = shalt.err (!%p3714_p7)
}
  0x18   :  { %s3837_s3 = smov 64   ;;  %s3838_s26 = smov 4  }
  0x19   :  { %68 = dma.hbm_to_vmem [thread:$0]  %s4679_s10, 1024, %s63_s30, [#allocation5], %s3837_s3, %s3837_s3, %s3838_s26  }
  0x1a   :  { %s3839_s29 = smov [#allocation7]   ;;  %s3840_s20 = smov [#allocation2]  }
  0x1b   :  { %s87_s0 = sshll.u32 %s3839_s29, 4  ;;  %s39_s21 = sshll.u32 %s3840_s20, 4  ;;  %s88_s0 = int_to_ptr.vmem [resolvable:$true] %s87_s0  ;;  %s40_s21 = int_to_ptr.vmem [resolvable:$true] %s39_s21 }
  0x1c   :  { %s3718_s2 = scalar_lea.hbm %s4682_s13, 16 }
  0x1d   :  { %p3719_p8 = scmp.ne.s32.totalorder %s4682_s13, %s3718_s2  ;;  %p3722_p9 = scmp.lt.u32.totalorder %s3718_s2, %s4682_s13 }
  0x1f   :  { %p3724_p10 = pnand %p3722_p9, %p3719_p8 }
  0x21   :  { %3727 = shalt.err (!%p3724_p10)
}
  0x22   :  { %s3728_s10 = scalar_lea.vmem %s88_s0, 16  ;;  %s3732_s30 = scalar_lea.vmem %s88_s0, 32 }
  0x23   :  { %p3729_p11 = scmp.ne.s32.totalorder %s88_s0, %s3728_s10  ;;  %p3733_p12 = scmp.lt.s32.totalorder %s88_s0, %s88_s0 }
  0x24   :  { %p3734_p13 = scmp.lt.s32.totalorder %s3732_s30, %s3728_s10 }
  0x26   :  { %p3735_p0 = por %p3734_p13, %p3733_p12 }
  0x28   :  { %p3736_p1 = pnand %p3735_p0, %p3729_p11 }
  0x2a   :  { %3739 = shalt.err (!%p3736_p1)
}
  0x2b   :  { %90 = dma.hbm_to_vmem [thread:$0]  %s4682_s13, 16, %s88_s0, [#allocation8]  }
  0x2c   :  { %s4696_s1 = sld [smem:[#allocation18_spill]] }
  0x32   :  { %s3740_s18 = scalar_lea.hbm %s4696_s1, 16 }
  0x33   :  { %p3741_p2 = scmp.ne.s32.totalorder %s4696_s1, %s3740_s18  ;;  %p3744_p3 = scmp.lt.u32.totalorder %s3740_s18, %s4696_s1 }
  0x35   :  { %p3746_p4 = pnand %p3744_p3, %p3741_p2 }
  0x37   :  { %3749 = shalt.err (!%p3746_p4)
}
  0x38   :  { %s3750_s25 = scalar_lea.vmem %s40_s21, 16  ;;  %s3754_s10 = scalar_lea.vmem %s40_s21, 32 }
  0x39   :  { %p3751_p5 = scmp.ne.s32.totalorder %s40_s21, %s3750_s25  ;;  %p3755_p6 = scmp.lt.s32.totalorder %s40_s21, %s40_s21 }
  0x3a   :  { %p3756_p7 = scmp.lt.s32.totalorder %s3754_s10, %s3750_s25 }
  0x3c   :  { %p3757_p8 = por %p3756_p7, %p3755_p6 }
  0x3e   :  { %p3758_p9 = pnand %p3757_p8, %p3751_p5 }
  0x40   :  { %3761 = shalt.err (!%p3758_p9)
}
  0x41   :  { %42 = dma.hbm_to_vmem [thread:$0]  %s4696_s1, 16, %s40_s21, [#allocation3]  }
  0x42   :  { %s3841_s30 = smov [#allocation6]   ;;  %s3842_s28 = smov [#allocation9]  }
  0x43   :  { %s75_s27 = sshll.u32 %s3841_s30, 4  ;;  %s96_s29 = sshll.u32 %s3842_s28, 4  ;;  %s76_s27 = int_to_ptr.vmem [resolvable:$true] %s75_s27  ;;  %s97_s29 = int_to_ptr.vmem [resolvable:$true] %s96_s29 }
  0x44   :  { %s3762_s22 = scalar_lea.hbm %s4680_s11, 16 }
  0x45   :  { %p3763_p10 = scmp.ne.s32.totalorder %s4680_s11, %s3762_s22  ;;  %p3766_p11 = scmp.lt.u32.totalorder %s3762_s22, %s4680_s11 }
  0x47   :  { %p3768_p12 = pnand %p3766_p11, %p3763_p10 }
  0x49   :  { %3771 = shalt.err (!%p3768_p12)
}
  0x4a   :  { %s3772_s21 = scalar_lea.vmem %s76_s27, 16  ;;  %s3776_s1 = scalar_lea.vmem %s76_s27, 32 }
  0x4b   :  { %p3773_p13 = scmp.ne.s32.totalorder %s76_s27, %s3772_s21  ;;  %p3777_p0 = scmp.lt.s32.totalorder %s76_s27, %s76_s27 }
  0x4c   :  { %p3778_p1 = scmp.lt.s32.totalorder %s3776_s1, %s3772_s21 }
  0x4e   :  { %p3779_p2 = por %p3778_p1, %p3777_p0 }
  0x50   :  { %p3780_p3 = pnand %p3779_p2, %p3773_p13 }
  0x52   :  { %3783 = shalt.err (!%p3780_p3)
}
  0x53   :  { %78 = dma.hbm_to_vmem [thread:$0]  %s4680_s11, 16, %s76_s27, [#allocation5]  }
  0x54   :  { %s3784_s28 = scalar_lea.hbm %s4683_s14, 2048 }
  0x55   :  { %p3785_p4 = scmp.ne.s32.totalorder %s4683_s14, %s3784_s28  ;;  %p3788_p5 = scmp.lt.u32.totalorder %s3784_s28, %s4683_s14 }
  0x57   :  { %p3790_p6 = pnand %p3788_p5, %p3785_p4 }
  0x59   :  { %3793 = shalt.err (!%p3790_p6)
}
  0x5a   :  { %s3794_s23 = scalar_lea.vmem %s97_s29, 2048  ;;  %p3799_p8 = scmp.lt.s32.totalorder %s97_s29, %s97_s29 }
  0x5b   :  { %p3795_p7 = scmp.ne.s32.totalorder %s97_s29, %s3794_s23  ;;  %p3800_p9 = scmp.lt.s32.totalorder %s3794_s23, %s3794_s23 }
  0x5d   :  { %p3801_p10 = por %p3800_p9, %p3799_p8 }
  0x5f   :  { %p3802_p11 = pnand %p3801_p10, %p3795_p7 }
  0x61   :  { %3805 = shalt.err (!%p3802_p11)
}
  0x62   :  { %102 = dma.hbm_to_vmem [thread:$0]  %s4683_s14, 2048, %s97_s29, [#allocation8], %s3837_s3, %s3837_s3, %s3838_s26  }
  0x63   :  { %s3843_s24 = smov [#allocation10]   ;;  %s3806_s10 = scalar_lea.hbm %s4684_s15, 1024 }
  0x64   :  { %s108_s25 = sshll.u32 %s3843_s24, 4  ;;  %p3807_p12 = scmp.ne.s32.totalorder %s4684_s15, %s3806_s10  ;;  %s109_s25 = int_to_ptr.vmem [resolvable:$true] %s108_s25 }
  0x65   :  { %p3810_p13 = scmp.lt.u32.totalorder %s3806_s10, %s4684_s15 }
  0x67   :  { %p3812_p0 = pnand %p3810_p13, %p3807_p12 }
  0x69   :  { %3815 = shalt.err (!%p3812_p0)
}
  0x6a   :  { %s3816_s20 = scalar_lea.vmem %s109_s25, 1024  ;;  %p3821_p2 = scmp.lt.s32.totalorder %s109_s25, %s109_s25 }
  0x6b   :  { %p3817_p1 = scmp.ne.s32.totalorder %s109_s25, %s3816_s20  ;;  %p3822_p3 = scmp.lt.s32.totalorder %s3816_s20, %s3816_s20 }
  0x6d   :  { %p3823_p4 = por %p3822_p3, %p3821_p2 }
  0x6f   :  { %p3824_p5 = pnand %p3823_p4, %p3817_p1 }
  0x71   :  { %3827 = shalt.err (!%p3824_p5)
}
  0x72   :  { %114 = dma.hbm_to_vmem [thread:$0]  %s4684_s15, 1024, %s109_s25, [#allocation11], %s3837_s3, %s3837_s3, %s3838_s26  }
  0x73   :  { %3828 = dma.done.wait [#allocation3], 16  }
  0x74   :  { %3829 = vsyncadd [#allocation3], 4294967280 }
  0x75   :  { %3830 = dma.done.wait [#allocation5], 1040  }
  0x76   :  { %3831 = vsyncadd [#allocation5], 4294966256 }
  0x77   :  { %3832 = dma.done.wait [#allocation8], 2064  }
  0x78   :  { %3833 = vsyncadd [#allocation8], 4294965232 }
  0x79   :  { %3834 = dma.done.wait [#allocation11], 1024  }
  0x7a   :  { %3835 = vsyncadd [#allocation11], 4294966272  ;;  %s4697_s2 = sld [smem:[#allocation16_spill]]  ;;  %s4698_s27 = sld [smem:[#allocation17_spill]]  ;;  %v3510_v18 = vld [vmem:[%s4673_s4] sm:$0xff]   ;;  %v3844_v19 = vmov 0.0  }
  0x7b   :  { %s4699_s15 = sld [smem:[#allocation19_spill]]  ;;  %3259 = vmatprep.subr.bf16.mxu1 %v3844_v19  ;;  %v3511_v22 = vld [vmem:[%s4673_s4 + $0x8] sm:$0xff]   ;;  %v3512_v24 = vld [vmem:[%s4673_s4 + $0x10] sm:$0xff]   ;;  %v3513_v25 = vld [vmem:[%s4673_s4 + $0x18] sm:$0xff]   ;;  %vm487_vm0 = vcmask 523264   ;;  %vm3845_vm1 = vmmov 0  }
  0x7c   :  { %3260 = vmatpush3.bf16.xpose.msra.mxu1 %v3510_v18  ;;  %v3514_v26 = vld [vmem:[%s4673_s4 + $0x20] sm:$0xff]   ;;  %v3516_v27 = vld [vmem:[%s4673_s4 + $0x28] sm:$0xff]   ;;  %v3518_v28 = vld [vmem:[%s4673_s4 + $0x30] sm:$0xff]   ;;  %3275 = vmatprep.mubr.msk.bf16.mxu1 %vm3845_vm1, %v3844_v19  ;;  %vm551_vm2 = vcmask 261120   ;;  %vm600_vm4 = vcmask 64512   ;;  %vm619_vm5 = vcmask 1043456  }
  0x7d   :  { %3261 = vmatprep.subr.bf16.mxu1 %v3844_v19  ;;  %v3520_v29 = vld [vmem:[%s4673_s4 + $0x38] sm:$0xff]   ;;  %v2740_v34 = vld [vmem:[#allocation2] ss:$0 sm:$0xff]  ;;  %v3517_v40 = vld [vmem:[%s4674_s5 + $0x8] sm:$0xff]   ;;  %vm995_vm6 = vcmask 785408   ;;  %vm1368_vm7 = vcmask 31744  }
  0x7e   :  { %v3515_v36 = vld [vmem:[%s4674_s5] sm:$0xff]   ;;  %v495_v41 = vsel %vm487_vm0, %v3517_v40, 0  ;;  %v3519_v42 = vld [vmem:[%s4674_s5 + $0x10] sm:$0xff]   ;;  %v3521_v44 = vld [vmem:[%s4674_s5 + $0x18] sm:$0xff]   ;;  %s3852_s23 = smov 127   ;;  %s3854_s11 = smov 125  }
  0x7f   :  { %v492_v39 = vsel %vm487_vm0, %v3515_v36, 0  ;;  %v498_v43 = vsel %vm487_vm0, %v3519_v42, 0  ;;  %v501_v45 = vsel %vm487_vm0, %v3521_v44, 0  ;;  %v352_v52 = vld [vmem:[%s4675_s6] sm:$0xff]  ;;  %s3846_s6 = smov 96   ;;  %s3856_s24 = smov 2  }
  0x80   :  { %v138_v0 = vld [vmem:[%s4697_s2] sm:$0xf]  ;;  %s3857_s21 = smov 3  }
  0x81   :  { %v140_v1 = vld [vmem:[%s4698_s27] sm:$0xff]  ;;  %v139_v2 = vunpack.c.l.bf16 %v138_v0  ;;  %v3496_v6 = vld [vmem:[%s4699_s15 + $0x48] sm:$0xff]   ;;  %v3498_v9 = vld [vmem:[%s4699_s15 + $0x50] sm:$0xff]   ;;  %s3855_s27 = smov 1  }
  0x82   :  { %v3494_v3 = vld [vmem:[%s4699_s15 + $0x40] sm:$0xff]   ;;  %v3497_v8 = vld [vmem:[%s4699_s15 + $0x8] sm:$0xff]   ;;  %v3499_v10 = vld [vmem:[%s4699_s15 + $0x10] sm:$0xff]  }
  0x83   :  { %v3495_v4 = vld [vmem:[%s4699_s15] sm:$0xff]   ;;  %v4051_v5 = vadd.f32 %v140_v1, %v139_v2  ;;  %3065 = vmatprep.subr.bf16.mxu0 %v3494_v3  ;;  %v3500_v11 = vld [vmem:[%s4699_s15 + $0x58] sm:$0xff]   ;;  %v3504_v15 = vld [vmem:[%s4699_s15 + $0x68] sm:$0xff]  }
  0x84   :  { %3066 = vmatpush3.bf16.xpose.msra.mxu0 %v3495_v4  ;;  %v3501_v12 = vld [vmem:[%s4699_s15 + $0x18] sm:$0xff]   ;;  %v3502_v13 = vld [vmem:[%s4699_s15 + $0x60] sm:$0xff]   ;;  %v3505_v16 = vld [vmem:[%s4699_s15 + $0x28] sm:$0xff]   ;;  %3262 = vmatpush3.bf16.xpose.msra.mxu1 %v3511_v22 }
  0x85   :  { %v143_v7 = vmul.f32 %v4051_v5, %v4051_v5  ;;  %3067 = vmatprep.subr.bf16.mxu0 %v3496_v6  ;;  %v3503_v14 = vld [vmem:[%s4699_s15 + $0x20] sm:$0xff]   ;;  %v3506_v17 = vld [vmem:[%s4699_s15 + $0x70] sm:$0xff]   ;;  %v3508_v21 = vld [vmem:[%s4699_s15 + $0x78] sm:$0xff]   ;;  %3263 = vmatprep.subr.bf16.mxu1 %v3844_v19 }
  0x86   :  { %v3507_v20 = vld [vmem:[%s4699_s15 + $0x30] sm:$0xff]   ;;  %v3509_v23 = vld [vmem:[%s4699_s15 + $0x38] sm:$0xff]   ;;  %v353_v53 = vld [vmem:[%s4676_s7] sm:$0xff]  ;;  %s3847_s7 = smov 32  }
  0x87   :  { %144 = vadd.xlane.f32.xlu0 %v143_v7  ;;  %v354_v54 = vld [vmem:[%s4677_s8] sm:$0xff] }
  0x88   :  { %v355_v55 = vld [vmem:[%s4678_s9] sm:$0xff] }
  0x8c   :  { %3068 = vmatpush3.bf16.xpose.msra.mxu0 %v3497_v8  ;;  %3264 = vmatpush3.bf16.xpose.msra.mxu1 %v3512_v24 }
  0x8d   :  { %3069 = vmatprep.subr.bf16.mxu0 %v3498_v9  ;;  %3265 = vmatprep.subr.bf16.mxu1 %v3844_v19 }
  0x94   :  { %3070 = vmatpush3.bf16.xpose.msra.mxu0 %v3499_v10  ;;  %3266 = vmatpush3.bf16.xpose.msra.mxu1 %v3513_v25  ;;  %v546_v10 = vlaneseq }
  0x95   :  { %3071 = vmatprep.subr.bf16.mxu0 %v3500_v11  ;;  %3267 = vmatprep.subr.bf16.mxu1 %v3844_v19 }
  0x96   :  { %v4181_v11 = vshrl.u32 %v546_v10, 7 }
  0x9c   :  { %3072 = vmatpush3.bf16.xpose.msra.mxu0 %v3501_v12  ;;  %3268 = vmatpush3.bf16.xpose.msra.mxu1 %v3514_v26  ;;  %v4183_v12 = vand.u32 127, %v546_v10 }
  0x9d   :  { %3073 = vmatprep.subr.bf16.mxu0 %v3502_v13  ;;  %3269 = vmatprep.subr.bf16.mxu1 %v3844_v19 }
  0x9e   :  { %vm550_vm3 = vcmp.le.s32.totalorder %v4183_v12, %v4181_v11 }
  0xa4   :  { %3074 = vmatpush3.bf16.xpose.msra.mxu0 %v3503_v14  ;;  %3270 = vmatpush3.bf16.xpose.msra.mxu1 %v3516_v27 }
  0xa5   :  { %3075 = vmatprep.subr.bf16.mxu0 %v3504_v15  ;;  %3271 = vmatprep.subr.bf16.mxu1 %v3844_v19 }
  0xac   :  { %3076 = vmatpush3.bf16.xpose.msra.mxu0 %v3505_v16  ;;  %3272 = vmatpush3.bf16.xpose.msra.mxu1 %v3518_v28 }
  0xad   :  { %3077 = vmatprep.subr.bf16.mxu0 %v3506_v17  ;;  %3273 = vmatprep.subr.bf16.mxu1 %v3844_v19 }
  0xb4   :  { %3078 = vmatpush3.bf16.xpose.msra.mxu0 %v3507_v20  ;;  %3274 = vmatpush3.bf16.xpose.msra.mxu1 %v3520_v29 }
  0xb5   :  { %3079 = vmatprep.subr.bf16.mxu0 %v3508_v21  ;;  %3309 = vmatprep.subr.bf16.mxu1 %v3844_v19 }
  0xbc   :  { %3080 = vmatpush3.bf16.xpose.msra.mxu0 %v3509_v23 }
  0xbd   :  { %3279 = vmatprep.subr.bf16.mxu0 %v3844_v19 }
 0x114   :  { %v145_v30 = vpop.xlane.xlu0 %144 }
 0x115   :  { %v147_v31 = vmul.f32 0.0078125, %v145_v30 }
 0x117   :  { %v148_v32 = vadd.f32 1e-05, %v147_v31 }
 0x119   :  { %3650 = vrsqrt.f32 %v148_v32 }
 0x123   :  { %v3651_v33 = vpop.eup %3650 }
 0x124   :  { %v150_v35 = vmul.f32 %v3651_v33, %v4051_v5 }
 0x126   :  { %v157_v37 = vmul.f32 %v2740_v34, %v150_v35 }
 0x128   :  { %v158_v38 = vpack.c.bf16 %v157_v37, %v157_v37 }
 0x12a   :  { %3081 = vmatprep.mubr.bf16.mxu0 %v158_v38 }
 0x12b   :  { %3082 = vmatmul.mubr.bf16.vlgmr.msra.gmra.mrb[0].mxu0 %v158_v38 }
 0x12c   :  { %3280 = vmatpush3.bf16.xpose.msra.mxu0 %v492_v39  ;;  %3287 = vmatprep.mubr.msk.bf16.mxu0 %vm3845_vm1, %v3844_v19 }
 0x12d   :  { %3281 = vmatprep.subr.bf16.mxu0 %v3844_v19 }
 0x134   :  { %3282 = vmatpush3.bf16.xpose.msra.mxu0 %v495_v41 }
 0x135   :  { %3283 = vmatprep.subr.bf16.mxu0 %v3844_v19 }
 0x13c   :  { %3284 = vmatpush3.bf16.xpose.msra.mxu0 %v498_v43 }
 0x13d   :  { %3285 = vmatprep.subr.bf16.mxu0 %v3844_v19 }
 0x144   :  { %3286 = vmatpush3.bf16.xpose.msra.mxu0 %v501_v45 }
 0x145   :  { %3291 = vmatprep.subr.bf16.mxu0 %v3844_v19 }
 0x1fe   :  { %v321_v46 = vpop.f32.mrb[0].mxu0 }
 0x1ff   :  { %v373_v47 = vpack.c.bf16 %v321_v46, %v321_v46  ;;  %v323_v48 = vpop.f32.mrb[1].mxu0  ;;  %v372_v57 = vmul.f32 %v352_v52, %v321_v46 }
 0x200   :  { %v4156_v49 = vpack.c.bf16 %v323_v48, %v323_v48  ;;  %v325_v50 = vpop.f32.mrb[2].mxu0  ;;  %v465_v61 = vmul.f32 %v354_v54, %v323_v48 }
 0x201   :  { %v326_v51 = vpop.f32.mrb[3].mxu0  ;;  %3276 = vmatmul.mubr.bf16.vlgmr.msra.gmra.mrb[0].mxu1 %v373_v47 }
 0x202   :  { %3288 = vmatmul.mubr.msk.bf16.vlgmr.msra.gmra.mrb[4].mxu0 %vm487_vm0, %v4156_v49  ;;  %3311 = vmatprep.mubr.msk.bf16.mxu1 %vm3845_vm1, %v3844_v19 }
 0x203   :  { %3293 = vmatprep.mubr.msk.bf16.mxu0 %vm3845_vm1, %v3844_v19 }
 0x2d4   :  { %v456_v56 = vpop.f32.mrb[0].mxu1 }
 0x2d5   :  { %v462_v58 = vmul.f32 %v456_v56, %v353_v53  ;;  %v3277_v59 = vpop.f32.mrb[1].mxu1  ;;  %v537_v60 = vpop.f32.mrb[4].mxu0 }
 0x2d6   :  { %v543_v62 = vmul.f32 %v537_v60, %v355_v55  ;;  %v459_v63 = vpop.f32.mrb[2].mxu1  ;;  %v3289_v0 = vpop.f32.mrb[5].mxu0 }
 0x2d7   :  { %v463_v1 = vadd.f32 %v462_v58, %v372_v57  ;;  %v3278_v2 = vpop.f32.mrb[3].mxu1  ;;  %v540_v3 = vpop.f32.mrb[6].mxu0 }
 0x2d8   :  { %v544_v4 = vadd.f32 %v543_v62, %v465_v61  ;;  %v3290_v6 = vpop.f32.mrb[7].mxu0 }
 0x2d9   :  { %v464_v9 = vpack.c.bf16 %v463_v1, %v463_v1 }
 0x2da   :  { %v545_v7 = vpack.c.bf16 %v544_v4, %v544_v4 }
 0x2dc   :  { %v556_v8 = vsel %vm551_vm2, %v545_v7, 0 }
 0x2dd   :  { %3292 = vmatpush3.bf16.xpose.msra.mxu0 %v556_v8 }
 0x2de   :  { %3297 = vmatprep.subr.bf16.mxu0 %v3844_v19 }
 0x2e4   :  { %3294 = vmatmul.mubr.msk.bf16.vlgmr.msra.gmra.mrb[8].mxu0 %vm551_vm2, %v464_v9 }
 0x2e5   :  { %3299 = vmatprep.mubr.msk.bf16.mxu0 %vm3845_vm1, %v3844_v19 }
 0x3b7   :  { %v592_v13 = vpop.f32.mrb[8].mxu0 }
 0x3b8   :  { %v598_v14 = vmul.f32 0.17677669, %v592_v13  ;;  %v3295_v15 = vpop.f32.mrb[9].mxu0 }
 0x3b9   :  { %v595_v16 = vpop.f32.mrb[10].mxu0 }
 0x3ba   :  { %v3296_v17 = vpop.f32.mrb[11].mxu0  ;;  %v599_v18 = vsel %vm550_vm3, %v598_v14, -1e+30 }
 0x3bb   :  { %v601_v20 = vsel %vm600_vm4, %v599_v18, -inf }
 0x3bc   :  { %602 = vmax.xlane.f32.xlu0 %v601_v20 }
 0x3d2   :  { %664 = vrot.lane.b32.xlu0 %v464_v9, %s3846_s6 }
 0x449   :  { %v603_v21 = vpop.xlane.xlu0 %602 }
 0x44a   :  { %v604_v22 = vsub.f32 %v599_v18, %v603_v21 }
 0x44c   :  { %v605_v23 = vmul.f32 1.442695, %v604_v22 }
 0x44d   :  { %v665_v33 = vpop.permute.xlu0 %664 }
 0x44e   :  { %3652 = vpow2.f32 %v605_v23 }
 0x458   :  { %v3653_v24 = vpop.eup %3652 }
 0x459   :  { %v607_v25 = vsel %vm600_vm4, %v3653_v24, 0.0 }
 0x45a   :  { %608 = vadd.xlane.f32.xlu1 %v607_v25 }
 0x46b   :  { %614 = vrot.lane.b32.xlu1 %v4156_v49, %s3837_s3 }
 0x46f   :  { %769 = vrot.lane.b32.xlu1 %v545_v7, %s3846_s6 }
 0x473   :  { %766 = vrot.lane.b32.xlu1 %v464_v9, %s3837_s3 }
 0x477   :  { %879 = vrot.lane.b32.xlu1 %v464_v9, %s3847_s7 }
 0x4e7   :  { %v609_v26 = vpop.xlane.xlu1 %608 }
 0x4e8   :  { %3654 = vrcp.f32 %v609_v26 }
 0x4eb   :  { %v615_v27 = vpop.permute.xlu1 %614 }
 0x4ec   :  { %v621_v28 = vsel %vm619_vm5, %v615_v27, 0 }
 0x4ed   :  { %3298 = vmatpush3.bf16.msra.mxu0 %v621_v28  ;;  %3310 = vmatpush3.bf16.msra.mxu1 %v621_v28 }
 0x4ee   :  { %3303 = vmatprep.subr.bf16.mxu0 %v3844_v19  ;;  %3321 = vmatprep.subr.bf16.mxu1 %v3844_v19 }
 0x4ef   :  { %v770_v32 = vpop.permute.xlu1 %769 }
 0x4f0   :  { %v775_v34 = vsel %vm551_vm2, %v770_v32, 0  ;;  %v3525_v32 = vld [vmem:[#allocation4 + $0x18] sm:$0xff]  }
 0x4f2   :  { %v3655_v29 = vpop.eup %3654 }
 0x4f3   :  { %v611_v30 = vmul.f32 %v3655_v29, %v3653_v24  ;;  %v767_v35 = vpop.permute.xlu1 %766  ;;  %v3522_v29 = vld [vmem:[#allocation4] sm:$0xff]  }
 0x4f5   :  { %v612_v31 = vpack.c.bf16 %v611_v30, %v611_v30  ;;  %v3523_v30 = vld [vmem:[#allocation4 + $0x8] sm:$0xff]  }
 0x4f7   :  { %3300 = vmatmul.mubr.msk.bf16.vlgmr.msra.gmra.mrb[12].mxu0 %vm600_vm4, %v612_v31  ;;  %v880_v36 = vpop.permute.xlu1 %879  ;;  %v3524_v31 = vld [vmem:[#allocation4 + $0x10] sm:$0xff]  }
 0x4f8   :  { %3304 = vmatpush3.bf16.xpose.msra.mxu0 %v556_v8  ;;  %3305 = vmatprep.mubr.msk.bf16.mxu0 %vm3845_vm1, %v3844_v19 }
 0x4f9   :  { %3315 = vmatprep.subr.bf16.mxu0 %v3844_v19 }
 0x4ff   :  { %3306 = vmatmul.mubr.msk.bf16.vlgmr.msra.gmra.mrb[16].mxu0 %vm551_vm2, %v665_v33  ;;  %v3526_v33 = vld [vmem:[#allocation4 + $0x20] sm:$0xff]  }
 0x500   :  { %3316 = vmatpush3.bf16.xpose.msra.mxu0 %v775_v34  ;;  %3317 = vmatprep.mubr.msk.bf16.mxu0 %vm3845_vm1, %v3844_v19 }
 0x501   :  { %3327 = vmatprep.subr.bf16.mxu0 %v3844_v19 }
 0x507   :  { %3318 = vmatmul.mubr.msk.bf16.vlgmr.msra.gmra.mrb[20].mxu0 %vm551_vm2, %v767_v35  ;;  %v3528_v35 = vld [vmem:[#allocation4 + $0x30] sm:$0xff]  }
 0x508   :  { %3328 = vmatpush3.bf16.xpose.msra.mxu0 %v775_v34  ;;  %3329 = vmatprep.mubr.msk.bf16.mxu0 %vm3845_vm1, %v3844_v19  ;;  %v3527_v34 = vld [vmem:[#allocation4 + $0x28] sm:$0xff]  }
 0x509   :  { %3339 = vmatprep.subr.bf16.mxu0 %v3844_v19 }
 0x50f   :  { %3330 = vmatmul.mubr.msk.bf16.vlgmr.msra.gmra.mrb[24].mxu0 %vm551_vm2, %v880_v36  ;;  %v3529_v36 = vld [vmem:[#allocation4 + $0x38] sm:$0xff]  }
 0x510   :  { %3355 = vmatprep.mubr.msk.bf16.mxu0 %vm3845_vm1, %v3844_v19  ;;  %3340 = vmatpush3.bf16.xpose.msra.mxu0 %v3522_v29  ;;  %v3551_v29 = vld [vmem:[%s4685_s16 + $0x10] sm:$0xff]  }
 0x511   :  { %3341 = vmatprep.subr.bf16.mxu0 %v3844_v19 }
 0x518   :  { %3342 = vmatpush3.bf16.xpose.msra.mxu0 %v3523_v30  ;;  %v3552_v30 = vld [vmem:[%s4685_s16 + $0x58] sm:$0xff]  }
 0x519   :  { %3343 = vmatprep.subr.bf16.mxu0 %v3844_v19 }
 0x520   :  { %3344 = vmatpush3.bf16.xpose.msra.mxu0 %v3524_v31  ;;  %v3553_v31 = vld [vmem:[%s4685_s16 + $0x18] sm:$0xff]  }
 0x521   :  { %3345 = vmatprep.subr.bf16.mxu0 %v3844_v19 }
 0x528   :  { %3346 = vmatpush3.bf16.xpose.msra.mxu0 %v3525_v32  ;;  %v3554_v32 = vld [vmem:[%s4685_s16 + $0x60] sm:$0xff]  }
 0x529   :  { %3347 = vmatprep.subr.bf16.mxu0 %v3844_v19 }
 0x530   :  { %3348 = vmatpush3.bf16.xpose.msra.mxu0 %v3526_v33  ;;  %v3555_v33 = vld [vmem:[%s4685_s16 + $0x20] sm:$0xff]  }
 0x531   :  { %3349 = vmatprep.subr.bf16.mxu0 %v3844_v19 }
 0x538   :  { %3350 = vmatpush3.bf16.xpose.msra.mxu0 %v3527_v34  ;;  %v3556_v34 = vld [vmem:[%s4685_s16 + $0x68] sm:$0xff]  }
 0x539   :  { %3351 = vmatprep.subr.bf16.mxu0 %v3844_v19 }
 0x540   :  { %3352 = vmatpush3.bf16.xpose.msra.mxu0 %v3528_v35  ;;  %v3557_v35 = vld [vmem:[%s4685_s16 + $0x28] sm:$0xff]  }
 0x541   :  { %3353 = vmatprep.subr.bf16.mxu0 %v3844_v19 }
 0x548   :  { %3354 = vmatpush3.bf16.xpose.msra.mxu0 %v3529_v36  ;;  %v3558_v36 = vld [vmem:[%s4685_s16 + $0x70] sm:$0xff]  }
 0x549   :  { %3359 = vmatprep.subr.mxu0 %v3844_v19 }
 0x5ca   :  { %v4217_v37 = vpop.f32.mrb[12].mxu0 }
 0x5cb   :  { %v3301_v38 = vpop.f32.mrb[13].mxu0 }
 0x5cc   :  { %v660_v39 = vpop.f32.mrb[14].mxu0 }
 0x5cd   :  { %v3302_v40 = vpop.f32.mrb[15].mxu0 }
 0x5d2   :  { %v703_v41 = vpop.f32.mrb[16].mxu0 }
 0x5d3   :  { %v709_v42 = vmul.f32 0.17677669, %v703_v41  ;;  %v3307_v43 = vpop.f32.mrb[17].mxu0 }
 0x5d4   :  { %v706_v44 = vpop.f32.mrb[18].mxu0 }
 0x5d5   :  { %v3308_v45 = vpop.f32.mrb[19].mxu0  ;;  %v710_v46 = vsel %vm550_vm3, %v709_v42, -1e+30 }
 0x5d6   :  { %v711_v47 = vsel %vm600_vm4, %v710_v46, -inf }
 0x5d7   :  { %712 = vmax.xlane.f32.xlu0 %v711_v47 }
 0x5da   :  { %v811_v48 = vpop.f32.mrb[20].mxu0 }
 0x5db   :  { %v817_v50 = vmul.f32 0.17677669, %v811_v48  ;;  %v3319_v51 = vpop.f32.mrb[21].mxu0 }
 0x5dc   :  { %v814_v52 = vpop.f32.mrb[22].mxu0 }
 0x5dd   :  { %v3320_v53 = vpop.f32.mrb[23].mxu0  ;;  %v818_v54 = vsel %vm550_vm3, %v817_v50, -1e+30 }
 0x5de   :  { %v819_v55 = vsel %vm600_vm4, %v818_v54, -inf }
 0x5df   :  { %820 = vmax.xlane.f32.xlu1 %v819_v55 }
 0x5e2   :  { %v918_v56 = vpop.f32.mrb[24].mxu0 }
 0x5e3   :  { %v924_v57 = vmul.f32 0.17677669, %v918_v56  ;;  %v3331_v58 = vpop.f32.mrb[25].mxu0 }
 0x5e4   :  { %v921_v59 = vpop.f32.mrb[26].mxu0  ;;  %v3530_v58 = vld [vmem:[#allocation9 + $0x40] sm:$0xff]  }
 0x5e5   :  { %v3332_v60 = vpop.f32.mrb[27].mxu0  ;;  %v925_v61 = vsel %vm550_vm3, %v924_v57, -1e+30  ;;  %v3531_v59 = vld [vmem:[#allocation9] sm:$0xff]  }
 0x5e6   :  { %v926_v62 = vsel %vm600_vm4, %v925_v61, -inf  ;;  %v3532_v60 = vld [vmem:[#allocation9 + $0x48] sm:$0xff]  }
 0x5e7   :  { %927 = vmax.xlane.f32.xlu0 %v926_v62  ;;  %v3534_v62 = vld [vmem:[#allocation9 + $0x50] sm:$0xff]  }
 0x664   :  { %v713_v63 = vpop.xlane.xlu0 %712 }
 0x665   :  { %v714_v0 = vsub.f32 %v710_v46, %v713_v63  ;;  %v3536_v63 = vld [vmem:[#allocation9 + $0x58] sm:$0xff]  }
 0x667   :  { %v715_v1 = vmul.f32 1.442695, %v714_v0  ;;  %v3537_v0 = vld [vmem:[#allocation9 + $0x18] sm:$0xff]  }
 0x669   :  { %3656 = vpow2.f32 %v715_v1  ;;  %v3538_v1 = vld [vmem:[#allocation9 + $0x60] sm:$0xff]  }
 0x66c   :  { %v821_v2 = vpop.xlane.xlu1 %820 }
 0x66d   :  { %v822_v3 = vsub.f32 %v818_v54, %v821_v2  ;;  %v3539_v2 = vld [vmem:[#allocation9 + $0x20] sm:$0xff]  }
 0x66f   :  { %v823_v4 = vmul.f32 1.442695, %v822_v3  ;;  %v3540_v3 = vld [vmem:[#allocation9 + $0x68] sm:$0xff]  }
 0x671   :  { %3658 = vpow2.f32 %v823_v4  ;;  %v3541_v4 = vld [vmem:[#allocation9 + $0x28] sm:$0xff]  }
 0x673   :  { %v3657_v6 = vpop.eup %3656 }
 0x674   :  { %v928_v7 = vpop.xlane.xlu0 %927  ;;  %v717_v8 = vsel %vm600_vm4, %v3657_v6, 0.0 }
 0x675   :  { %v929_v9 = vsub.f32 %v925_v61, %v928_v7  ;;  %718 = vadd.xlane.f32.xlu0 %v717_v8  ;;  %v3533_v61 = vld [vmem:[#allocation9 + $0x8] sm:$0xff]  }
 0x677   :  { %v930_v10 = vmul.f32 1.442695, %v929_v9 }
 0x679   :  { %3660 = vpow2.f32 %v930_v10 }
 0x67b   :  { %v3659_v11 = vpop.eup %3658 }
 0x67c   :  { %v825_v12 = vsel %vm600_vm4, %v3659_v11, 0.0 }
 0x67d   :  { %826 = vadd.xlane.f32.xlu0 %v825_v12  ;;  %v3542_v12 = vld [vmem:[#allocation9 + $0x70] sm:$0xff]  }
 0x683   :  { %v3661_v13 = vpop.eup %3660 }
 0x684   :  { %v932_v14 = vsel %vm600_vm4, %v3661_v13, 0.0 }
 0x685   :  { %933 = vadd.xlane.f32.xlu1 %v932_v14  ;;  %v1297_v14 = vld [vmem:[%s4681_s12] sm:$0xf] }
 0x693   :  { %831 = vrot.lane.b32.xlu0 %v4156_v49, %s3847_s7 }
 0x702   :  { %v719_v15 = vpop.xlane.xlu0 %718 }
 0x703   :  { %3662 = vrcp.f32 %v719_v15  ;;  %v3544_v15 = vld [vmem:[#allocation9 + $0x78] sm:$0xff]  }
 0x70a   :  { %v827_v16 = vpop.xlane.xlu0 %826 }
 0x70b   :  { %3664 = vrcp.f32 %v827_v16  ;;  %v3546_v16 = vld [vmem:[%s4685_s16 + $0x40] sm:$0xff]  }
 0x70d   :  { %v3663_v17 = vpop.eup %3662 }
 0x70e   :  { %v721_v18 = vmul.f32 %v3663_v17, %v3657_v6  ;;  %v832_v20 = vpop.permute.xlu0 %831 }
 0x70f   :  { %v837_v22 = vsel %vm619_vm5, %v832_v20, 0 }
 0x710   :  { %v722_v21 = vpack.c.bf16 %v721_v18, %v721_v18 }
 0x712   :  { %v934_v23 = vpop.xlane.xlu1 %933  ;;  %3312 = vmatmul.mubr.msk.bf16.vlgmr.msra.gmra.mrb[4].mxu1 %vm600_vm4, %v722_v21 }
 0x713   :  { %3666 = vrcp.f32 %v934_v23  ;;  %3322 = vmatpush3.bf16.msra.mxu1 %v837_v22  ;;  %3323 = vmatprep.mubr.msk.bf16.mxu1 %vm3845_vm1, %v3844_v19 }
 0x714   :  { %3333 = vmatprep.subr.bf16.mxu1 %v3844_v19 }
 0x715   :  { %v3665_v49 = vpop.eup %3664 }
 0x716   :  { %v829_v24 = vmul.f32 %v3665_v49, %v3659_v11 }
 0x718   :  { %v830_v25 = vpack.c.bf16 %v829_v24, %v829_v24 }
 0x71a   :  { %3324 = vmatmul.mubr.msk.bf16.vlgmr.msra.gmra.mrb[8].mxu1 %vm600_vm4, %v830_v25  ;;  %v3547_v25 = vld [vmem:[%s4685_s16] sm:$0xff]  }
 0x71b   :  { %3334 = vmatpush3.bf16.msra.mxu1 %v837_v22  ;;  %3335 = vmatprep.mubr.msk.bf16.mxu1 %vm3845_vm1, %v3844_v19  ;;  %v2786_v22 = vld [vmem:[#allocation6] ss:$0 sm:$0xff] }
 0x71c   :  { %3122 = vmatprep.subr.bf16.mxu1 %v3530_v58  ;;  %v3578_v58 = vld [vmem:[%s4685_s16 + $0xc0] sm:$0xff]  }
 0x71d   :  { %v3667_v26 = vpop.eup %3666 }
 0x71e   :  { %v936_v27 = vmul.f32 %v3667_v26, %v3661_v13  ;;  %v3543_v13 = vld [vmem:[#allocation9 + $0x30] sm:$0xff]   ;;  %v3548_v26 = vld [vmem:[%s4685_s16 + $0x48] sm:$0xff]  }
 0x720   :  { %v937_v28 = vpack.c.bf16 %v936_v27, %v936_v27  ;;  %v3549_v27 = vld [vmem:[%s4685_s16 + $0x8] sm:$0xff]  }
 0x722   :  { %3336 = vmatmul.mubr.msk.bf16.vlgmr.msra.gmra.mrb[12].mxu1 %vm600_vm4, %v937_v28  ;;  %v3550_v28 = vld [vmem:[%s4685_s16 + $0x50] sm:$0xff]  }
 0x724   :  { %3123 = vmatpush3.bf16.xpose.msra.mxu1 %v3531_v59 }
 0x725   :  { %3124 = vmatprep.subr.bf16.mxu1 %v3532_v60 }
 0x72c   :  { %3125 = vmatpush3.bf16.xpose.msra.mxu1 %v3533_v61 }
 0x72d   :  { %3126 = vmatprep.subr.bf16.mxu1 %v3534_v62 }
 0x7e5   :  { %v760_v38 = vpop.f32.mrb[4].mxu1 }
 0x7e6   :  { %982 = vrot.lane.b32.xlu1 %v760_v38, %s3847_s7  ;;  %v3313_v39 = vpop.f32.mrb[5].mxu1  ;;  %v3559_v38 = vld [vmem:[%s4685_s16 + $0x30] sm:$0xff]  }
 0x7e7   :  { %v763_v40 = vpop.f32.mrb[6].mxu1  ;;  %v3560_v39 = vld [vmem:[%s4685_s16 + $0x78] sm:$0xff]  }
 0x7e8   :  { %v3314_v41 = vpop.f32.mrb[7].mxu1  ;;  %v3561_v40 = vld [vmem:[%s4685_s16 + $0x38] sm:$0xff]  }
 0x7e9   :  { %v3562_v41 = vld [vmem:[#allocation10] sm:$0xff]  }
 0x7ed   :  { %v873_v42 = vpop.f32.mrb[8].mxu1 }
 0x7ee   :  { %986 = vrot.lane.b32.xlu1 %v873_v42, %s3837_s3  ;;  %v3325_v43 = vpop.f32.mrb[9].mxu1  ;;  %v3563_v42 = vld [vmem:[#allocation10 + $0x8] sm:$0xff]  }
 0x7ef   :  { %v876_v44 = vpop.f32.mrb[10].mxu1  ;;  %v3564_v43 = vld [vmem:[#allocation10 + $0x10] sm:$0xff]  }
 0x7f0   :  { %v3326_v45 = vpop.f32.mrb[11].mxu1  ;;  %v3565_v44 = vld [vmem:[#allocation10 + $0x18] sm:$0xff]  }
 0x7f1   :  { %v3566_v45 = vld [vmem:[#allocation10 + $0x20] sm:$0xff]  }
 0x7f5   :  { %v975_v46 = vpop.f32.mrb[12].mxu1 }
 0x7f6   :  { %990 = vrot.lane.b32.xlu1 %v975_v46, %s3846_s6  ;;  %v3337_v47 = vpop.f32.mrb[13].mxu1  ;;  %v3567_v46 = vld [vmem:[#allocation10 + $0x28] sm:$0xff]   ;;  %s4700_s6 = sld [smem:[#allocation20_spill]] }
 0x7f7   :  { %v978_v48 = vpop.f32.mrb[14].mxu1  ;;  %v3568_v47 = vld [vmem:[#allocation10 + $0x30] sm:$0xff]  }
 0x7f8   :  { %v3338_v50 = vpop.f32.mrb[15].mxu1  ;;  %v3570_v48 = vld [vmem:[%s4686_s17] sm:$0xff]  }
 0x7f9   :  { %v3569_v50 = vld [vmem:[#allocation10 + $0x38] sm:$0xff]  }
 0x858   :  { %v983_v51 = vpop.permute.xlu1 %982 }
 0x859   :  { %v993_v53 = vsel %vm551_vm2, %v4217_v37, %v983_v51  ;;  %v3535_v37 = vld [vmem:[#allocation9 + $0x10] sm:$0xff]   ;;  %v3571_v51 = vld [vmem:[%s4686_s17 + $0x8] sm:$0xff]  }
 0x85a   :  { %3127 = vmatpush3.bf16.xpose.msra.mxu1 %v3535_v37 }
 0x85b   :  { %3128 = vmatprep.subr.bf16.mxu1 %v3536_v63 }
 0x860   :  { %v987_v52 = vpop.permute.xlu1 %986 }
 0x861   :  { %v994_v54 = vsel %vm487_vm0, %v993_v53, %v987_v52  ;;  %v3572_v52 = vld [vmem:[%s4686_s17 + $0x10] sm:$0xff]   ;;  %v3573_v53 = vld [vmem:[%s4686_s17 + $0x18] sm:$0xff]  }
 0x862   :  { %3129 = vmatpush3.bf16.xpose.msra.mxu1 %v3537_v0 }
 0x863   :  { %3130 = vmatprep.subr.bf16.mxu1 %v3538_v1 }
 0x868   :  { %v991_v55 = vpop.permute.xlu1 %990 }
 0x869   :  { %v996_v56 = vsel %vm995_vm6, %v994_v54, %v991_v55  ;;  %v3574_v54 = vld [vmem:[%s4686_s17 + $0x20] sm:$0xff]   ;;  %v3575_v55 = vld [vmem:[%s4686_s17 + $0x28] sm:$0xff]  }
 0x86a   :  { %v997_v57 = vpack.c.bf16 %v996_v56, %v996_v56  ;;  %3131 = vmatpush3.bf16.xpose.msra.mxu1 %v3539_v2  ;;  %v3576_v56 = vld [vmem:[%s4686_s17 + $0x30] sm:$0xff]  }
 0x86b   :  { %3132 = vmatprep.subr.bf16.mxu1 %v3540_v3 }
 0x86c   :  { %3356 = vmatmul.mubr.bf16.vlgmr.msra.gmra.mrb[28].mxu0 %v997_v57  ;;  %v3577_v57 = vld [vmem:[%s4686_s17 + $0x38] sm:$0xff]  }
 0x86d   :  { %3361 = vmatprep.mubr.msk.f32.mxu0 %vm3845_vm1, %v3844_v19  ;;  %3360 = vmatpush3.xpose.msra.mxu0 %v1297_v14 }
 0x86e   :  { %3364 = vmatprep.subr.bf16.mxu0 %v3844_v19 }
 0x872   :  { %3133 = vmatpush3.bf16.xpose.msra.mxu1 %v3541_v4 }
 0x873   :  { %3134 = vmatprep.subr.bf16.mxu1 %v3542_v12 }
 0x87a   :  { %3135 = vmatpush3.bf16.xpose.msra.mxu1 %v3543_v13 }
 0x87b   :  { %3136 = vmatprep.subr.bf16.mxu1 %v3544_v15 }
 0x93f   :  { %v1080_v6 = vpop.f32.mrb[28].mxu0 }
 0x940   :  { %v1081_v7 = vadd.f32 %v1080_v6, %v4051_v5  ;;  %v3357_v8 = vpop.f32.mrb[29].mxu0  ;;  %v3545_v5 = vld [vmem:[#allocation9 + $0x38] sm:$0xff]  }
 0x941   :  { %v1083_v9 = vpop.f32.mrb[30].mxu0  ;;  %3137 = vmatpush3.bf16.xpose.msra.mxu1 %v3545_v5 }
 0x942   :  { %1086 = vst [vmem:[%s4688_s19] sm:$0xff] %v1081_v7  ;;  %v3358_v10 = vpop.f32.mrb[31].mxu0  ;;  %v1088_v11 = vmul.f32 %v1081_v7, %v1081_v7  ;;  %3142 = vmatprep.subr.bf16.mxu1 %v3546_v16 }
 0x944   :  { %1089 = vadd.xlane.f32.xlu0 %v1088_v11 }
 0x9d1   :  { %v1090_v17 = vpop.xlane.xlu0 %1089 }
 0x9d2   :  { %v1091_v18 = vmul.f32 0.0078125, %v1090_v17 }
 0x9d4   :  { %v1092_v20 = vadd.f32 1e-05, %v1091_v18  ;;  %v3579_v18 = vld [vmem:[%s4685_s16 + $0x80] sm:$0xff]  }
 0x9d6   :  { %3668 = vrsqrt.f32 %v1092_v20 }
 0x9e0   :  { %v3669_v21 = vpop.eup %3668 }
 0x9e1   :  { %v1094_v23 = vmul.f32 %v3669_v21, %v1081_v7  ;;  %v3580_v21 = vld [vmem:[%s4685_s16 + $0xc8] sm:$0xff]  }
 0x9e3   :  { %v1101_v49 = vmul.f32 %v2786_v22, %v1094_v23  ;;  %v3581_v22 = vld [vmem:[%s4685_s16 + $0x88] sm:$0xff]   ;;  %v3582_v23 = vld [vmem:[%s4685_s16 + $0xd0] sm:$0xff]  }
 0x9e5   :  { %v4272_v24 = vpack.c.bf16 %v1101_v49, %v1101_v49  ;;  %3362 = vmatmul.mubr.f32.vlgmr.msra.gmra.mrb[32].mxu0 %v1101_v49  ;;  %v3583_v49 = vld [vmem:[%s4685_s16 + $0x90] sm:$0xff]  }
 0x9e6   :  { %3380 = vmatprep.mubr.msk.bf16.mxu0 %vm3845_vm1, %v3844_v19  ;;  %3365 = vmatpush3.bf16.xpose.msra.mxu0 %v3570_v48  ;;  %v3601_v48 = vld [vmem:[%s4685_s16 + $0x118] sm:$0xff]  }
 0x9e7   :  { %3138 = vmatprep.mubr.bf16.mxu1 %v4272_v24  ;;  %3366 = vmatprep.subr.bf16.mxu0 %v3844_v19 }
 0x9e8   :  { %3139 = vmatmul.mubr.bf16.vlgmr.msra.gmra.mrb[16].mxu1 %v4272_v24 }
 0x9e9   :  { %3143 = vmatpush3.bf16.xpose.msra.mxu1 %v3547_v25  ;;  %3158 = vmatprep.mubr.bf16.mxu1 %v4272_v24  ;;  %v3584_v25 = vld [vmem:[%s4685_s16 + $0xd8] sm:$0xff]  }
 0x9ea   :  { %3144 = vmatprep.subr.bf16.mxu1 %v3548_v26  ;;  %v3585_v26 = vld [vmem:[%s4685_s16 + $0x98] sm:$0xff]  }
 0x9ee   :  { %3367 = vmatpush3.bf16.xpose.msra.mxu0 %v3571_v51  ;;  %v3848_v51 = vmov 2  }
 0x9ef   :  { %3368 = vmatprep.subr.bf16.mxu0 %v3844_v19  ;;  %3487 = vset.pattern.permute.xlu1 %v3848_v51 }
 0x9f1   :  { %3145 = vmatpush3.bf16.xpose.msra.mxu1 %v3549_v27  ;;  %v3586_v27 = vld [vmem:[%s4685_s16 + $0xe0] sm:$0xff]  }
 0x9f2   :  { %3146 = vmatprep.subr.bf16.mxu1 %v3550_v28  ;;  %v3587_v28 = vld [vmem:[%s4685_s16 + $0xa0] sm:$0xff]  }
 0x9f6   :  { %3369 = vmatpush3.bf16.xpose.msra.mxu0 %v3572_v52  ;;  %v3849_v52 = vmov 1  }
 0x9f7   :  { %3370 = vmatprep.subr.bf16.mxu0 %v3844_v19  ;;  %3486 = vset.pattern.permute.xlu0 %v3849_v52 }
 0x9f9   :  { %3147 = vmatpush3.bf16.xpose.msra.mxu1 %v3551_v29  ;;  %v3588_v29 = vld [vmem:[%s4685_s16 + $0xe8] sm:$0xff]  }
 0x9fa   :  { %3148 = vmatprep.subr.bf16.mxu1 %v3552_v30  ;;  %v3589_v30 = vld [vmem:[%s4685_s16 + $0xa8] sm:$0xff]  }
 0x9fe   :  { %3371 = vmatpush3.bf16.xpose.msra.mxu0 %v3573_v53  ;;  %v3603_v53 = vld [vmem:[%s4685_s16 + $0x120] sm:$0xff]  }
 0x9ff   :  { %3372 = vmatprep.subr.bf16.mxu0 %v3844_v19 }
 0xa01   :  { %3149 = vmatpush3.bf16.xpose.msra.mxu1 %v3553_v31  ;;  %v3590_v31 = vld [vmem:[%s4685_s16 + $0xf0] sm:$0xff]  }
 0xa02   :  { %3150 = vmatprep.subr.bf16.mxu1 %v3554_v32 }
 0xa06   :  { %3373 = vmatpush3.bf16.xpose.msra.mxu0 %v3574_v54  ;;  %v3604_v54 = vld [vmem:[%s4685_s16 + $0x168] sm:$0xff]  }
 0xa07   :  { %3374 = vmatprep.subr.bf16.mxu0 %v3844_v19 }
 0xa09   :  { %3151 = vmatpush3.bf16.xpose.msra.mxu1 %v3555_v33 }
 0xa0a   :  { %3152 = vmatprep.subr.bf16.mxu1 %v3556_v34  ;;  %v3591_v34 = vld [vmem:[%s4685_s16 + $0xb0] sm:$0xff]  }
 0xa0e   :  { %3375 = vmatpush3.bf16.xpose.msra.mxu0 %v3575_v55  ;;  %v3626_v55 = vld [vmem:[%s4686_s17 + $0x40] sm:$0xff]  }
 0xa0f   :  { %3376 = vmatprep.subr.bf16.mxu0 %v3844_v19 }
 0xa11   :  { %3153 = vmatpush3.bf16.xpose.msra.mxu1 %v3557_v35 }
 0xa12   :  { %3154 = vmatprep.subr.bf16.mxu1 %v3558_v36  ;;  %v3592_v36 = vld [vmem:[%s4685_s16 + $0xf8] sm:$0xff]  }
 0xa16   :  { %3377 = vmatpush3.bf16.xpose.msra.mxu0 %v3576_v56  ;;  %v3605_v56 = vld [vmem:[%s4685_s16 + $0x128] sm:$0xff]  }
 0xa17   :  { %3378 = vmatprep.subr.bf16.mxu0 %v3844_v19 }
 0xa19   :  { %3155 = vmatpush3.bf16.xpose.msra.mxu1 %v3559_v38  ;;  %v3593_v38 = vld [vmem:[%s4685_s16 + $0xb8] sm:$0xff]  }
 0xa1a   :  { %3156 = vmatprep.subr.bf16.mxu1 %v3560_v39  ;;  %v3594_v39 = vld [vmem:[%s4685_s16 + $0x140] sm:$0xff]  }
 0xa1e   :  { %3379 = vmatpush3.bf16.xpose.msra.mxu0 %v3577_v57  ;;  %v3606_v57 = vld [vmem:[%s4685_s16 + $0x170] sm:$0xff]  }
 0xa1f   :  { %3178 = vmatprep.subr.bf16.mxu0 %v3578_v58  ;;  %v3627_v58 = vld [vmem:[%s4686_s17 + $0x48] sm:$0xff]  }
 0xa21   :  { %3157 = vmatpush3.bf16.xpose.msra.mxu1 %v3561_v40 }
 0xa22   :  { %3384 = vmatprep.subr.bf16.mxu1 %v3844_v19 }
 0xa28   :  { %3159 = vmatmul.mubr.bf16.vlgmr.msra.gmra.mrb[20].mxu1 %v4272_v24 }
 0xa29   :  { %3385 = vmatpush3.bf16.xpose.msra.mxu1 %v3562_v41  ;;  %3400 = vmatprep.mubr.msk.bf16.mxu1 %vm3845_vm1, %v3844_v19 }
 0xa2a   :  { %3386 = vmatprep.subr.bf16.mxu1 %v3844_v19 }
 0xa31   :  { %3387 = vmatpush3.bf16.xpose.msra.mxu1 %v3563_v42  ;;  %v3595_v42 = vld [vmem:[%s4685_s16 + $0x100] sm:$0xff]  }
 0xa32   :  { %3388 = vmatprep.subr.bf16.mxu1 %v3844_v19 }
 0xa39   :  { %3389 = vmatpush3.bf16.xpose.msra.mxu1 %v3564_v43  ;;  %v3596_v43 = vld [vmem:[%s4685_s16 + $0x148] sm:$0xff]  }
 0xa3a   :  { %3390 = vmatprep.subr.bf16.mxu1 %v3844_v19 }
 0xa41   :  { %3391 = vmatpush3.bf16.xpose.msra.mxu1 %v3565_v44  ;;  %v3597_v44 = vld [vmem:[%s4685_s16 + $0x108] sm:$0xff]  }
 0xa42   :  { %3392 = vmatprep.subr.bf16.mxu1 %v3844_v19 }
 0xa49   :  { %3393 = vmatpush3.bf16.xpose.msra.mxu1 %v3566_v45  ;;  %v3598_v45 = vld [vmem:[%s4685_s16 + $0x150] sm:$0xff]  }
 0xa4a   :  { %3394 = vmatprep.subr.bf16.mxu1 %v3844_v19 }
 0xa51   :  { %3395 = vmatpush3.bf16.xpose.msra.mxu1 %v3567_v46  ;;  %v3599_v46 = vld [vmem:[%s4685_s16 + $0x110] sm:$0xff]  }
 0xa52   :  { %3396 = vmatprep.subr.bf16.mxu1 %v3844_v19 }
 0xa59   :  { %3397 = vmatpush3.bf16.xpose.msra.mxu1 %v3568_v47  ;;  %v3600_v47 = vld [vmem:[%s4685_s16 + $0x158] sm:$0xff]  }
 0xa5a   :  { %3398 = vmatprep.subr.bf16.mxu1 %v3844_v19 }
 0xa61   :  { %3399 = vmatpush3.bf16.xpose.msra.mxu1 %v3569_v50  ;;  %v3602_v50 = vld [vmem:[%s4685_s16 + $0x160] sm:$0xff]  }
 0xa62   :  { %3404 = vmatprep.subr.bf16.mxu1 %v3844_v19 }
 0xab8   :  { %v1364_v59 = vpop.f32.mrb[32].mxu0 }
 0xab9   :  { %v3363_v60 = vpop.f32.mrb[33].mxu0  ;;  %v1369_v61 = vsel %vm1368_vm7, %v1364_v59, -inf }
 0xaba   :  { %1370 = vmax.xlane.f32.xlu1 %v1369_v61  ;;  %v3608_v60 = vld [vmem:[%s4685_s16 + $0x178] sm:$0xff]   ;;  %v3628_v61 = vld [vmem:[%s4686_s17 + $0x50] sm:$0xff]  }
 0xabb   :  { %v1281_v62 = vpop.f32.mrb[16].mxu1 }
 0xabc   :  { %v2803_v37 = vmul.f32 -1.442695, %v1281_v62  ;;  %v1283_v63 = vpop.f32.mrb[17].mxu1 }
 0xabd   :  { %v1285_v0 = vpop.f32.mrb[18].mxu1 }
 0xabe   :  { %3670 = vpow2.f32 %v2803_v37  ;;  %v1286_v1 = vpop.f32.mrb[19].mxu1  ;;  %v3610_v37 = vld [vmem:[%s4685_s16 + $0x1c0] sm:$0xff]  }
 0xabf   :  { %v3611_v0 = vld [vmem:[%s4685_s16 + $0x180] sm:$0xff]   ;;  %v3612_v1 = vld [vmem:[%s4685_s16 + $0x1c8] sm:$0xff]  }
 0xac8   :  { %v3671_v2 = vpop.eup %3670 }
 0xac9   :  { %v1291_v3 = vadd.f32 1.0, %v3671_v2  ;;  %v3613_v2 = vld [vmem:[%s4685_s16 + $0x188] sm:$0xff]  }
 0xacb   :  { %3672 = vrcp.f32 %v1291_v3  ;;  %v3614_v3 = vld [vmem:[%s4685_s16 + $0x1d0] sm:$0xff]  }
 0xad5   :  { %v3673_v4 = vpop.eup %3672 }
 0xad6   :  { %v1294_v6 = vmul.f32 %v3673_v4, %v1281_v62  ;;  %v3609_v62 = vld [vmem:[%s4685_s16 + $0x138] sm:$0xff]   ;;  %v3615_v4 = vld [vmem:[%s4685_s16 + $0x190] sm:$0xff]  }
 0xad8   :  { %v1295_v7 = vmul.f32 %v1294_v6, %v1283_v63  ;;  %v3629_v63 = vld [vmem:[%s4686_s17 + $0x58] sm:$0xff]  }
 0xad9   :  { %v3616_v6 = vld [vmem:[%s4685_s16 + $0x1d8] sm:$0xff]  }
 0xada   :  { %v1296_v8 = vpack.c.bf16 %v1295_v7, %v1295_v7 }
 0xadc   :  { %3401 = vmatmul.mubr.bf16.vlgmr.msra.gmra.mrb[24].mxu1 %v1296_v8  ;;  %v3630_v8 = vld [vmem:[%s4686_s17 + $0x60] sm:$0xff]  }
 0xadd   :  { %3420 = vmatprep.mubr.msk.bf16.mxu1 %vm3845_vm1, %v3844_v19  ;;  %3405 = vmatpush3.bf16.xpose.msra.mxu1 %v3626_v55 }
 0xade   :  { %3406 = vmatprep.subr.bf16.mxu1 %v3844_v19 }
 0xae5   :  { %3407 = vmatpush3.bf16.xpose.msra.mxu1 %v3627_v58 }
 0xae6   :  { %3408 = vmatprep.subr.bf16.mxu1 %v3844_v19 }
 0xaed   :  { %3409 = vmatpush3.bf16.xpose.msra.mxu1 %v3628_v61  ;;  %v3639_v61 = vld [vmem:[%s4686_s17 + $0xa8] sm:$0xff]  }
 0xaee   :  { %3410 = vmatprep.subr.bf16.mxu1 %v3844_v19 }
 0xaf5   :  { %3411 = vmatpush3.bf16.xpose.msra.mxu1 %v3629_v63 }
 0xaf6   :  { %3412 = vmatprep.subr.bf16.mxu1 %v3844_v19 }
 0xafb   :  { %v1641_v9 = vpop.f32.mrb[20].mxu1 }
 0xafc   :  { %v2829_v10 = vmul.f32 -1.442695, %v1641_v9  ;;  %v1643_v11 = vpop.f32.mrb[21].mxu1 }
 0xafd   :  { %v1645_v12 = vpop.f32.mrb[22].mxu1  ;;  %3413 = vmatpush3.bf16.xpose.msra.mxu1 %v3630_v8  ;;  %v3640_v8 = vld [vmem:[%s4686_s17 + $0xb0] sm:$0xff]  }
 0xafe   :  { %3674 = vpow2.f32 %v2829_v10  ;;  %v1646_v13 = vpop.f32.mrb[23].mxu1  ;;  %3414 = vmatprep.subr.bf16.mxu1 %v3844_v19 }
 0xaff   :  { %v3618_v13 = vld [vmem:[%s4685_s16 + $0x1e0] sm:$0xff]  }
 0xb08   :  { %v3675_v14 = vpop.eup %3674 }
 0xb09   :  { %v1651_v15 = vadd.f32 1.0, %v3675_v14  ;;  %v3631_v14 = vld [vmem:[%s4686_s17 + $0x68] sm:$0xff]  }
 0xb0a   :  { %3415 = vmatpush3.bf16.xpose.msra.mxu1 %v3631_v14 }
 0xb0b   :  { %3676 = vrcp.f32 %v1651_v15  ;;  %v3619_v15 = vld [vmem:[%s4685_s16 + $0x1a0] sm:$0xff]   ;;  %3416 = vmatprep.subr.bf16.mxu1 %v3844_v19 }
 0xb15   :  { %v3677_v5 = vpop.eup %3676 }
 0xb16   :  { %v1654_v16 = vmul.f32 %v3677_v5, %v1641_v9  ;;  %v3620_v5 = vld [vmem:[%s4685_s16 + $0x1e8] sm:$0xff]  }
 0xb18   :  { %v1655_v17 = vmul.f32 %v1654_v16, %v1643_v11  ;;  %v3617_v11 = vld [vmem:[%s4685_s16 + $0x198] sm:$0xff]   ;;  %v3632_v16 = vld [vmem:[%s4686_s17 + $0x70] sm:$0xff]  }
 0xb19   :  { %3417 = vmatpush3.bf16.xpose.msra.mxu1 %v3632_v16 }
 0xb1a   :  { %v1656_v20 = vpack.c.bf16 %v1655_v17, %v1655_v17  ;;  %v3621_v17 = vld [vmem:[%s4685_s16 + $0x1a8] sm:$0xff]   ;;  %3418 = vmatprep.subr.bf16.mxu1 %v3844_v19 }
 0xb1c   :  { %3381 = vmatmul.mubr.bf16.vlgmr.msra.gmra.mrb[36].mxu0 %v1656_v20  ;;  %v3633_v20 = vld [vmem:[%s4686_s17 + $0x78] sm:$0xff]  }
 0xb1d   :  { %3179 = vmatpush3.bf16.xpose.msra.mxu0 %v3579_v18  ;;  %3194 = vmatprep.mubr.bf16.mxu0 %v4272_v24  ;;  %v3622_v18 = vld [vmem:[%s4685_s16 + $0x1f0] sm:$0xff]  }
 0xb1e   :  { %3180 = vmatprep.subr.bf16.mxu0 %v3580_v21  ;;  %v3623_v21 = vld [vmem:[%s4685_s16 + $0x1b0] sm:$0xff]  }
 0xb21   :  { %3419 = vmatpush3.bf16.xpose.msra.mxu1 %v3633_v20  ;;  %v3645_v20 = vld [vmem:[%s4686_s17 + $0xd8] sm:$0xff]  }
 0xb22   :  { %3424 = vmatprep.subr.bf16.mxu1 %v3844_v19 }
 0xb25   :  { %3181 = vmatpush3.bf16.xpose.msra.mxu0 %v3581_v22  ;;  %v3624_v22 = vld [vmem:[%s4685_s16 + $0x1f8] sm:$0xff]  }
 0xb26   :  { %3182 = vmatprep.subr.bf16.mxu0 %v3582_v23  ;;  %v3625_v23 = vld [vmem:[%s4685_s16 + $0x1b8] sm:$0xff]  }
 0xb2d   :  { %3183 = vmatpush3.bf16.xpose.msra.mxu0 %v3583_v49 }
 0xb2e   :  { %3184 = vmatprep.subr.bf16.mxu0 %v3584_v25 }
 0xb35   :  { %3185 = vmatpush3.bf16.xpose.msra.mxu0 %v3585_v26 }
 0xb36   :  { %3186 = vmatprep.subr.bf16.mxu0 %v3586_v27  ;;  %v2804_v27 = vld [vmem:[#allocation7] ss:$0 sm:$0xff] }
 0xb3d   :  { %3187 = vmatpush3.bf16.xpose.msra.mxu0 %v3587_v28 }
 0xb3e   :  { %3188 = vmatprep.subr.bf16.mxu0 %v3588_v29 }
 0xb45   :  { %3189 = vmatpush3.bf16.xpose.msra.mxu0 %v3589_v30 }
 0xb46   :  { %3190 = vmatprep.subr.bf16.mxu0 %v3590_v31 }
 0xb47   :  { %v1371_v32 = vpop.xlane.xlu1 %1370 }
 0xb48   :  { %v1372_v33 = vsub.f32 %v1364_v59, %v1371_v32  ;;  %v3607_v59 = vld [vmem:[%s4685_s16 + $0x130] sm:$0xff]  }
 0xb4a   :  { %v1373_v35 = vmul.f32 1.442695, %v1372_v33  ;;  %v3851_v33 = vmov 0  }
 0xb4c   :  { %3678 = vpow2.f32 %v1373_v35 }
 0xb4d   :  { %3191 = vmatpush3.bf16.xpose.msra.mxu0 %v3591_v34 }
 0xb4e   :  { %3192 = vmatprep.subr.bf16.mxu0 %v3592_v36 }
 0xb55   :  { %3193 = vmatpush3.bf16.xpose.msra.mxu0 %v3593_v38 }
 0xb56   :  { %v4422_v40 = vpop.eup %3678  ;;  %3205 = vmatprep.subr.bf16.mxu0 %v3594_v39 }
 0xb57   :  { %v1375_v41 = vsel %vm1368_vm7, %v4422_v40, 0.0 }
 0xb58   :  { %1376 = vadd.xlane.f32.xlu0 %v1375_v41 }
 0xb5c   :  { %3195 = vmatmul.mubr.bf16.vlgmr.msra.gmra.mrb[40].mxu0 %v4272_v24 }
 0xb5d   :  { %3206 = vmatpush3.bf16.xpose.msra.mxu0 %v3595_v42  ;;  %3221 = vmatprep.mubr.bf16.mxu0 %v4272_v24 }
 0xb5e   :  { %3207 = vmatprep.subr.bf16.mxu0 %v3596_v43 }
 0xb65   :  { %3208 = vmatpush3.bf16.xpose.msra.mxu0 %v3597_v44 }
 0xb66   :  { %3209 = vmatprep.subr.bf16.mxu0 %v3598_v45  ;;  %v3634_v45 = vld [vmem:[%s4686_s17 + $0x80] sm:$0xff]  }
 0xb6d   :  { %3210 = vmatpush3.bf16.xpose.msra.mxu0 %v3599_v46 }
 0xb6e   :  { %3211 = vmatprep.subr.bf16.mxu0 %v3600_v47  ;;  %v3635_v47 = vld [vmem:[%s4686_s17 + $0x88] sm:$0xff]  }
 0xb75   :  { %3212 = vmatpush3.bf16.xpose.msra.mxu0 %v3601_v48  ;;  %v3636_v48 = vld [vmem:[%s4686_s17 + $0x90] sm:$0xff]  }
 0xb76   :  { %3213 = vmatprep.subr.bf16.mxu0 %v3602_v50  ;;  %v3637_v50 = vld [vmem:[%s4686_s17 + $0x98] sm:$0xff]  }
 0xb7d   :  { %3214 = vmatpush3.bf16.xpose.msra.mxu0 %v3603_v53  ;;  %v3638_v53 = vld [vmem:[%s4686_s17 + $0xa0] sm:$0xff]  }
 0xb7e   :  { %3215 = vmatprep.subr.bf16.mxu0 %v3604_v54 }
 0xb85   :  { %3216 = vmatpush3.bf16.xpose.msra.mxu0 %v3605_v56 }
 0xb86   :  { %3217 = vmatprep.subr.bf16.mxu0 %v3606_v57 }
 0xb8d   :  { %3218 = vmatpush3.bf16.xpose.msra.mxu0 %v3607_v59 }
 0xb8e   :  { %3219 = vmatprep.subr.bf16.mxu0 %v3608_v60 }
 0xb95   :  { %3220 = vmatpush3.bf16.xpose.msra.mxu0 %v3609_v62 }
 0xb96   :  { %3232 = vmatprep.subr.bf16.mxu0 %v3610_v37 }
 0xb9c   :  { %3222 = vmatmul.mubr.bf16.vlgmr.msra.gmra.mrb[44].mxu0 %v4272_v24 }
 0xb9d   :  { %3233 = vmatpush3.bf16.xpose.msra.mxu0 %v3611_v0  ;;  %3248 = vmatprep.mubr.bf16.mxu0 %v4272_v24 }
 0xb9e   :  { %3234 = vmatprep.subr.bf16.mxu0 %v3612_v1 }
 0xba5   :  { %3235 = vmatpush3.bf16.xpose.msra.mxu0 %v3613_v2 }
 0xba6   :  { %3236 = vmatprep.subr.bf16.mxu0 %v3614_v3 }
 0xbad   :  { %3237 = vmatpush3.bf16.xpose.msra.mxu0 %v3615_v4 }
 0xbae   :  { %3238 = vmatprep.subr.bf16.mxu0 %v3616_v6 }
 0xbaf   :  { %v4514_v7 = vpop.f32.mrb[24].mxu1 }
 0xbb0   :  { %v3402_v9 = vpop.f32.mrb[25].mxu1 }
 0xbb1   :  { %v1837_v10 = vpop.f32.mrb[26].mxu1 }
 0xbb2   :  { %v3403_v12 = vpop.f32.mrb[27].mxu1 }
 0xbb3   :  { %v3641_v12 = vld [vmem:[%s4686_s17 + $0xb8] sm:$0xff]  }
 0xbb5   :  { %3239 = vmatpush3.bf16.xpose.msra.mxu0 %v3617_v11 }
 0xbb6   :  { %3240 = vmatprep.subr.bf16.mxu0 %v3618_v13 }
 0xbbd   :  { %3241 = vmatpush3.bf16.xpose.msra.mxu0 %v3619_v15 }
 0xbbe   :  { %3242 = vmatprep.subr.bf16.mxu0 %v3620_v5  ;;  %v3642_v5 = vld [vmem:[%s4686_s17 + $0xc0] sm:$0xff]  }
 0xbc5   :  { %3243 = vmatpush3.bf16.xpose.msra.mxu0 %v3621_v17  ;;  %v3643_v17 = vld [vmem:[%s4686_s17 + $0xc8] sm:$0xff]  }
 0xbc6   :  { %3244 = vmatprep.subr.bf16.mxu0 %v3622_v18  ;;  %v3644_v18 = vld [vmem:[%s4686_s17 + $0xd0] sm:$0xff]  }
 0xbcd   :  { %3245 = vmatpush3.bf16.xpose.msra.mxu0 %v3623_v21  ;;  %v3646_v21 = vld [vmem:[%s4686_s17 + $0xe0] sm:$0xff]  }
 0xbce   :  { %3246 = vmatprep.subr.bf16.mxu0 %v3624_v22 }
 0xbd5   :  { %3247 = vmatpush3.bf16.xpose.msra.mxu0 %v3625_v23 }
 0xbdc   :  { %3249 = vmatmul.mubr.bf16.vlgmr.msra.gmra.mrb[48].mxu0 %v4272_v24  ;;  %v3850_v24 = vmov 3  }
 0xbe5   :  { %v1377_v49 = vpop.xlane.xlu0 %1376 }
 0xbe6   :  { %3680 = vrcp.f32 %v1377_v49 }
 0xbef   :  { %v4560_v25 = vpop.f32.mrb[36].mxu0 }
 0xbf0   :  { %v3681_v26 = vpop.eup %3680  ;;  %v3382_v28 = vpop.f32.mrb[37].mxu0 }
 0xbf1   :  { %v4563_v29 = vmul.f32 %v3681_v26, %v4422_v40  ;;  %v1742_v30 = vpop.f32.mrb[38].mxu0  ;;  %v3647_v28 = vld [vmem:[%s4686_s17 + $0xe8] sm:$0xff]  }
 0xbf2   :  { %v3383_v31 = vpop.f32.mrb[39].mxu0 }
 0xbf3   :  { %v4566_v32 = vadd.f32 %v2804_v27, %v4563_v29 }
 0xbf5   :  { %1424 = vperm.xlu1 %3487, %v4566_v32   ;;  %1405 = vperm.xlu0 %3486, %v4566_v32  }
 0xbf9   :  { %3488 = vset.pattern.permute.xlu1 %v3850_v24  ;;  %3493 = vset.pattern.permute.xlu0 %v3850_v24 }
 0xbfa   :  { %1443 = vperm.xlu1 %3488, %v4566_v32  }
 0xbfe   :  { %3489 = vset.pattern.permute.xlu1 %v3851_v33  ;;  %v3649_v33 = vld [vmem:[%s4686_s17 + $0xf8] sm:$0xff]  }
 0xbff   :  { %1390 = vperm.xlu1 %3489, %v4566_v32  }
 0xc2f   :  { %v2020_v34 = vpop.f32.mrb[40].mxu0 }
 0xc30   :  { %v2910_v35 = vmul.f32 -1.442695, %v2020_v34  ;;  %v2022_v36 = vpop.f32.mrb[41].mxu0 }
 0xc31   :  { %v2024_v38 = vpop.f32.mrb[42].mxu0 }
 0xc32   :  { %3682 = vpow2.f32 %v2910_v35  ;;  %v2025_v39 = vpop.f32.mrb[43].mxu0 }
 0xc3c   :  { %v3683_v40 = vpop.eup %3682 }
 0xc3d   :  { %v2030_v41 = vadd.f32 1.0, %v3683_v40 }
 0xc3f   :  { %3684 = vrcp.f32 %v2030_v41 }
 0xc49   :  { %v3685_v42 = vpop.eup %3684 }
 0xc4a   :  { %v2033_v43 = vmul.f32 %v3685_v42, %v2020_v34 }
 0xc4c   :  { %v2034_v44 = vmul.f32 %v2033_v43, %v2022_v36 }
 0xc4e   :  { %v2035_v46 = vpack.c.bf16 %v2034_v44, %v2034_v44 }
 0xc50   :  { %3421 = vmatmul.mubr.bf16.vlgmr.msra.gmra.mrb[28].mxu1 %v2035_v46 }
 0xc51   :  { %3425 = vmatpush3.bf16.xpose.msra.mxu1 %v3634_v45  ;;  %3440 = vmatprep.mubr.msk.bf16.mxu1 %vm3845_vm1, %v3844_v19 }
 0xc52   :  { %3426 = vmatprep.subr.bf16.mxu1 %v3844_v19 }
 0xc59   :  { %3427 = vmatpush3.bf16.xpose.msra.mxu1 %v3635_v47 }
 0xc5a   :  { %3428 = vmatprep.subr.bf16.mxu1 %v3844_v19 }
 0xc61   :  { %3429 = vmatpush3.bf16.xpose.msra.mxu1 %v3636_v48 }
 0xc62   :  { %3430 = vmatprep.subr.bf16.mxu1 %v3844_v19 }
 0xc69   :  { %3431 = vmatpush3.bf16.xpose.msra.mxu1 %v3637_v50 }
 0xc6a   :  { %3432 = vmatprep.subr.bf16.mxu1 %v3844_v19 }
 0xc6f   :  { %v2316_v54 = vpop.f32.mrb[44].mxu0 }
 0xc70   :  { %v2983_v55 = vmul.f32 -1.442695, %v2316_v54  ;;  %v2318_v56 = vpop.f32.mrb[45].mxu0 }
 0xc71   :  { %v2320_v57 = vpop.f32.mrb[46].mxu0  ;;  %3433 = vmatpush3.bf16.xpose.msra.mxu1 %v3638_v53 }
 0xc72   :  { %3686 = vpow2.f32 %v2983_v55  ;;  %v2321_v58 = vpop.f32.mrb[47].mxu0  ;;  %3434 = vmatprep.subr.bf16.mxu1 %v3844_v19 }
 0xc74   :  { %v1425_v59 = vpop.permute.xlu1 %1424  ;;  %v1406_v60 = vpop.permute.xlu0 %1405 }
 0xc75   :  { %vm1427_vm8 = vcmp.gt.f32.partialorder %v4566_v32, %v1425_v59  ;;  %vm1408_vm9 = vcmp.gt.f32.partialorder %v4566_v32, %v1406_v60 }
 0xc76   :  { %v2809_v62 = vsel %vm1427_vm8, 1.0, %v3844_v19  ;;  %v2807_v37 = vsel %vm1408_vm9, 1.0, %v3844_v19 }
 0xc77   :  { %v1430_v63 = vsel %vm1368_vm7, %v2809_v62, 0.0  ;;  %v1411_v0 = vsel %vm1368_vm7, %v2807_v37, 0.0 }
 0xc78   :  { %1431 = vadd.xlane.f32.xlu0 %v1430_v63  ;;  %1412 = vadd.xlane.f32.xlu1 %v1411_v0 }
 0xc79   :  { %3435 = vmatpush3.bf16.xpose.msra.mxu1 %v3639_v61  ;;  %v1444_v1 = vpop.permute.xlu1 %1443 }
 0xc7a   :  { %vm1446_vm10 = vcmp.gt.f32.partialorder %v4566_v32, %v1444_v1  ;;  %3436 = vmatprep.subr.bf16.mxu1 %v3844_v19 }
 0xc7b   :  { %v2811_v2 = vsel %vm1446_vm10, 1.0, %v3844_v19 }
 0xc7c   :  { %v3687_v3 = vpop.eup %3686  ;;  %v1449_v4 = vsel %vm1368_vm7, %v2811_v2, 0.0 }
 0xc7d   :  { %v2326_v6 = vadd.f32 1.0, %v3687_v3  ;;  %1450 = vadd.xlane.f32.xlu1 %v1449_v4 }
 0xc7e   :  { %v1391_v9 = vpop.permute.xlu1 %1390 }
 0xc7f   :  { %3688 = vrcp.f32 %v2326_v6  ;;  %vm1393_vm11 = vcmp.gt.f32.partialorder %v4566_v32, %v1391_v9  ;;  %v3648_v32 = vld [vmem:[%s4686_s17 + $0xf0] sm:$0xff]   ;;  %s3853_s17 = smov 126  }
 0xc80   :  { %v2805_v10 = vsel %vm1393_vm11, 1.0, %v3844_v19 }
 0xc81   :  { %3437 = vmatpush3.bf16.xpose.msra.mxu1 %v3640_v8  ;;  %v1396_v11 = vsel %vm1368_vm7, %v2805_v10, 0.0 }
 0xc82   :  { %1397 = vadd.xlane.f32.xlu1 %v1396_v11  ;;  %3438 = vmatprep.subr.bf16.mxu1 %v3844_v19 }
 0xc89   :  { %v3689_v13 = vpop.eup %3688  ;;  %3439 = vmatpush3.bf16.xpose.msra.mxu1 %v3641_v12 }
 0xc8a   :  { %v2329_v14 = vmul.f32 %v3689_v13, %v2316_v54  ;;  %3444 = vmatprep.subr.bf16.mxu1 %v3844_v19 }
 0xc8c   :  { %v2330_v15 = vmul.f32 %v2329_v14, %v2318_v56 }
 0xc8e   :  { %v2331_v16 = vpack.c.bf16 %v2330_v15, %v2330_v15 }
 0xc90   :  { %3441 = vmatmul.mubr.bf16.vlgmr.msra.gmra.mrb[32].mxu1 %v2331_v16 }
 0xc91   :  { %3445 = vmatpush3.bf16.xpose.msra.mxu1 %v3642_v5  ;;  %3460 = vmatprep.mubr.msk.bf16.mxu1 %vm3845_vm1, %v3844_v19 }
 0xc92   :  { %3446 = vmatprep.subr.bf16.mxu1 %v3844_v19 }
 0xc99   :  { %3447 = vmatpush3.bf16.xpose.msra.mxu1 %v3643_v17 }
 0xc9a   :  { %3448 = vmatprep.subr.bf16.mxu1 %v3844_v19 }
 0xca1   :  { %3449 = vmatpush3.bf16.xpose.msra.mxu1 %v3644_v18 }
 0xca2   :  { %3450 = vmatprep.subr.bf16.mxu1 %v3844_v19 }
 0xca9   :  { %3451 = vmatpush3.bf16.xpose.msra.mxu1 %v3645_v20 }
 0xcaa   :  { %3452 = vmatprep.subr.bf16.mxu1 %v3844_v19 }
 0xcaf   :  { %v2611_v22 = vpop.f32.mrb[48].mxu0 }
 0xcb0   :  { %v3056_v23 = vmul.f32 -1.442695, %v2611_v22  ;;  %v2613_v49 = vpop.f32.mrb[49].mxu0 }
 0xcb1   :  { %v2615_v26 = vpop.f32.mrb[50].mxu0  ;;  %3453 = vmatpush3.bf16.xpose.msra.mxu1 %v3646_v21 }
 0xcb2   :  { %3690 = vpow2.f32 %v3056_v23  ;;  %v2616_v27 = vpop.f32.mrb[51].mxu0  ;;  %3454 = vmatprep.subr.bf16.mxu1 %v3844_v19 }
 0xcb9   :  { %3455 = vmatpush3.bf16.xpose.msra.mxu1 %v3647_v28 }
 0xcba   :  { %3456 = vmatprep.subr.bf16.mxu1 %v3844_v19 }
 0xcbc   :  { %v3691_v30 = vpop.eup %3690 }
 0xcbd   :  { %v2621_v31 = vadd.f32 1.0, %v3691_v30 }
 0xcbf   :  { %3692 = vrcp.f32 %v2621_v31 }
 0xcc1   :  { %3457 = vmatpush3.bf16.xpose.msra.mxu1 %v3648_v32 }
 0xcc2   :  { %3458 = vmatprep.subr.bf16.mxu1 %v3844_v19 }
 0xcc9   :  { %v3693_v34 = vpop.eup %3692  ;;  %3459 = vmatpush3.bf16.xpose.msra.mxu1 %v3649_v33 }
 0xcca   :  { %v2624_v35 = vmul.f32 %v3693_v34, %v2611_v22 }
 0xccc   :  { %v2625_v36 = vmul.f32 %v2624_v35, %v2613_v49 }
 0xcce   :  { %v2626_v38 = vpack.c.bf16 %v2625_v36, %v2625_v36 }
 0xcd0   :  { %3461 = vmatmul.mubr.bf16.vlgmr.msra.gmra.mrb[36].mxu1 %v2626_v38 }
 0xd05   :  { %v1413_v39 = vpop.xlane.xlu1 %1412  ;;  %v1432_v40 = vpop.xlane.xlu0 %1431 }
 0xd06   :  { %vm1414_vm12 = vcmp.lt.f32.partialorder %v1413_v39, 2.0  ;;  %vm1433_vm13 = vcmp.lt.f32.partialorder %v1432_v40, 2.0 }
 0xd07   :  { %v2808_v41 = vsel %vm1414_vm12, 1.0, %v3844_v19  ;;  %v2810_v42 = vsel %vm1433_vm13, 1.0, %v3844_v19 }
 0xd08   :  { %v1417_v43 = vmul.f32 %v2808_v41, %v4563_v29  ;;  %v1436_v44 = vmul.f32 %v2810_v42, %v4563_v29 }
 0xd0a   :  { %1419 = vrot.lane.b32.xlu1 %v1417_v43, %s3852_s23  ;;  %v1451_v45 = vpop.xlane.xlu1 %1450  ;;  %1438 = vrot.lane.b32.xlu0 %v1436_v44, %s3853_s17 }
 0xd0b   :  { %vm1452_vm14 = vcmp.lt.f32.partialorder %v1451_v45, 2.0 }
 0xd0c   :  { %v2812_v46 = vsel %vm1452_vm14, 1.0, %v3844_v19 }
 0xd0d   :  { %v1455_v47 = vmul.f32 %v2812_v46, %v4563_v29 }
 0xd0f   :  { %1457 = vrot.lane.b32.xlu1 %v1455_v47, %s3854_s11  ;;  %v1398_v59 = vpop.xlane.xlu1 %1397 }
 0xd10   :  { %vm1399_vm15 = vcmp.lt.f32.partialorder %v1398_v59, 2.0 }
 0xd11   :  { %v2806_v60 = vsel %vm1399_vm15, 1.0, %v3844_v19 }
 0xd12   :  { %v1402_v61 = vmul.f32 %v2806_v60, %v4563_v29 }
 0xd23   :  { %v2118_v48 = vpop.f32.mrb[28].mxu1 }
 0xd24   :  { %v3422_v50 = vpop.f32.mrb[29].mxu1 }
 0xd25   :  { %v2121_v53 = vpop.f32.mrb[30].mxu1 }
 0xd26   :  { %v3423_v54 = vpop.f32.mrb[31].mxu1 }
 0xd63   :  { %v2414_v55 = vpop.f32.mrb[32].mxu1 }
 0xd64   :  { %v3442_v56 = vpop.f32.mrb[33].mxu1 }
 0xd65   :  { %v2417_v57 = vpop.f32.mrb[34].mxu1 }
 0xd66   :  { %v3443_v58 = vpop.f32.mrb[35].mxu1 }
 0xd7c   :  { %v1420_v62 = vpop.permute.xlu1 %1419  ;;  %v1439_v63 = vpop.permute.xlu0 %1438 }
 0xd7d   :  { %v1422_v37 = vadd.f32 %v1420_v62, %v1402_v61 }
 0xd7f   :  { %v1441_v0 = vadd.f32 %v1439_v63, %v1422_v37 }
 0xd81   :  { %v1458_v1 = vpop.permute.xlu1 %1457 }
 0xd82   :  { %v1460_v2 = vadd.f32 %v1458_v1, %v1441_v0 }
 0xd84   :  { %3694 = vrcp.f32 %v1460_v2 }
 0xd8e   :  { %v3695_v3 = vpop.eup %3694 }
 0xd8f   :  { %2125 = vrot.lane.b32.xlu0 %v3695_v3, %s3855_s27  ;;  %v1745_v4 = vmul.f32 %v3695_v3, %v1402_v61 }
 0xd91   :  { %1748 = vperm.xlu1 %3489, %v1745_v4  }
 0xd93   :  { %2420 = vrot.lane.b32.xlu0 %v3695_v3, %s3856_s24 }
 0xd95   :  { %3490 = vset.pattern.permute.xlu1 %v3849_v52 }
 0xd97   :  { %2715 = vrot.lane.b32.xlu0 %v3695_v3, %s3857_s21 }
 0xda3   :  { %v2709_v19 = vpop.f32.mrb[36].mxu1 }
 0xda4   :  { %v3462_v29 = vpop.f32.mrb[37].mxu1 }
 0xda5   :  { %v2712_v6 = vpop.f32.mrb[38].mxu1 }
 0xda6   :  { %v3463_v8 = vpop.f32.mrb[39].mxu1 }
 0xe01   :  { %v2126_v9 = vpop.permute.xlu0 %2125 }
 0xe02   :  { %v2128_v10 = vmul.f32 %v2126_v9, %v1417_v43 }
 0xe04   :  { %2131 = vperm.xlu1 %3490, %v2128_v10  }
 0xe05   :  { %v2421_v11 = vpop.permute.xlu0 %2420 }
 0xe06   :  { %v2423_v12 = vmul.f32 %v2421_v11, %v1436_v44 }
 0xe08   :  { %3491 = vset.pattern.permute.xlu1 %v3848_v51 }
 0xe09   :  { %v2716_v13 = vpop.permute.xlu0 %2715  ;;  %2426 = vperm.xlu1 %3491, %v2423_v12  }
 0xe0a   :  { %v2718_v14 = vmul.f32 %v2716_v13, %v1455_v47 }
 0xe0d   :  { %3492 = vset.pattern.permute.xlu1 %v3850_v24 }
 0xe0e   :  { %2721 = vperm.xlu1 %3492, %v2718_v14  }
 0xe10   :  { %v1749_v52 = vpop.permute.xlu1 %1748 }
 0xe11   :  { %v1751_v15 = vmul.f32 %v1749_v52, %v4560_v25 }
 0xe13   :  { %v1835_v5 = vadd.f32 %v4514_v7, %v1751_v15 }
 0xe83   :  { %v2132_v16 = vpop.permute.xlu1 %2131 }
 0xe84   :  { %v2134_v17 = vmul.f32 %v2132_v16, %v2118_v48 }
 0xe86   :  { %v2135_v18 = vadd.f32 %v2134_v17, %v1835_v5 }
 0xe88   :  { %v2427_v20 = vpop.permute.xlu1 %2426 }
 0xe89   :  { %v2429_v21 = vmul.f32 %v2427_v20, %v2414_v55 }
 0xe8b   :  { %v2430_v22 = vadd.f32 %v2429_v21, %v2135_v18 }
 0xe8d   :  { %v2722_v23 = vpop.permute.xlu1 %2721 }
 0xe8e   :  { %v2724_v49 = vmul.f32 %v2722_v23, %v2709_v19 }
 0xe90   :  { %v2725_v51 = vadd.f32 %v2724_v49, %v2430_v22 }
 0xe92   :  { %v2726_v26 = vpack.c.bf16 %v2725_v51, %v2725_v51 }
 0xe94   :  { %2727 = vst [vmem:[%s4700_s6] sm:$0xf] %v2726_v26 }
 0xe95   :  { %2736 = vsyncpa [#allocation3], 1 }
 0xe96   :  { %2737 = vsyncpa [#allocation5], 1 }
 0xe97   :  { %2738 = vsyncpa [#allocation8], 1 }
 0xe98   :  { %2739 = vsyncpa [#allocation11], 1 }

</bundles_post_ra>
